<compile_context>
chip_gen: v5e
topology: v5e:2x2
jax: 0.10.0
libtpu: 0.0.40
codegen_flags: <defaults>
</compile_context>

<pallas_src>
import math

import jax
import jax.numpy as jnp
from jax.experimental import pallas as pl
from jax.experimental.pallas import tpu as pltpu

W = 28
FLAT = W * W              # 784 real pixels per image
IMG_PAD = 1024            # per-image lane stride inside the kernel (8 * 128)
K1 = 5                    # conv1 / conv2 kernel size

# Slab widths, rounded up to multiples of 128 (lane-dense, whole-vreg slabs).
L1 = 896                  # conv1 slab  (valid flat index 28*y + x   <= 667)
L1P = 768                 # pool1 slab  (valid 56*y + 2*x            <= 638)
L2 = 512                  # conv2 slab  (valid 56*y + 2*x            <= 406)
L2P = 384                 # pool2 slab  (valid 112*y + 4*x           <= 348)

C1_SHIFT = (K1 - 1) * W + (K1 - 1)          # 116  max conv1 tap offset
P1_SHIFT = W + 1                            # 29   max pool1 tap offset
C2_SHIFT = 56 * (K1 - 1) + 2 * (K1 - 1)     # 232  max conv2 tap offset
P2_SHIFT = 58                               #      max pool2 tap offset

# ---- static guards for the "garbage lanes are never consumed" invariants ----
assert C1_SHIFT + L1 <= IMG_PAD             # conv1 windows stay inside the padded row
assert 28 * 23 + 23 + C1_SHIFT < FLAT       # valid conv1 outputs only read real pixels
assert 28 * 23 + 23 < L1                    # valid conv1 outputs fit in the conv1 slab
assert P1_SHIFT + L1P <= L1                 # pool1 windows stay inside the conv1 slab
assert 56 * 11 + 2 * 11 < L1P               # valid pool1 entries fit in the pool1 slab
assert C2_SHIFT + L2 <= L1P                 # conv2 windows stay inside the pool1 slab
assert 56 * 7 + 2 * 7 < L2                  # valid conv2 outputs fit in the conv2 slab
assert P2_SHIFT + L2P <= L2                 # pool2 windows stay inside the conv2 slab
assert 112 * 3 + 4 * 3 < L2P                # valid pool2 entries fit in the pool2 slab


# -----------------------------------------------------------------------------
# The single fused kernel: one grid step processes B_TILE images.
# -----------------------------------------------------------------------------
def _net_kernel(x_ref, w1_ref, b1_ref, w2_ref, b2_ref, w3_ref, b3_ref,
                wf1_ref, bf1_ref, wf2_ref, bf2_ref, o_ref,
                im1_s, im2_s, feat_s):
    f32 = jnp.float32
    cdt = w1_ref.dtype                      # matmul operand dtype (f32 or bf16)
    bt = feat_s.shape[1]                    # images per grid step

    lane = jax.lax.broadcasted_iota(jnp.int32, (1, bt), 1)   # hoisted out of the loop

    def per_image(b, carry):
        # -------- conv1 (1->6, 5x5) as ONE im2col matmul + bias + ReLU --------
        xrow = x_ref[pl.ds(b, 1), :]                                   # (1, 1024)
        for i in range(K1):
            for j in range(K1):
                s = i * W + j
                im1_s[pl.ds(i * K1 + j, 1), :] = xrow[:, s:s + L1]
        a1 = jnp.maximum(
            jnp.dot(w1_ref[...], im1_s[...].astype(cdt),
                    preferred_element_type=f32) + b1_ref[...], 0.0)    # (6, L1)

        # -------- maxpool 2x2: 24x24 -> 12x12 (kept strided at 56y+2x) --------
        p1 = jnp.maximum(
            jnp.maximum(a1[:, 0:L1P], a1[:, 1:1 + L1P]),
            jnp.maximum(a1[:, W:W + L1P], a1[:, W + 1:W + 1 + L1P]))   # (6, L1P)

        # -------- conv2 (6->16, 5x5) as ONE im2col matmul + bias + ReLU -------
        for i in range(K1):
            for j in range(K1):
                t = i * K1 + j
                s = 56 * i + 2 * j
                im2_s[pl.ds(6 * t, 6), :] = p1[:, s:s + L2]
        a2 = jnp.maximum(
            jnp.dot(w2_ref[...], im2_s[...].astype(cdt),
                    preferred_element_type=f32) + b2_ref[...], 0.0)    # (16, L2)

        # -------- maxpool 2x2: 8x8 -> 4x4, fused with the conv3 gather --------
        p2 = jnp.maximum(
            jnp.maximum(a2[:, 0:L2P], a2[:, 2:2 + L2P]),
            jnp.maximum(a2[:, 56:56 + L2P], a2[:, 58:58 + L2P]))       # (16, L2P)
        cols = []
        for yy in range(4):
            for xx in range(4):
                p = 112 * yy + 4 * xx
                cols.append(p2[:, p:p + 1])                            # (16, 1)
        col = jnp.concatenate(cols, axis=0)                            # (256, 1)

        # Write column b of the batched feature matrix with a lane select
        # (full-vreg writes; avoids a dynamic-lane masked store).
        feat_s[...] = jnp.where(lane == b, col, feat_s[...])
        return carry

    jax.lax.fori_loop(0, bt, per_image, 0)

    # -------- batched tail: conv3-as-dense, fc1, fc2, log_softmax -------------
    feats = feat_s[...]                                                # (256, bt)
    u3 = jnp.dot(w3_ref[...], feats.astype(cdt),
                 preferred_element_type=f32) + b3_ref[...]             # (120, bt)
    # (the reference Net applies no ReLU after conv3)
    h1 = jnp.maximum(
        jnp.dot(wf1_ref[...], u3.astype(cdt),
                preferred_element_type=f32) + bf1_ref[...], 0.0)       # (84, bt)
    h2 = jnp.maximum(
        jnp.dot(wf2_ref[...], h1.astype(cdt),
                preferred_element_type=f32) + bf2_ref[...], 0.0)       # (10, bt)
    # NOTE: the reference Net really does ReLU the fc_2 logits before
    # log_softmax (see Net.forward in the PyTorch spec).
    m = jnp.max(h2, axis=0, keepdims=True)
    z = h2 - m
    lse = jnp.log(jnp.sum(jnp.exp(z), axis=0, keepdims=True))
    o_ref[...] = z - lse                                               # (10, bt)


# -----------------------------------------------------------------------------
# Parameters: PyTorch layouts at init, repacked ONCE into kernel layouts.
# -----------------------------------------------------------------------------
def init_params(key):
    ks = jax.random.split(key, 10)
    n = lambda k, s: (0.1 * jax.random.normal(k, s)).astype(jnp.float32)
    return {
        "w1": n(ks[0], (6, 1, 5, 5)),    "b1": n(ks[1], (6,)),
        "w2": n(ks[2], (16, 6, 5, 5)),   "b2": n(ks[3], (16,)),
        "w3": n(ks[4], (120, 16, 4, 4)), "b3": n(ks[5], (120,)),
        "wf1": n(ks[6], (84, 120)),      "bf1": n(ks[7], (84,)),
        "wf2": n(ks[8], (10, 84)),       "bf2": n(ks[9], (10,)),
    }


def prepare_params(p, dtype=jnp.float32):
    """One-time repack of the PyTorch weights into the kernel's im2col layouts.

    `dtype` is the MXU operand dtype (jnp.float32 or jnp.bfloat16); biases stay
    float32 since they are added to the float32 accumulators.
    """
    f32 = jnp.float32
    w = lambda a: a.astype(dtype)
    return {
        # conv1: (6,1,5,5) -> (6, 25), column index = 5*i + j
        "w1": w(p["w1"].reshape(6, 25)),
        # conv2: (16,6,5,5) -> (16, 150), column index = 6*(5*i + j) + c
        "w2": w(jnp.transpose(p["w2"], (0, 2, 3, 1)).reshape(16, 150)),
        # conv3 == dense over 256 features, index = 16*(4*i + j) + c
        "w3": w(jnp.transpose(p["w3"], (0, 2, 3, 1)).reshape(120, 256)),
        "wf1": w(p["wf1"]),                       # (84, 120) = (out, in)
        "wf2": w(p["wf2"]),                       # (10, 84)
        "b1": p["b1"].astype(f32).reshape(6, 1),
        "b2": p["b2"].astype(f32).reshape(16, 1),
        "b3": p["b3"].astype(f32).reshape(120, 1),
        "bf1": p["bf1"].astype(f32).reshape(84, 1),
        "bf2": p["bf2"].astype(f32).reshape(10, 1),
    }


# -----------------------------------------------------------------------------
# Forward pass: one pallas_call for the whole network, B_TILE images per step.
# -----------------------------------------------------------------------------
def net_forward(kp, x, *, b_tile=128):
    """x: NCHW (B, 1, 28, 28) float32 -> log-probabilities (B, 10).

    b_tile: images per grid step.  Use a multiple of 128 (256 on v6e/v7x) for
    real batches so the tail matmuls fill the MXU N dimension; with >= 2 tiles
    the "parallel" grid axis spreads tiles over both v7x TensorCores.
    """
    B = x.shape[0]
    bt = min(b_tile, B)
    n_tiles = math.ceil(B / bt)
    Bp = n_tiles * bt

    # Host-side glue only: flatten, zero-pad each image row to 1024 lanes and
    # the batch to a multiple of the tile, then group into tiles.
    xf = x.reshape(B, FLAT).astype(jnp.float32)
    xf = jnp.pad(xf, ((0, Bp - B), (0, IMG_PAD - FLAT)))
    xf = xf.reshape(n_tiles, bt, IMG_PAD)

    out = pl.pallas_call(
        _net_kernel,
        out_shape=jax.ShapeDtypeStruct((n_tiles, 10, bt), jnp.float32),
        grid=(n_tiles,),
        in_specs=[
            pl.BlockSpec((None, bt, IMG_PAD), lambda t: (t, 0, 0)),  # image tile
            pl.BlockSpec((6, 25),    lambda t: (0, 0)),   # conv1 w (resident)
            pl.BlockSpec((6, 1),     lambda t: (0, 0)),   # conv1 b
            pl.BlockSpec((16, 150),  lambda t: (0, 0)),   # conv2 w
            pl.BlockSpec((16, 1),    lambda t: (0, 0)),   # conv2 b
            pl.BlockSpec((120, 256), lambda t: (0, 0)),   # conv3 w
            pl.BlockSpec((120, 1),   lambda t: (0, 0)),   # conv3 b
            pl.BlockSpec((84, 120),  lambda t: (0, 0)),   # fc1 w
            pl.BlockSpec((84, 1),    lambda t: (0, 0)),   # fc1 b
            pl.BlockSpec((10, 84),   lambda t: (0, 0)),   # fc2 w
            pl.BlockSpec((10, 1),    lambda t: (0, 0)),   # fc2 b
        ],
        out_specs=pl.BlockSpec((None, 10, bt), lambda t: (t, 0, 0)),
        scratch_shapes=[
            pltpu.VMEM((K1 * K1, L1), jnp.float32),       # conv1 im2col slab
            pltpu.VMEM((K1 * K1 * 6, L2), jnp.float32),   # conv2 im2col slab
            pltpu.VMEM((256, bt), jnp.float32),           # batched conv3 features
        ],
        compiler_params=pltpu.CompilerParams(
            dimension_semantics=("parallel",),            # tiles across v7x TCs
        ),
    )(xf, kp["w1"], kp["b1"], kp["w2"], kp["b2"], kp["w3"], kp["b3"],
      kp["wf1"], kp["bf1"], kp["wf2"], kp["bf2"])

    # (n_tiles, 10, bt) -> (B, 10)
    return out.transpose(0, 2, 1).reshape(Bp, 10)[:B]


# -----------------------------------------------------------------------------
# Pure-XLA reference of the PyTorch module (validation only).
# -----------------------------------------------------------------------------
def _reference_forward(params, x):
    dn = ("NCHW", "OIHW", "NCHW")

    def conv(u, w, b):
        return jax.lax.conv_general_dilated(
            u, w, (1, 1), "VALID", dimension_numbers=dn
        ) + b[None, :, None, None]

    def pool(u):
        return jnp.maximum(
            jnp.maximum(u[:, :, 0::2, 0::2], u[:, :, 0::2, 1::2]),
            jnp.maximum(u[:, :, 1::2, 0::2], u[:, :, 1::2, 1::2]))

    u = pool(jax.nn.relu(conv(x, params["w1"], params["b1"])))
    u = pool(jax.nn.relu(conv(u, params["w2"], params["b2"])))
    u = conv(u, params["w3"], params["b3"]).reshape(x.shape[0], -1)
    u = jax.nn.relu(u @ params["wf1"].T + params["bf1"])
    u = jax.nn.relu(u @ params["wf2"].T + params["bf2"])
    return jax.nn.log_softmax(u, axis=-1)


if __name__ == "__main__":
    key = jax.random.PRNGKey(0)
    kx, kp_key = jax.random.split(key)
    # The architecture requires 28x28 inputs (28 -> 24 -> 12 -> 8 -> 4 -> 1).
    x = jax.random.normal(kx, (8, 1, 28, 28), dtype=jnp.float32)

    params = init_params(kp_key)
    y_ref = jax.block_until_ready(_reference_forward(params, x))

    # ---- f32 matmul path, 2 grid tiles of 4 images (exercises multi-tile) ----
    kp32 = prepare_params(params, jnp.float32)
    fwd32 = jax.jit(lambda p, u: net_forward(p, u, b_tile=4))
    y = jax.block_until_ready(fwd32(kp32, x))
    assert y.shape == (8, 10) and y.dtype == jnp.float32
    assert bool(jnp.all(jnp.abs(jnp.sum(jnp.exp(y), axis=1) - 1.0) < 1e-4))
    assert bool(jnp.allclose(y, y_ref, atol=2e-3, rtol=2e-3)), (
        "f32 max abs err = %g" % float(jnp.max(jnp.abs(y - y_ref))))

    # ---- bf16 matmul-operand path (v6e/v7x MXU-native), single tile ----------
    kpbf = prepare_params(params, jnp.bfloat16)
    fwdbf = jax.jit(lambda p, u: net_forward(p, u, b_tile=8))
    ybf = jax.block_until_ready(fwdbf(kpbf, x))
    assert bool(jnp.allclose(ybf, y_ref, atol=5e-2, rtol=5e-2)), (
        "bf16 max abs err = %g" % float(jnp.max(jnp.abs(ybf - y_ref))))

    print("KERNEL_OK")
</pallas_src>

<mosaic_0001>
module attributes {stable_mosaic.version = 11 : i64} {
  func.func @_net_kernel(%arg0: i32, %arg1: memref<1x4x1024xf32, #tpu.memory_space<vmem>>, %arg2: memref<6x25xf32, #tpu.memory_space<vmem>>, %arg3: memref<6x1xf32, #tpu.memory_space<vmem>>, %arg4: memref<16x150xf32, #tpu.memory_space<vmem>>, %arg5: memref<16x1xf32, #tpu.memory_space<vmem>>, %arg6: memref<120x256xf32, #tpu.memory_space<vmem>>, %arg7: memref<120x1xf32, #tpu.memory_space<vmem>>, %arg8: memref<84x120xf32, #tpu.memory_space<vmem>>, %arg9: memref<84x1xf32, #tpu.memory_space<vmem>>, %arg10: memref<10x84xf32, #tpu.memory_space<vmem>>, %arg11: memref<10x1xf32, #tpu.memory_space<vmem>>, %arg12: memref<1x10x4xf32, #tpu.memory_space<vmem>>, %arg13: memref<25x896xf32, #tpu.memory_space<vmem>>, %arg14: memref<150x512xf32, #tpu.memory_space<vmem>>, %arg15: memref<256x4xf32, #tpu.memory_space<vmem>>) attributes {dimension_semantics = [#tpu.dimension_semantics<parallel>], iteration_bounds = array<i64: 2>, scalar_prefetch = 0 : i64, scratch_operands = 3 : i64, tpu.core_type = #tpu.core_type<tc>, window_params = [{transform_indices = @transform_0, window_bounds = array<i64: 1, 4, 1024>}, {pipeline_mode = #tpu.pipeline_mode<synchronous>, transform_indices = @transform_1, window_bounds = array<i64: 6, 25>}, {pipeline_mode = #tpu.pipeline_mode<synchronous>, transform_indices = @transform_2, window_bounds = array<i64: 6, 1>}, {pipeline_mode = #tpu.pipeline_mode<synchronous>, transform_indices = @transform_3, window_bounds = array<i64: 16, 150>}, {pipeline_mode = #tpu.pipeline_mode<synchronous>, transform_indices = @transform_4, window_bounds = array<i64: 16, 1>}, {pipeline_mode = #tpu.pipeline_mode<synchronous>, transform_indices = @transform_5, window_bounds = array<i64: 120, 256>}, {pipeline_mode = #tpu.pipeline_mode<synchronous>, transform_indices = @transform_6, window_bounds = array<i64: 120, 1>}, {pipeline_mode = #tpu.pipeline_mode<synchronous>, transform_indices = @transform_7, window_bounds = array<i64: 84, 120>}, {pipeline_mode = #tpu.pipeline_mode<synchronous>, transform_indices = @transform_8, window_bounds = array<i64: 84, 1>}, {pipeline_mode = #tpu.pipeline_mode<synchronous>, transform_indices = @transform_9, window_bounds = array<i64: 10, 84>}, {pipeline_mode = #tpu.pipeline_mode<synchronous>, transform_indices = @transform_10, window_bounds = array<i64: 10, 1>}, {transform_indices = @transform_11, window_bounds = array<i64: 1, 10, 4>}]} {
    %0 = tpu.iota {dimensions = array<i32: 1>} : vector<1x4xi32>
    %c0_i32 = arith.constant 0 : i32
    %c4_i32 = arith.constant 4 : i32
    %1 = arith.addi %c0_i32, %c4_i32 : i32
    %c1_i32 = arith.constant 1 : i32
    scf.for %arg16 = %c0_i32 to %1 step %c1_i32  : i32 {
      %c0_23 = arith.constant 0 : index
      %35 = arith.index_cast %arg16 : i32 to index
      %c0_24 = arith.constant 0 : index
      %36 = vector.load %arg1[%c0_23, %35, %c0_24] : memref<1x4x1024xf32, #tpu.memory_space<vmem>>, vector<1x1x1024xf32>
      %37 = vector.shape_cast %36 : vector<1x1x1024xf32> to vector<1x1024xf32>
      %38 = vector.extract_strided_slice %37 {offsets = [0, 0], sizes = [1, 896], strides = [1, 1]} : vector<1x1024xf32> to vector<1x896xf32>
      %c0_25 = arith.constant 0 : index
      %c0_26 = arith.constant 0 : index
      %39 = vector.load %arg13[%c0_25, %c0_26] : memref<25x896xf32, #tpu.memory_space<vmem>>, vector<1x896xf32>
      tpu.vector_store %arg13[%c0_25, %c0_26], %38 {strides = array<i32>} : memref<25x896xf32, #tpu.memory_space<vmem>>, vector<1x896xf32>,
      %40 = vector.extract_strided_slice %37 {offsets = [0, 1], sizes = [1, 896], strides = [1, 1]} : vector<1x1024xf32> to vector<1x896xf32>
      %c1 = arith.constant 1 : index
      %c0_27 = arith.constant 0 : index
      %41 = vector.load %arg13[%c1, %c0_27] : memref<25x896xf32, #tpu.memory_space<vmem>>, vector<1x896xf32>
      tpu.vector_store %arg13[%c1, %c0_27], %40 {strides = array<i32>} : memref<25x896xf32, #tpu.memory_space<vmem>>, vector<1x896xf32>,
      %42 = vector.extract_strided_slice %37 {offsets = [0, 2], sizes = [1, 896], strides = [1, 1]} : vector<1x1024xf32> to vector<1x896xf32>
      %c2 = arith.constant 2 : index
      %c0_28 = arith.constant 0 : index
      %43 = vector.load %arg13[%c2, %c0_28] : memref<25x896xf32, #tpu.memory_space<vmem>>, vector<1x896xf32>
      tpu.vector_store %arg13[%c2, %c0_28], %42 {strides = array<i32>} : memref<25x896xf32, #tpu.memory_space<vmem>>, vector<1x896xf32>,
      %44 = vector.extract_strided_slice %37 {offsets = [0, 3], sizes = [1, 896], strides = [1, 1]} : vector<1x1024xf32> to vector<1x896xf32>
      %c3 = arith.constant 3 : index
      %c0_29 = arith.constant 0 : index
      %45 = vector.load %arg13[%c3, %c0_29] : memref<25x896xf32, #tpu.memory_space<vmem>>, vector<1x896xf32>
      tpu.vector_store %arg13[%c3, %c0_29], %44 {strides = array<i32>} : memref<25x896xf32, #tpu.memory_space<vmem>>, vector<1x896xf32>,
      %46 = vector.extract_strided_slice %37 {offsets = [0, 4], sizes = [1, 896], strides = [1, 1]} : vector<1x1024xf32> to vector<1x896xf32>
      %c4 = arith.constant 4 : index
      %c0_30 = arith.constant 0 : index
      %47 = vector.load %arg13[%c4, %c0_30] : memref<25x896xf32, #tpu.memory_space<vmem>>, vector<1x896xf32>
      tpu.vector_store %arg13[%c4, %c0_30], %46 {strides = array<i32>} : memref<25x896xf32, #tpu.memory_space<vmem>>, vector<1x896xf32>,
      %48 = vector.extract_strided_slice %37 {offsets = [0, 28], sizes = [1, 896], strides = [1, 1]} : vector<1x1024xf32> to vector<1x896xf32>
      %c5 = arith.constant 5 : index
      %c0_31 = arith.constant 0 : index
      %49 = vector.load %arg13[%c5, %c0_31] : memref<25x896xf32, #tpu.memory_space<vmem>>, vector<1x896xf32>
      tpu.vector_store %arg13[%c5, %c0_31], %48 {strides = array<i32>} : memref<25x896xf32, #tpu.memory_space<vmem>>, vector<1x896xf32>,
      %50 = vector.extract_strided_slice %37 {offsets = [0, 29], sizes = [1, 896], strides = [1, 1]} : vector<1x1024xf32> to vector<1x896xf32>
      %c6 = arith.constant 6 : index
      %c0_32 = arith.constant 0 : index
      %51 = vector.load %arg13[%c6, %c0_32] : memref<25x896xf32, #tpu.memory_space<vmem>>, vector<1x896xf32>
      tpu.vector_store %arg13[%c6, %c0_32], %50 {strides = array<i32>} : memref<25x896xf32, #tpu.memory_space<vmem>>, vector<1x896xf32>,
      %52 = vector.extract_strided_slice %37 {offsets = [0, 30], sizes = [1, 896], strides = [1, 1]} : vector<1x1024xf32> to vector<1x896xf32>
      %c7 = arith.constant 7 : index
      %c0_33 = arith.constant 0 : index
      %53 = vector.load %arg13[%c7, %c0_33] : memref<25x896xf32, #tpu.memory_space<vmem>>, vector<1x896xf32>
      tpu.vector_store %arg13[%c7, %c0_33], %52 {strides = array<i32>} : memref<25x896xf32, #tpu.memory_space<vmem>>, vector<1x896xf32>,
      %54 = vector.extract_strided_slice %37 {offsets = [0, 31], sizes = [1, 896], strides = [1, 1]} : vector<1x1024xf32> to vector<1x896xf32>
      %c8 = arith.constant 8 : index
      %c0_34 = arith.constant 0 : index
      %55 = vector.load %arg13[%c8, %c0_34] : memref<25x896xf32, #tpu.memory_space<vmem>>, vector<1x896xf32>
      tpu.vector_store %arg13[%c8, %c0_34], %54 {strides = array<i32>} : memref<25x896xf32, #tpu.memory_space<vmem>>, vector<1x896xf32>,
      %56 = vector.extract_strided_slice %37 {offsets = [0, 32], sizes = [1, 896], strides = [1, 1]} : vector<1x1024xf32> to vector<1x896xf32>
      %c9 = arith.constant 9 : index
      %c0_35 = arith.constant 0 : index
      %57 = vector.load %arg13[%c9, %c0_35] : memref<25x896xf32, #tpu.memory_space<vmem>>, vector<1x896xf32>
      tpu.vector_store %arg13[%c9, %c0_35], %56 {strides = array<i32>} : memref<25x896xf32, #tpu.memory_space<vmem>>, vector<1x896xf32>,
      %58 = vector.extract_strided_slice %37 {offsets = [0, 56], sizes = [1, 896], strides = [1, 1]} : vector<1x1024xf32> to vector<1x896xf32>
      %c10 = arith.constant 10 : index
      %c0_36 = arith.constant 0 : index
      %59 = vector.load %arg13[%c10, %c0_36] : memref<25x896xf32, #tpu.memory_space<vmem>>, vector<1x896xf32>
      tpu.vector_store %arg13[%c10, %c0_36], %58 {strides = array<i32>} : memref<25x896xf32, #tpu.memory_space<vmem>>, vector<1x896xf32>,
      %60 = vector.extract_strided_slice %37 {offsets = [0, 57], sizes = [1, 896], strides = [1, 1]} : vector<1x1024xf32> to vector<1x896xf32>
      %c11 = arith.constant 11 : index
      %c0_37 = arith.constant 0 : index
      %61 = vector.load %arg13[%c11, %c0_37] : memref<25x896xf32, #tpu.memory_space<vmem>>, vector<1x896xf32>
      tpu.vector_store %arg13[%c11, %c0_37], %60 {strides = array<i32>} : memref<25x896xf32, #tpu.memory_space<vmem>>, vector<1x896xf32>,
      %62 = vector.extract_strided_slice %37 {offsets = [0, 58], sizes = [1, 896], strides = [1, 1]} : vector<1x1024xf32> to vector<1x896xf32>
      %c12 = arith.constant 12 : index
      %c0_38 = arith.constant 0 : index
      %63 = vector.load %arg13[%c12, %c0_38] : memref<25x896xf32, #tpu.memory_space<vmem>>, vector<1x896xf32>
      tpu.vector_store %arg13[%c12, %c0_38], %62 {strides = array<i32>} : memref<25x896xf32, #tpu.memory_space<vmem>>, vector<1x896xf32>,
      %64 = vector.extract_strided_slice %37 {offsets = [0, 59], sizes = [1, 896], strides = [1, 1]} : vector<1x1024xf32> to vector<1x896xf32>
      %c13 = arith.constant 13 : index
      %c0_39 = arith.constant 0 : index
      %65 = vector.load %arg13[%c13, %c0_39] : memref<25x896xf32, #tpu.memory_space<vmem>>, vector<1x896xf32>
      tpu.vector_store %arg13[%c13, %c0_39], %64 {strides = array<i32>} : memref<25x896xf32, #tpu.memory_space<vmem>>, vector<1x896xf32>,
      %66 = vector.extract_strided_slice %37 {offsets = [0, 60], sizes = [1, 896], strides = [1, 1]} : vector<1x1024xf32> to vector<1x896xf32>
      %c14 = arith.constant 14 : index
      %c0_40 = arith.constant 0 : index
      %67 = vector.load %arg13[%c14, %c0_40] : memref<25x896xf32, #tpu.memory_space<vmem>>, vector<1x896xf32>
      tpu.vector_store %arg13[%c14, %c0_40], %66 {strides = array<i32>} : memref<25x896xf32, #tpu.memory_space<vmem>>, vector<1x896xf32>,
      %68 = vector.extract_strided_slice %37 {offsets = [0, 84], sizes = [1, 896], strides = [1, 1]} : vector<1x1024xf32> to vector<1x896xf32>
      %c15 = arith.constant 15 : index
      %c0_41 = arith.constant 0 : index
      %69 = vector.load %arg13[%c15, %c0_41] : memref<25x896xf32, #tpu.memory_space<vmem>>, vector<1x896xf32>
      tpu.vector_store %arg13[%c15, %c0_41], %68 {strides = array<i32>} : memref<25x896xf32, #tpu.memory_space<vmem>>, vector<1x896xf32>,
      %70 = vector.extract_strided_slice %37 {offsets = [0, 85], sizes = [1, 896], strides = [1, 1]} : vector<1x1024xf32> to vector<1x896xf32>
      %c16 = arith.constant 16 : index
      %c0_42 = arith.constant 0 : index
      %71 = vector.load %arg13[%c16, %c0_42] : memref<25x896xf32, #tpu.memory_space<vmem>>, vector<1x896xf32>
      tpu.vector_store %arg13[%c16, %c0_42], %70 {strides = array<i32>} : memref<25x896xf32, #tpu.memory_space<vmem>>, vector<1x896xf32>,
      %72 = vector.extract_strided_slice %37 {offsets = [0, 86], sizes = [1, 896], strides = [1, 1]} : vector<1x1024xf32> to vector<1x896xf32>
      %c17 = arith.constant 17 : index
      %c0_43 = arith.constant 0 : index
      %73 = vector.load %arg13[%c17, %c0_43] : memref<25x896xf32, #tpu.memory_space<vmem>>, vector<1x896xf32>
      tpu.vector_store %arg13[%c17, %c0_43], %72 {strides = array<i32>} : memref<25x896xf32, #tpu.memory_space<vmem>>, vector<1x896xf32>,
      %74 = vector.extract_strided_slice %37 {offsets = [0, 87], sizes = [1, 896], strides = [1, 1]} : vector<1x1024xf32> to vector<1x896xf32>
      %c18 = arith.constant 18 : index
      %c0_44 = arith.constant 0 : index
      %75 = vector.load %arg13[%c18, %c0_44] : memref<25x896xf32, #tpu.memory_space<vmem>>, vector<1x896xf32>
      tpu.vector_store %arg13[%c18, %c0_44], %74 {strides = array<i32>} : memref<25x896xf32, #tpu.memory_space<vmem>>, vector<1x896xf32>,
      %76 = vector.extract_strided_slice %37 {offsets = [0, 88], sizes = [1, 896], strides = [1, 1]} : vector<1x1024xf32> to vector<1x896xf32>
      %c19 = arith.constant 19 : index
      %c0_45 = arith.constant 0 : index
      %77 = vector.load %arg13[%c19, %c0_45] : memref<25x896xf32, #tpu.memory_space<vmem>>, vector<1x896xf32>
      tpu.vector_store %arg13[%c19, %c0_45], %76 {strides = array<i32>} : memref<25x896xf32, #tpu.memory_space<vmem>>, vector<1x896xf32>,
      %78 = vector.extract_strided_slice %37 {offsets = [0, 112], sizes = [1, 896], strides = [1, 1]} : vector<1x1024xf32> to vector<1x896xf32>
      %c20 = arith.constant 20 : index
      %c0_46 = arith.constant 0 : index
      %79 = vector.load %arg13[%c20, %c0_46] : memref<25x896xf32, #tpu.memory_space<vmem>>, vector<1x896xf32>
      tpu.vector_store %arg13[%c20, %c0_46], %78 {strides = array<i32>} : memref<25x896xf32, #tpu.memory_space<vmem>>, vector<1x896xf32>,
      %80 = vector.extract_strided_slice %37 {offsets = [0, 113], sizes = [1, 896], strides = [1, 1]} : vector<1x1024xf32> to vector<1x896xf32>
      %c21 = arith.constant 21 : index
      %c0_47 = arith.constant 0 : index
      %81 = vector.load %arg13[%c21, %c0_47] : memref<25x896xf32, #tpu.memory_space<vmem>>, vector<1x896xf32>
      tpu.vector_store %arg13[%c21, %c0_47], %80 {strides = array<i32>} : memref<25x896xf32, #tpu.memory_space<vmem>>, vector<1x896xf32>,
      %82 = vector.extract_strided_slice %37 {offsets = [0, 114], sizes = [1, 896], strides = [1, 1]} : vector<1x1024xf32> to vector<1x896xf32>
      %c22 = arith.constant 22 : index
      %c0_48 = arith.constant 0 : index
      %83 = vector.load %arg13[%c22, %c0_48] : memref<25x896xf32, #tpu.memory_space<vmem>>, vector<1x896xf32>
      tpu.vector_store %arg13[%c22, %c0_48], %82 {strides = array<i32>} : memref<25x896xf32, #tpu.memory_space<vmem>>, vector<1x896xf32>,
      %84 = vector.extract_strided_slice %37 {offsets = [0, 115], sizes = [1, 896], strides = [1, 1]} : vector<1x1024xf32> to vector<1x896xf32>
      %c23 = arith.constant 23 : index
      %c0_49 = arith.constant 0 : index
      %85 = vector.load %arg13[%c23, %c0_49] : memref<25x896xf32, #tpu.memory_space<vmem>>, vector<1x896xf32>
      tpu.vector_store %arg13[%c23, %c0_49], %84 {strides = array<i32>} : memref<25x896xf32, #tpu.memory_space<vmem>>, vector<1x896xf32>,
      %86 = vector.extract_strided_slice %37 {offsets = [0, 116], sizes = [1, 896], strides = [1, 1]} : vector<1x1024xf32> to vector<1x896xf32>
      %c24 = arith.constant 24 : index
      %c0_50 = arith.constant 0 : index
      %87 = vector.load %arg13[%c24, %c0_50] : memref<25x896xf32, #tpu.memory_space<vmem>>, vector<1x896xf32>
      tpu.vector_store %arg13[%c24, %c0_50], %86 {strides = array<i32>} : memref<25x896xf32, #tpu.memory_space<vmem>>, vector<1x896xf32>,
      %c0_51 = arith.constant 0 : index
      %c0_52 = arith.constant 0 : index
      %88 = vector.load %arg2[%c0_51, %c0_52] : memref<6x25xf32, #tpu.memory_space<vmem>>, vector<6x25xf32>
      %c0_53 = arith.constant 0 : index
      %c0_54 = arith.constant 0 : index
      %89 = vector.load %arg13[%c0_53, %c0_54] : memref<25x896xf32, #tpu.memory_space<vmem>>, vector<25x896xf32>
      %cst_55 = arith.constant dense<0.000000e+00> : vector<6x896xf32>
      %90 = tpu.matmul %88, %89, %cst_55 {dimension_numbers = #tpu.dot_dimension_numbers<[1], [0], [0], [1], [0, 0, 1, 1], [], []>} : vector<6x25xf32>, vector<25x896xf32>, vector<6x896xf32> -> vector<6x896xf32>
      %c0_56 = arith.constant 0 : index
      %c0_57 = arith.constant 0 : index
      %91 = vector.load %arg3[%c0_56, %c0_57] : memref<6x1xf32, #tpu.memory_space<vmem>>, vector<6x1xf32>
      %92 = vector.broadcast %91 : vector<6x1xf32> to vector<6x896xf32>
      %93 = arith.addf %90, %92 : vector<6x896xf32>
      %cst_58 = arith.constant 0.000000e+00 : f32
      %94 = vector.broadcast %cst_58 : f32 to vector<6x896xf32>
      %95 = arith.maximumf %93, %94 : vector<6x896xf32>
      %96 = vector.extract_strided_slice %95 {offsets = [0, 0], sizes = [6, 768], strides = [1, 1]} : vector<6x896xf32> to vector<6x768xf32>
      %97 = vector.extract_strided_slice %95 {offsets = [0, 1], sizes = [6, 768], strides = [1, 1]} : vector<6x896xf32> to vector<6x768xf32>
      %98 = arith.maximumf %96, %97 : vector<6x768xf32>
      %99 = vector.extract_strided_slice %95 {offsets = [0, 28], sizes = [6, 768], strides = [1, 1]} : vector<6x896xf32> to vector<6x768xf32>
      %100 = vector.extract_strided_slice %95 {offsets = [0, 29], sizes = [6, 768], strides = [1, 1]} : vector<6x896xf32> to vector<6x768xf32>
      %101 = arith.maximumf %99, %100 : vector<6x768xf32>
      %102 = arith.maximumf %98, %101 : vector<6x768xf32>
      %103 = vector.extract_strided_slice %102 {offsets = [0, 0], sizes = [6, 512], strides = [1, 1]} : vector<6x768xf32> to vector<6x512xf32>
      %c0_59 = arith.constant 0 : index
      %c0_60 = arith.constant 0 : index
      %104 = vector.load %arg14[%c0_59, %c0_60] : memref<150x512xf32, #tpu.memory_space<vmem>>, vector<6x512xf32>
      tpu.vector_store %arg14[%c0_59, %c0_60], %103 {strides = array<i32>} : memref<150x512xf32, #tpu.memory_space<vmem>>, vector<6x512xf32>,
      %105 = vector.extract_strided_slice %102 {offsets = [0, 2], sizes = [6, 512], strides = [1, 1]} : vector<6x768xf32> to vector<6x512xf32>
      %c6_61 = arith.constant 6 : index
      %c0_62 = arith.constant 0 : index
      %106 = vector.load %arg14[%c6_61, %c0_62] : memref<150x512xf32, #tpu.memory_space<vmem>>, vector<6x512xf32>
      tpu.vector_store %arg14[%c6_61, %c0_62], %105 {strides = array<i32>} : memref<150x512xf32, #tpu.memory_space<vmem>>, vector<6x512xf32>,
      %107 = vector.extract_strided_slice %102 {offsets = [0, 4], sizes = [6, 512], strides = [1, 1]} : vector<6x768xf32> to vector<6x512xf32>
      %c12_63 = arith.constant 12 : index
      %c0_64 = arith.constant 0 : index
      %108 = vector.load %arg14[%c12_63, %c0_64] : memref<150x512xf32, #tpu.memory_space<vmem>>, vector<6x512xf32>
      tpu.vector_store %arg14[%c12_63, %c0_64], %107 {strides = array<i32>} : memref<150x512xf32, #tpu.memory_space<vmem>>, vector<6x512xf32>,
      %109 = vector.extract_strided_slice %102 {offsets = [0, 6], sizes = [6, 512], strides = [1, 1]} : vector<6x768xf32> to vector<6x512xf32>
      %c18_65 = arith.constant 18 : index
      %c0_66 = arith.constant 0 : index
      %110 = vector.load %arg14[%c18_65, %c0_66] : memref<150x512xf32, #tpu.memory_space<vmem>>, vector<6x512xf32>
      tpu.vector_store %arg14[%c18_65, %c0_66], %109 {strides = array<i32>} : memref<150x512xf32, #tpu.memory_space<vmem>>, vector<6x512xf32>,
      %111 = vector.extract_strided_slice %102 {offsets = [0, 8], sizes = [6, 512], strides = [1, 1]} : vector<6x768xf32> to vector<6x512xf32>
      %c24_67 = arith.constant 24 : index
      %c0_68 = arith.constant 0 : index
      %112 = vector.load %arg14[%c24_67, %c0_68] : memref<150x512xf32, #tpu.memory_space<vmem>>, vector<6x512xf32>
      tpu.vector_store %arg14[%c24_67, %c0_68], %111 {strides = array<i32>} : memref<150x512xf32, #tpu.memory_space<vmem>>, vector<6x512xf32>,
      %113 = vector.extract_strided_slice %102 {offsets = [0, 56], sizes = [6, 512], strides = [1, 1]} : vector<6x768xf32> to vector<6x512xf32>
      %c30 = arith.constant 30 : index
      %c0_69 = arith.constant 0 : index
      %114 = vector.load %arg14[%c30, %c0_69] : memref<150x512xf32, #tpu.memory_space<vmem>>, vector<6x512xf32>
      tpu.vector_store %arg14[%c30, %c0_69], %113 {strides = array<i32>} : memref<150x512xf32, #tpu.memory_space<vmem>>, vector<6x512xf32>,
      %115 = vector.extract_strided_slice %102 {offsets = [0, 58], sizes = [6, 512], strides = [1, 1]} : vector<6x768xf32> to vector<6x512xf32>
      %c36 = arith.constant 36 : index
      %c0_70 = arith.constant 0 : index
      %116 = vector.load %arg14[%c36, %c0_70] : memref<150x512xf32, #tpu.memory_space<vmem>>, vector<6x512xf32>
      tpu.vector_store %arg14[%c36, %c0_70], %115 {strides = array<i32>} : memref<150x512xf32, #tpu.memory_space<vmem>>, vector<6x512xf32>,
      %117 = vector.extract_strided_slice %102 {offsets = [0, 60], sizes = [6, 512], strides = [1, 1]} : vector<6x768xf32> to vector<6x512xf32>
      %c42 = arith.constant 42 : index
      %c0_71 = arith.constant 0 : index
      %118 = vector.load %arg14[%c42, %c0_71] : memref<150x512xf32, #tpu.memory_space<vmem>>, vector<6x512xf32>
      tpu.vector_store %arg14[%c42, %c0_71], %117 {strides = array<i32>} : memref<150x512xf32, #tpu.memory_space<vmem>>, vector<6x512xf32>,
      %119 = vector.extract_strided_slice %102 {offsets = [0, 62], sizes = [6, 512], strides = [1, 1]} : vector<6x768xf32> to vector<6x512xf32>
      %c48 = arith.constant 48 : index
      %c0_72 = arith.constant 0 : index
      %120 = vector.load %arg14[%c48, %c0_72] : memref<150x512xf32, #tpu.memory_space<vmem>>, vector<6x512xf32>
      tpu.vector_store %arg14[%c48, %c0_72], %119 {strides = array<i32>} : memref<150x512xf32, #tpu.memory_space<vmem>>, vector<6x512xf32>,
      %121 = vector.extract_strided_slice %102 {offsets = [0, 64], sizes = [6, 512], strides = [1, 1]} : vector<6x768xf32> to vector<6x512xf32>
      %c54 = arith.constant 54 : index
      %c0_73 = arith.constant 0 : index
      %122 = vector.load %arg14[%c54, %c0_73] : memref<150x512xf32, #tpu.memory_space<vmem>>, vector<6x512xf32>
      tpu.vector_store %arg14[%c54, %c0_73], %121 {strides = array<i32>} : memref<150x512xf32, #tpu.memory_space<vmem>>, vector<6x512xf32>,
      %123 = vector.extract_strided_slice %102 {offsets = [0, 112], sizes = [6, 512], strides = [1, 1]} : vector<6x768xf32> to vector<6x512xf32>
      %c60 = arith.constant 60 : index
      %c0_74 = arith.constant 0 : index
      %124 = vector.load %arg14[%c60, %c0_74] : memref<150x512xf32, #tpu.memory_space<vmem>>, vector<6x512xf32>
      tpu.vector_store %arg14[%c60, %c0_74], %123 {strides = array<i32>} : memref<150x512xf32, #tpu.memory_space<vmem>>, vector<6x512xf32>,
      %125 = vector.extract_strided_slice %102 {offsets = [0, 114], sizes = [6, 512], strides = [1, 1]} : vector<6x768xf32> to vector<6x512xf32>
      %c66 = arith.constant 66 : index
      %c0_75 = arith.constant 0 : index
      %126 = vector.load %arg14[%c66, %c0_75] : memref<150x512xf32, #tpu.memory_space<vmem>>, vector<6x512xf32>
      tpu.vector_store %arg14[%c66, %c0_75], %125 {strides = array<i32>} : memref<150x512xf32, #tpu.memory_space<vmem>>, vector<6x512xf32>,
      %127 = vector.extract_strided_slice %102 {offsets = [0, 116], sizes = [6, 512], strides = [1, 1]} : vector<6x768xf32> to vector<6x512xf32>
      %c72 = arith.constant 72 : index
      %c0_76 = arith.constant 0 : index
      %128 = vector.load %arg14[%c72, %c0_76] : memref<150x512xf32, #tpu.memory_space<vmem>>, vector<6x512xf32>
      tpu.vector_store %arg14[%c72, %c0_76], %127 {strides = array<i32>} : memref<150x512xf32, #tpu.memory_space<vmem>>, vector<6x512xf32>,
      %129 = vector.extract_strided_slice %102 {offsets = [0, 118], sizes = [6, 512], strides = [1, 1]} : vector<6x768xf32> to vector<6x512xf32>
      %c78 = arith.constant 78 : index
      %c0_77 = arith.constant 0 : index
      %130 = vector.load %arg14[%c78, %c0_77] : memref<150x512xf32, #tpu.memory_space<vmem>>, vector<6x512xf32>
      tpu.vector_store %arg14[%c78, %c0_77], %129 {strides = array<i32>} : memref<150x512xf32, #tpu.memory_space<vmem>>, vector<6x512xf32>,
      %131 = vector.extract_strided_slice %102 {offsets = [0, 120], sizes = [6, 512], strides = [1, 1]} : vector<6x768xf32> to vector<6x512xf32>
      %c84 = arith.constant 84 : index
      %c0_78 = arith.constant 0 : index
      %132 = vector.load %arg14[%c84, %c0_78] : memref<150x512xf32, #tpu.memory_space<vmem>>, vector<6x512xf32>
      tpu.vector_store %arg14[%c84, %c0_78], %131 {strides = array<i32>} : memref<150x512xf32, #tpu.memory_space<vmem>>, vector<6x512xf32>,
      %133 = vector.extract_strided_slice %102 {offsets = [0, 168], sizes = [6, 512], strides = [1, 1]} : vector<6x768xf32> to vector<6x512xf32>
      %c90 = arith.constant 90 : index
      %c0_79 = arith.constant 0 : index
      %134 = vector.load %arg14[%c90, %c0_79] : memref<150x512xf32, #tpu.memory_space<vmem>>, vector<6x512xf32>
      tpu.vector_store %arg14[%c90, %c0_79], %133 {strides = array<i32>} : memref<150x512xf32, #tpu.memory_space<vmem>>, vector<6x512xf32>,
      %135 = vector.extract_strided_slice %102 {offsets = [0, 170], sizes = [6, 512], strides = [1, 1]} : vector<6x768xf32> to vector<6x512xf32>
      %c96 = arith.constant 96 : index
      %c0_80 = arith.constant 0 : index
      %136 = vector.load %arg14[%c96, %c0_80] : memref<150x512xf32, #tpu.memory_space<vmem>>, vector<6x512xf32>
      tpu.vector_store %arg14[%c96, %c0_80], %135 {strides = array<i32>} : memref<150x512xf32, #tpu.memory_space<vmem>>, vector<6x512xf32>,
      %137 = vector.extract_strided_slice %102 {offsets = [0, 172], sizes = [6, 512], strides = [1, 1]} : vector<6x768xf32> to vector<6x512xf32>
      %c102 = arith.constant 102 : index
      %c0_81 = arith.constant 0 : index
      %138 = vector.load %arg14[%c102, %c0_81] : memref<150x512xf32, #tpu.memory_space<vmem>>, vector<6x512xf32>
      tpu.vector_store %arg14[%c102, %c0_81], %137 {strides = array<i32>} : memref<150x512xf32, #tpu.memory_space<vmem>>, vector<6x512xf32>,
      %139 = vector.extract_strided_slice %102 {offsets = [0, 174], sizes = [6, 512], strides = [1, 1]} : vector<6x768xf32> to vector<6x512xf32>
      %c108 = arith.constant 108 : index
      %c0_82 = arith.constant 0 : index
      %140 = vector.load %arg14[%c108, %c0_82] : memref<150x512xf32, #tpu.memory_space<vmem>>, vector<6x512xf32>
      tpu.vector_store %arg14[%c108, %c0_82], %139 {strides = array<i32>} : memref<150x512xf32, #tpu.memory_space<vmem>>, vector<6x512xf32>,
      %141 = vector.extract_strided_slice %102 {offsets = [0, 176], sizes = [6, 512], strides = [1, 1]} : vector<6x768xf32> to vector<6x512xf32>
      %c114 = arith.constant 114 : index
      %c0_83 = arith.constant 0 : index
      %142 = vector.load %arg14[%c114, %c0_83] : memref<150x512xf32, #tpu.memory_space<vmem>>, vector<6x512xf32>
      tpu.vector_store %arg14[%c114, %c0_83], %141 {strides = array<i32>} : memref<150x512xf32, #tpu.memory_space<vmem>>, vector<6x512xf32>,
      %143 = vector.extract_strided_slice %102 {offsets = [0, 224], sizes = [6, 512], strides = [1, 1]} : vector<6x768xf32> to vector<6x512xf32>
      %c120 = arith.constant 120 : index
      %c0_84 = arith.constant 0 : index
      %144 = vector.load %arg14[%c120, %c0_84] : memref<150x512xf32, #tpu.memory_space<vmem>>, vector<6x512xf32>
      tpu.vector_store %arg14[%c120, %c0_84], %143 {strides = array<i32>} : memref<150x512xf32, #tpu.memory_space<vmem>>, vector<6x512xf32>,
      %145 = vector.extract_strided_slice %102 {offsets = [0, 226], sizes = [6, 512], strides = [1, 1]} : vector<6x768xf32> to vector<6x512xf32>
      %c126 = arith.constant 126 : index
      %c0_85 = arith.constant 0 : index
      %146 = vector.load %arg14[%c126, %c0_85] : memref<150x512xf32, #tpu.memory_space<vmem>>, vector<6x512xf32>
      tpu.vector_store %arg14[%c126, %c0_85], %145 {strides = array<i32>} : memref<150x512xf32, #tpu.memory_space<vmem>>, vector<6x512xf32>,
      %147 = vector.extract_strided_slice %102 {offsets = [0, 228], sizes = [6, 512], strides = [1, 1]} : vector<6x768xf32> to vector<6x512xf32>
      %c132 = arith.constant 132 : index
      %c0_86 = arith.constant 0 : index
      %148 = vector.load %arg14[%c132, %c0_86] : memref<150x512xf32, #tpu.memory_space<vmem>>, vector<6x512xf32>
      tpu.vector_store %arg14[%c132, %c0_86], %147 {strides = array<i32>} : memref<150x512xf32, #tpu.memory_space<vmem>>, vector<6x512xf32>,
      %149 = vector.extract_strided_slice %102 {offsets = [0, 230], sizes = [6, 512], strides = [1, 1]} : vector<6x768xf32> to vector<6x512xf32>
      %c138 = arith.constant 138 : index
      %c0_87 = arith.constant 0 : index
      %150 = vector.load %arg14[%c138, %c0_87] : memref<150x512xf32, #tpu.memory_space<vmem>>, vector<6x512xf32>
      tpu.vector_store %arg14[%c138, %c0_87], %149 {strides = array<i32>} : memref<150x512xf32, #tpu.memory_space<vmem>>, vector<6x512xf32>,
      %151 = vector.extract_strided_slice %102 {offsets = [0, 232], sizes = [6, 512], strides = [1, 1]} : vector<6x768xf32> to vector<6x512xf32>
      %c144 = arith.constant 144 : index
      %c0_88 = arith.constant 0 : index
      %152 = vector.load %arg14[%c144, %c0_88] : memref<150x512xf32, #tpu.memory_space<vmem>>, vector<6x512xf32>
      tpu.vector_store %arg14[%c144, %c0_88], %151 {strides = array<i32>} : memref<150x512xf32, #tpu.memory_space<vmem>>, vector<6x512xf32>,
      %c0_89 = arith.constant 0 : index
      %c0_90 = arith.constant 0 : index
      %153 = vector.load %arg4[%c0_89, %c0_90] : memref<16x150xf32, #tpu.memory_space<vmem>>, vector<16x150xf32>
      %c0_91 = arith.constant 0 : index
      %c0_92 = arith.constant 0 : index
      %154 = vector.load %arg14[%c0_91, %c0_92] : memref<150x512xf32, #tpu.memory_space<vmem>>, vector<150x512xf32>
      %cst_93 = arith.constant dense<0.000000e+00> : vector<16x512xf32>
      %155 = tpu.matmul %153, %154, %cst_93 {dimension_numbers = #tpu.dot_dimension_numbers<[1], [0], [0], [1], [0, 0, 1, 1], [], []>} : vector<16x150xf32>, vector<150x512xf32>, vector<16x512xf32> -> vector<16x512xf32>
      %c0_94 = arith.constant 0 : index
      %c0_95 = arith.constant 0 : index
      %156 = vector.load %arg5[%c0_94, %c0_95] : memref<16x1xf32, #tpu.memory_space<vmem>>, vector<16x1xf32>
      %157 = vector.broadcast %156 : vector<16x1xf32> to vector<16x512xf32>
      %158 = arith.addf %155, %157 : vector<16x512xf32>
      %cst_96 = arith.constant 0.000000e+00 : f32
      %159 = vector.broadcast %cst_96 : f32 to vector<16x512xf32>
      %160 = arith.maximumf %158, %159 : vector<16x512xf32>
      %161 = vector.extract_strided_slice %160 {offsets = [0, 0], sizes = [16, 384], strides = [1, 1]} : vector<16x512xf32> to vector<16x384xf32>
      %162 = vector.extract_strided_slice %160 {offsets = [0, 2], sizes = [16, 384], strides = [1, 1]} : vector<16x512xf32> to vector<16x384xf32>
      %163 = arith.maximumf %161, %162 : vector<16x384xf32>
      %164 = vector.extract_strided_slice %160 {offsets = [0, 56], sizes = [16, 384], strides = [1, 1]} : vector<16x512xf32> to vector<16x384xf32>
      %165 = vector.extract_strided_slice %160 {offsets = [0, 58], sizes = [16, 384], strides = [1, 1]} : vector<16x512xf32> to vector<16x384xf32>
      %166 = arith.maximumf %164, %165 : vector<16x384xf32>
      %167 = arith.maximumf %163, %166 : vector<16x384xf32>
      %168 = vector.extract_strided_slice %167 {offsets = [0, 0], sizes = [16, 1], strides = [1, 1]} : vector<16x384xf32> to vector<16x1xf32>
      %169 = vector.extract_strided_slice %167 {offsets = [0, 4], sizes = [16, 1], strides = [1, 1]} : vector<16x384xf32> to vector<16x1xf32>
      %170 = vector.extract_strided_slice %167 {offsets = [0, 8], sizes = [16, 1], strides = [1, 1]} : vector<16x384xf32> to vector<16x1xf32>
      %171 = vector.extract_strided_slice %167 {offsets = [0, 12], sizes = [16, 1], strides = [1, 1]} : vector<16x384xf32> to vector<16x1xf32>
      %172 = vector.extract_strided_slice %167 {offsets = [0, 112], sizes = [16, 1], strides = [1, 1]} : vector<16x384xf32> to vector<16x1xf32>
      %173 = vector.extract_strided_slice %167 {offsets = [0, 116], sizes = [16, 1], strides = [1, 1]} : vector<16x384xf32> to vector<16x1xf32>
      %174 = vector.extract_strided_slice %167 {offsets = [0, 120], sizes = [16, 1], strides = [1, 1]} : vector<16x384xf32> to vector<16x1xf32>
      %175 = vector.extract_strided_slice %167 {offsets = [0, 124], sizes = [16, 1], strides = [1, 1]} : vector<16x384xf32> to vector<16x1xf32>
      %176 = vector.extract_strided_slice %167 {offsets = [0, 224], sizes = [16, 1], strides = [1, 1]} : vector<16x384xf32> to vector<16x1xf32>
      %177 = vector.extract_strided_slice %167 {offsets = [0, 228], sizes = [16, 1], strides = [1, 1]} : vector<16x384xf32> to vector<16x1xf32>
      %178 = vector.extract_strided_slice %167 {offsets = [0, 232], sizes = [16, 1], strides = [1, 1]} : vector<16x384xf32> to vector<16x1xf32>
      %179 = vector.extract_strided_slice %167 {offsets = [0, 236], sizes = [16, 1], strides = [1, 1]} : vector<16x384xf32> to vector<16x1xf32>
      %180 = vector.extract_strided_slice %167 {offsets = [0, 336], sizes = [16, 1], strides = [1, 1]} : vector<16x384xf32> to vector<16x1xf32>
      %181 = vector.extract_strided_slice %167 {offsets = [0, 340], sizes = [16, 1], strides = [1, 1]} : vector<16x384xf32> to vector<16x1xf32>
      %182 = vector.extract_strided_slice %167 {offsets = [0, 344], sizes = [16, 1], strides = [1, 1]} : vector<16x384xf32> to vector<16x1xf32>
      %183 = vector.extract_strided_slice %167 {offsets = [0, 348], sizes = [16, 1], strides = [1, 1]} : vector<16x384xf32> to vector<16x1xf32>
      %184 = tpu.concatenate %168, %169, %170, %171, %172, %173, %174, %175, %176, %177, %178, %179, %180, %181, %182, %183 in 0 : vector<16x1xf32>, vector<16x1xf32>, vector<16x1xf32>, vector<16x1xf32>, vector<16x1xf32>, vector<16x1xf32>, vector<16x1xf32>, vector<16x1xf32>, vector<16x1xf32>, vector<16x1xf32>, vector<16x1xf32>, vector<16x1xf32>, vector<16x1xf32>, vector<16x1xf32>, vector<16x1xf32>, vector<16x1xf32> -> vector<256x1xf32>
      %185 = vector.broadcast %arg16 : i32 to vector<1x4xi32>
      %186 = arith.cmpi eq, %0, %185 : vector<1x4xi32>
      %c0_97 = arith.constant 0 : index
      %c0_98 = arith.constant 0 : index
      %187 = vector.load %arg15[%c0_97, %c0_98] : memref<256x4xf32, #tpu.memory_space<vmem>>, vector<256x4xf32>
      %188 = vector.shape_cast %186 : vector<1x4xi1> to vector<1x4xi1>
      %189 = vector.broadcast %188 : vector<1x4xi1> to vector<256x4xi1>
      %190 = vector.shape_cast %184 : vector<256x1xf32> to vector<256x1xf32>
      %191 = vector.broadcast %190 : vector<256x1xf32> to vector<256x4xf32>
      %192 = arith.select %189, %191, %187 : vector<256x4xi1>, vector<256x4xf32>
      %c0_99 = arith.constant 0 : index
      %c0_100 = arith.constant 0 : index
      %193 = vector.load %arg15[%c0_99, %c0_100] : memref<256x4xf32, #tpu.memory_space<vmem>>, vector<256x4xf32>
      tpu.vector_store %arg15[%c0_99, %c0_100], %192 {strides = array<i32>} : memref<256x4xf32, #tpu.memory_space<vmem>>, vector<256x4xf32>,
    }
    %c4_i32_0 = arith.constant 4 : i32
    %c0 = arith.constant 0 : index
    %c0_1 = arith.constant 0 : index
    %2 = vector.load %arg15[%c0, %c0_1] : memref<256x4xf32, #tpu.memory_space<vmem>>, vector<256x4xf32>
    %c0_2 = arith.constant 0 : index
    %c0_3 = arith.constant 0 : index
    %3 = vector.load %arg6[%c0_2, %c0_3] : memref<120x256xf32, #tpu.memory_space<vmem>>, vector<120x256xf32>
    %cst = arith.constant dense<0.000000e+00> : vector<120x4xf32>
    %4 = tpu.matmul %3, %2, %cst {dimension_numbers = #tpu.dot_dimension_numbers<[1], [0], [0], [1], [0, 0, 1, 1], [], []>} : vector<120x256xf32>, vector<256x4xf32>, vector<120x4xf32> -> vector<120x4xf32>
    %c0_4 = arith.constant 0 : index
    %c0_5 = arith.constant 0 : index
    %5 = vector.load %arg7[%c0_4, %c0_5] : memref<120x1xf32, #tpu.memory_space<vmem>>, vector<120x1xf32>
    %6 = vector.broadcast %5 : vector<120x1xf32> to vector<120x4xf32>
    %7 = arith.addf %4, %6 : vector<120x4xf32>
    %c0_6 = arith.constant 0 : index
    %c0_7 = arith.constant 0 : index
    %8 = vector.load %arg8[%c0_6, %c0_7] : memref<84x120xf32, #tpu.memory_space<vmem>>, vector<84x120xf32>
    %cst_8 = arith.constant dense<0.000000e+00> : vector<84x4xf32>
    %9 = tpu.matmul %8, %7, %cst_8 {dimension_numbers = #tpu.dot_dimension_numbers<[1], [0], [0], [1], [0, 0, 1, 1], [], []>} : vector<84x120xf32>, vector<120x4xf32>, vector<84x4xf32> -> vector<84x4xf32>
    %c0_9 = arith.constant 0 : index
    %c0_10 = arith.constant 0 : index
    %10 = vector.load %arg9[%c0_9, %c0_10] : memref<84x1xf32, #tpu.memory_space<vmem>>, vector<84x1xf32>
    %11 = vector.broadcast %10 : vector<84x1xf32> to vector<84x4xf32>
    %12 = arith.addf %9, %11 : vector<84x4xf32>
    %cst_11 = arith.constant 0.000000e+00 : f32
    %13 = vector.broadcast %cst_11 : f32 to vector<84x4xf32>
    %14 = arith.maximumf %12, %13 : vector<84x4xf32>
    %c0_12 = arith.constant 0 : index
    %c0_13 = arith.constant 0 : index
    %15 = vector.load %arg10[%c0_12, %c0_13] : memref<10x84xf32, #tpu.memory_space<vmem>>, vector<10x84xf32>
    %cst_14 = arith.constant dense<0.000000e+00> : vector<10x4xf32>
    %16 = tpu.matmul %15, %14, %cst_14 {dimension_numbers = #tpu.dot_dimension_numbers<[1], [0], [0], [1], [0, 0, 1, 1], [], []>} : vector<10x84xf32>, vector<84x4xf32>, vector<10x4xf32> -> vector<10x4xf32>
    %c0_15 = arith.constant 0 : index
    %c0_16 = arith.constant 0 : index
    %17 = vector.load %arg11[%c0_15, %c0_16] : memref<10x1xf32, #tpu.memory_space<vmem>>, vector<10x1xf32>
    %18 = vector.broadcast %17 : vector<10x1xf32> to vector<10x4xf32>
    %19 = arith.addf %16, %18 : vector<10x4xf32>
    %cst_17 = arith.constant 0.000000e+00 : f32
    %20 = vector.broadcast %cst_17 : f32 to vector<10x4xf32>
    %21 = arith.maximumf %19, %20 : vector<10x4xf32>
    %cst_18 = arith.constant dense<0xFF800000> : vector<4xf32>
    %22 = vector.multi_reduction <maximumf>, %21, %cst_18 [0] : vector<10x4xf32> to vector<4xf32>
    %23 = vector.shape_cast %22 : vector<4xf32> to vector<1x4xf32>
    %24 = vector.broadcast %23 : vector<1x4xf32> to vector<10x4xf32>
    %25 = arith.subf %21, %24 : vector<10x4xf32>
    %26 = math.exp %25 : vector<10x4xf32>
    %cst_19 = arith.constant dense<0.000000e+00> : vector<4xf32>
    %27 = vector.multi_reduction <add>, %26, %cst_19 [0] : vector<10x4xf32> to vector<4xf32>
    %28 = vector.shape_cast %27 : vector<4xf32> to vector<1x4xf32>
    %29 = math.log %28 : vector<1x4xf32>
    %30 = vector.broadcast %29 : vector<1x4xf32> to vector<10x4xf32>
    %31 = arith.subf %25, %30 : vector<10x4xf32>
    %c0_20 = arith.constant 0 : index
    %c0_21 = arith.constant 0 : index
    %c0_22 = arith.constant 0 : index
    %32 = vector.load %arg12[%c0_20, %c0_21, %c0_22] : memref<1x10x4xf32, #tpu.memory_space<vmem>>, vector<1x10x4xf32>
    %33 = vector.shape_cast %32 : vector<1x10x4xf32> to vector<10x4xf32>
    %34 = vector.shape_cast %31 : vector<10x4xf32> to vector<1x10x4xf32>
    tpu.vector_store %arg12[%c0_20, %c0_21, %c0_22], %34 {strides = array<i32>} : memref<1x10x4xf32, #tpu.memory_space<vmem>>, vector<1x10x4xf32>,
    return
  }
  func.func @transform_0(%arg0: i32) -> (i32, i32, i32) {
    %c0_i32 = arith.constant 0 : i32
    %c0_i32_0 = arith.constant 0 : i32
    %c0_i32_1 = arith.constant 0 : i32
    return %arg0, %c0_i32, %c0_i32_0 : i32, i32, i32
  }
  func.func @transform_1(%arg0: i32) -> (i32, i32) {
    %c0_i32 = arith.constant 0 : i32
    %c0_i32_0 = arith.constant 0 : i32
    %c0_i32_1 = arith.constant 0 : i32
    return %c0_i32, %c0_i32_0 : i32, i32
  }
  func.func @transform_2(%arg0: i32) -> (i32, i32) {
    %c0_i32 = arith.constant 0 : i32
    %c0_i32_0 = arith.constant 0 : i32
    %c0_i32_1 = arith.constant 0 : i32
    return %c0_i32, %c0_i32_0 : i32, i32
  }
  func.func @transform_3(%arg0: i32) -> (i32, i32) {
    %c0_i32 = arith.constant 0 : i32
    %c0_i32_0 = arith.constant 0 : i32
    %c0_i32_1 = arith.constant 0 : i32
    return %c0_i32, %c0_i32_0 : i32, i32
  }
  func.func @transform_4(%arg0: i32) -> (i32, i32) {
    %c0_i32 = arith.constant 0 : i32
    %c0_i32_0 = arith.constant 0 : i32
    %c0_i32_1 = arith.constant 0 : i32
    return %c0_i32, %c0_i32_0 : i32, i32
  }
  func.func @transform_5(%arg0: i32) -> (i32, i32) {
    %c0_i32 = arith.constant 0 : i32
    %c0_i32_0 = arith.constant 0 : i32
    %c0_i32_1 = arith.constant 0 : i32
    return %c0_i32, %c0_i32_0 : i32, i32
  }
  func.func @transform_6(%arg0: i32) -> (i32, i32) {
    %c0_i32 = arith.constant 0 : i32
    %c0_i32_0 = arith.constant 0 : i32
    %c0_i32_1 = arith.constant 0 : i32
    return %c0_i32, %c0_i32_0 : i32, i32
  }
  func.func @transform_7(%arg0: i32) -> (i32, i32) {
    %c0_i32 = arith.constant 0 : i32
    %c0_i32_0 = arith.constant 0 : i32
    %c0_i32_1 = arith.constant 0 : i32
    return %c0_i32, %c0_i32_0 : i32, i32
  }
  func.func @transform_8(%arg0: i32) -> (i32, i32) {
    %c0_i32 = arith.constant 0 : i32
    %c0_i32_0 = arith.constant 0 : i32
    %c0_i32_1 = arith.constant 0 : i32
    return %c0_i32, %c0_i32_0 : i32, i32
  }
  func.func @transform_9(%arg0: i32) -> (i32, i32) {
    %c0_i32 = arith.constant 0 : i32
    %c0_i32_0 = arith.constant 0 : i32
    %c0_i32_1 = arith.constant 0 : i32
    return %c0_i32, %c0_i32_0 : i32, i32
  }
  func.func @transform_10(%arg0: i32) -> (i32, i32) {
    %c0_i32 = arith.constant 0 : i32
    %c0_i32_0 = arith.constant 0 : i32
    %c0_i32_1 = arith.constant 0 : i32
    return %c0_i32, %c0_i32_0 : i32, i32
  }
  func.func @transform_11(%arg0: i32) -> (i32, i32, i32) {
    %c0_i32 = arith.constant 0 : i32
    %c0_i32_0 = arith.constant 0 : i32
    %c0_i32_1 = arith.constant 0 : i32
    return %arg0, %c0_i32, %c0_i32_0 : i32, i32, i32
  }
}

</mosaic_0001>

<bundles_post_ra>
// kernel: _lambda_.1
= control target key start
LH: loop header
LB: loop body
LE: loop exit
PB: predicated region body
PF: predicated region fallthrough
CT: control target
= control target key end

     0   :  { %s3101_s17 = smov 0   ;;  %s4329_s0 = inlined_call_operand.vmem [shape: f32[2,4,1024], index: 0, kind: input, shape index: {}]   ;;  %s4330_s1 = inlined_call_operand.vmem [shape: f32[6,25], index: 1, kind: input, shape index: {}]   ;;  %s4331_s2 = inlined_call_operand.vmem [shape: f32[6,1], index: 2, kind: input, shape index: {}]   ;;  %s4332_s3 = inlined_call_operand.vmem [shape: f32[16,150], index: 3, kind: input, shape index: {}]   ;;  %s4333_s4 = inlined_call_operand.vmem [shape: f32[16,1], index: 4, kind: input, shape index: {}]   ;;  %s4334_s5 = inlined_call_operand.vmem [shape: f32[120,256], index: 5, kind: input, shape index: {}]   ;;  %s4335_s6 = inlined_call_operand.vmem [shape: f32[120,1], index: 6, kind: input, shape index: {}]   ;;  %s4336_s7 = inlined_call_operand.vmem [shape: f32[84,120], index: 7, kind: input, shape index: {}]   ;;  %s4337_s8 = inlined_call_operand.vmem [shape: f32[84,1], index: 8, kind: input, shape index: {}]   ;;  %s4338_s9 = inlined_call_operand.vmem [shape: f32[10,84], index: 9, kind: input, shape index: {}]   ;;  %s4339_s10 = inlined_call_operand.vmem [shape: f32[10,1], index: 10, kind: input, shape index: {}]   ;;  %s4340_s11 = inlined_call_operand.vmem [shape: f32[2,10,4], index: 11, kind: output, shape index: {}]  }
   0x1 LB: > { %s2815_s18 = sadd.s32 4294967295, %s2988_s17   ;;  %p2819_p0 = scmp.ge.s32.totalorder %s2988_s17, 1  ;;  %s2988_s17 = sphi %s3101_s17, %s21_s17  }
   0x2   : > { %p337_p1 = scmp.lt.s32.totalorder %s2988_s17, 3 }
   0x4   : > { %p338_p2 = pnand %p2819_p0, %p337_p1 }
   0x5   : > { %p377_p3 = scmp.lt.s32.totalorder (!%p338_p2), %s2815_s18, 1  ;;  %s3122_s27 = smov (!%p338_p2), 0  }
   0x6   : > { %341 = sbr.rel (%p338_p2) target bundleno = 2411 (0x96b), region = 64 }
   0xb   : > { %v387_v0 = vlaneseq  ;;  %s4402_s18 = smov (!%p377_p3, %s2815_s18), 1 }
   0xc   : > { %s2868_s19 = sshll.u32 %s4402_s18, 5  ;;  %s2869_s20 = sshll.u32 %s4402_s18, 4 }
   0xd   : > { %v3110_v1 = vand.u32 127, %v387_v0  ;;  %s3115_s23 = scalar_lea.vmem %s4329_s0, %s2868_s19  ;;  %s3120_s26 = scalar_lea.vmem %s4340_s11, %s2869_s20 }
   0xe LB: >> { %s395_s28 = sshra.s32 %s2992_s27, 2  ;;  %s398_s29 = sand.u32 3, %s2992_s27  ;;  %vm3137_vm0 = vcmp.lt.s32.totalorder %v387_v0, 896  ;;  %vm450_vm1 = vcmask 818176   ;;  %vm459_vm2 = vcmask 809984   ;;  %vm486_vm3 = vcmask 785408   ;;  %s2992_s27 = sphi %s3122_s27, %s394_s27  }
   0xf   : >> { %s2870_s30 = sshll.u32 %s395_s28, 5  ;;  %s2994_s14 = smov 125   ;;  %vm432_vm4 = vcmask 1022976   ;;  %vm414_vm5 = vcmask 1039360   ;;  %vm513_vm6 = vcmask 572416   ;;  %vm441_vm7 = vcmask 1014784  }
  0x10   : >> { %s401_s12 = sadd.s32 %s2870_s30, %s398_s29  ;;  %s2995_s15 = smov 127   ;;  %vm423_vm8 = vcmask 1031168   ;;  %vm540_vm9 = vcmask 359424   ;;  %vm477_vm10 = vcmask 793600   ;;  %vm468_vm11 = vcmask 801792  }
  0x11   : >> { %s402_s13 = scalar_lea.vmem %s3115_s23, %s401_s12  ;;  %s2996_s16 = smov 100   ;;  %vm567_vm12 = vcmask 334848   ;;  %vm504_vm13 = vcmask 580608   ;;  %vm495_vm14 = vcmask 588800   ;;  %vm594_vm15 = vcmask 121856  }
  0x12   : >> { %v403_v2 = vld [vmem:[%s402_s13] ss:$4 sm:$0xff]  ;;  %s2997_s18 = smov 124   ;;  %s2998_s19 = smov 126  }
  0x13   : >> { %429 = vrot.lane.b32.xlu1 %v403_v2, %s2994_s14  ;;  %411 = vrot.lane.b32.xlu0 %v403_v2, %s2995_s15  ;;  %s2999_s20 = smov 99   ;;  %s3000_s21 = smov 97   ;;  %408 = vst.msk [vmem:[#allocation2] ss:$8 sm:$0xf] %vm3137_vm0, %v403_v2 }
  0x14   : >> { %447 = vrot.lane.b32.xlu2 %v403_v2, %s2996_s16  ;;  %s3001_s22 = smov 98   ;;  %s3002_s24 = smov 96   ;;  %409 = vst.msk [vmem:[#allocation2] ss:$8 sm:$0x70] %vm3137_vm0, %v403_v2 }
  0x15   : >> { %s3003_s25 = smov 71   ;;  %s3004_s28 = smov 72   ;;  %v627_v3 = vld [vmem:[%s4330_s1] sm:$0x3f] }
  0x16   : >> { %s4357_s29 = smov 70   ;;  %s4341_s30 = smov 68  }
  0x17   : >> { %s3007_s12 = smov 69   ;;  %s4343_s13 = smov 44  }
  0x18   : >> { %s3009_s14 = smov 42  }
  0x1b   : >> { %438 = vrot.lane.b32.xlu1 %v403_v2, %s2997_s18  ;;  %420 = vrot.lane.b32.xlu0 %v403_v2, %s2998_s19 }
  0x1c   : >> { %456 = vrot.lane.b32.xlu2 %v403_v2, %s2999_s20  ;;  %s3010_s20 = smov 43  }
  0x23   : >> { %474 = vrot.lane.b32.xlu1 %v403_v2, %s3000_s21  ;;  %465 = vrot.lane.b32.xlu0 %v403_v2, %s3001_s22  ;;  %s3011_s21 = smov 41   ;;  %s4349_s22 = smov 16  }
  0x24   : >> { %483 = vrot.lane.b32.xlu2 %v403_v2, %s3002_s24  ;;  %s4345_s24 = smov 40  }
  0x2b   : >> { %501 = vrot.lane.b32.xlu1 %v403_v2, %s3003_s25  ;;  %492 = vrot.lane.b32.xlu0 %v403_v2, %s3004_s28  ;;  %s3014_s25 = smov 15  }
  0x2c   : >> { %510 = vrot.lane.b32.xlu2 %v403_v2, %s4357_s29 }
  0x33   : >> { %528 = vrot.lane.b32.xlu1 %v403_v2, %s4341_s30  ;;  %519 = vrot.lane.b32.xlu0 %v403_v2, %s3007_s12  ;;  %s3015_s30 = smov 13   ;;  %s4355_s12 = smov 14  }
  0x34   : >> { %537 = vrot.lane.b32.xlu2 %v403_v2, %s4343_s13  ;;  %s3017_s13 = smov 12  }
  0x3b   : >> { %555 = vrot.lane.b32.xlu1 %v403_v2, %s3009_s14  ;;  %546 = vrot.lane.b32.xlu0 %v403_v2, %s3010_s20  ;;  %s3023_s14 = smov 24   ;;  %s3024_s20 = smov 122  }
  0x3c   : >> { %564 = vrot.lane.b32.xlu2 %v403_v2, %s3011_s21  ;;  %s4374_s21 = smov 68  }
  0x43   : >> { %582 = vrot.lane.b32.xlu1 %v403_v2, %s4349_s22  ;;  %573 = vrot.lane.b32.xlu0 %v403_v2, %s4345_s24  ;;  %s4347_s24 = smov 64  }
  0x44   : >> { %591 = vrot.lane.b32.xlu2 %v403_v2, %s3014_s25  ;;  %s3021_s25 = smov 86  }
  0x4b   : >> { %609 = vrot.lane.b32.xlu1 %v403_v2, %s3015_s30  ;;  %600 = vrot.lane.b32.xlu0 %v403_v2, %s4355_s12  ;;  %s4365_s30 = smov 32  }
  0x4c   : >> { %618 = vrot.lane.b32.xlu2 %v403_v2, %s3017_s13 }
  0x6e   : >> { %v448_v4 = vpop.permute.xlu2 %447 }
  0x6f   : >> { %v449_v5 = vrot.slane %v448_v4, 1 }
  0x71   : >> { %v451_v6 = vsel %vm450_vm1, %v448_v4, %v449_v5 }
  0x72   : >> { %454 = vst.msk [vmem:[#allocation2 + $0x5] ss:$8 sm:$0xf] %vm3137_vm0, %v451_v6 }
  0x73   : >> { %455 = vst.msk [vmem:[#allocation2 + $0x5] ss:$8 sm:$0x70] %vm3137_vm0, %v451_v6 }
  0x76   : >> { %v457_v7 = vpop.permute.xlu2 %456 }
  0x77   : >> { %v458_v8 = vrot.slane %v457_v7, 1 }
  0x79   : >> { %v460_v9 = vsel %vm459_vm2, %v457_v7, %v458_v8  ;;  %vm531_vm2 = vcmask 556032  }
  0x7a   : >> { %463 = vst.msk [vmem:[#allocation2 + $0x6] ss:$8 sm:$0xf] %vm3137_vm0, %v460_v9 }
  0x7b   : >> { %464 = vst.msk [vmem:[#allocation2 + $0x6] ss:$8 sm:$0x70] %vm3137_vm0, %v460_v9 }
  0x7e   : >> { %v484_v10 = vpop.permute.xlu2 %483 }
  0x7f   : >> { %v485_v11 = vrot.slane %v484_v10, 1 }
  0x81   : >> { %v487_v12 = vsel %vm486_vm3, %v484_v10, %v485_v11  ;;  %vm522_vm3 = vcmask 564224  }
  0x82   : >> { %490 = vst.msk [vmem:[#allocation2 + $0x39] ss:$8 sm:$0xf] %vm3137_vm0, %v487_v12 }
  0x83   : >> { %491 = vst.msk [vmem:[#allocation2 + $0x39] ss:$8 sm:$0x70] %vm3137_vm0, %v487_v12 }
  0x85   : >> { %v430_v13 = vpop.permute.xlu1 %429  ;;  %v412_v14 = vpop.permute.xlu0 %411 }
  0x86   : >> { %v431_v15 = vrot.slane %v430_v13, 1  ;;  %v413_v16 = vrot.slane %v412_v14, 1  ;;  %v511_v17 = vpop.permute.xlu2 %510 }
  0x87   : >> { %v512_v18 = vrot.slane %v511_v17, 1 }
  0x88   : >> { %v433_v19 = vsel %vm432_vm4, %v430_v13, %v431_v15  ;;  %v415_v20 = vsel %vm414_vm5, %v412_v14, %v413_v16  ;;  %vm621_vm4 = vcmask 97280   ;;  %v656_v13 = vld [vmem:[%s4331_s2] sm:$0x3f]  ;;  %v3018_v14 = vmov 0  }
  0x89   : >> { %436 = vst.msk [vmem:[#allocation2 + $0x3] ss:$8 sm:$0xf] %vm3137_vm0, %v433_v19  ;;  %v514_v21 = vsel %vm513_vm6, %v511_v17, %v512_v18  ;;  %2966 = vset.pattern.permute.xlu0 %v3018_v14  ;;  %2967 = vset.pattern.permute.xlu1 %v3018_v14 }
  0x8a   : >> { %437 = vst.msk [vmem:[#allocation2 + $0x3] ss:$8 sm:$0x70] %vm3137_vm0, %v433_v19  ;;  %659 = vperm.xlu0 %2966, %v656_v13   ;;  %2968 = vset.pattern.permute.xlu2 %v3018_v14 }
  0x8b   : >> { %418 = vst.msk [vmem:[#allocation2 + $0x1] ss:$8 sm:$0xf] %vm3137_vm0, %v415_v20 }
  0x8c   : >> { %419 = vst.msk [vmem:[#allocation2 + $0x1] ss:$8 sm:$0x70] %vm3137_vm0, %v415_v20 }
  0x8d   : >> { %v439_v22 = vpop.permute.xlu1 %438  ;;  %v421_v23 = vpop.permute.xlu0 %420  ;;  %517 = vst.msk [vmem:[#allocation2 + $0x3c] ss:$8 sm:$0xf] %vm3137_vm0, %v514_v21 }
  0x8e   : >> { %v440_v24 = vrot.slane %v439_v22, 1  ;;  %v422_v25 = vrot.slane %v421_v23, 1  ;;  %518 = vst.msk [vmem:[#allocation2 + $0x3c] ss:$8 sm:$0x70] %vm3137_vm0, %v514_v21  ;;  %v538_v26 = vpop.permute.xlu2 %537 }
  0x8f   : >> { %v539_v27 = vrot.slane %v538_v26, 1 }
  0x90   : >> { %v442_v28 = vsel %vm441_vm7, %v439_v22, %v440_v24  ;;  %v424_v29 = vsel %vm423_vm8, %v421_v23, %v422_v25 }
  0x91   : >> { %445 = vst.msk [vmem:[#allocation2 + $0x4] ss:$8 sm:$0xf] %vm3137_vm0, %v442_v28  ;;  %v541_v30 = vsel %vm540_vm9, %v538_v26, %v539_v27  ;;  %vm558_vm9 = vcmask 343040  }
  0x92   : >> { %446 = vst.msk [vmem:[#allocation2 + $0x4] ss:$8 sm:$0x70] %vm3137_vm0, %v442_v28 }
  0x93   : >> { %427 = vst.msk [vmem:[#allocation2 + $0x2] ss:$8 sm:$0xf] %vm3137_vm0, %v424_v29 }
  0x94   : >> { %428 = vst.msk [vmem:[#allocation2 + $0x2] ss:$8 sm:$0x70] %vm3137_vm0, %v424_v29 }
  0x95   : >> { %v475_v31 = vpop.permute.xlu1 %474  ;;  %v466_v32 = vpop.permute.xlu0 %465  ;;  %544 = vst.msk [vmem:[#allocation2 + $0x3f] ss:$8 sm:$0xf] %vm3137_vm0, %v541_v30 }
  0x96   : >> { %v476_v33 = vrot.slane %v475_v31, 1  ;;  %v467_v34 = vrot.slane %v466_v32, 1  ;;  %545 = vst.msk [vmem:[#allocation2 + $0x3f] ss:$8 sm:$0x70] %vm3137_vm0, %v541_v30  ;;  %v565_v35 = vpop.permute.xlu2 %564 }
  0x97   : >> { %v566_v36 = vrot.slane %v565_v35, 1 }
  0x98   : >> { %v478_v37 = vsel %vm477_vm10, %v475_v31, %v476_v33  ;;  %v469_v38 = vsel %vm468_vm11, %v466_v32, %v467_v34  ;;  %vm549_vm10 = vcmask 351232   ;;  %vm666_vm11 = vcmask 1040384  }
  0x99   : >> { %481 = vst.msk [vmem:[#allocation2 + $0x38] ss:$8 sm:$0xf] %vm3137_vm0, %v478_v37  ;;  %v568_v39 = vsel %vm567_vm12, %v565_v35, %v566_v36  ;;  %vm585_vm12 = vcmask 130048  }
  0x9a   : >> { %482 = vst.msk [vmem:[#allocation2 + $0x38] ss:$8 sm:$0x70] %vm3137_vm0, %v478_v37 }
  0x9b   : >> { %472 = vst.msk [vmem:[#allocation2 + $0x7] ss:$8 sm:$0xf] %vm3137_vm0, %v469_v38 }
  0x9c   : >> { %473 = vst.msk [vmem:[#allocation2 + $0x7] ss:$8 sm:$0x70] %vm3137_vm0, %v469_v38 }
  0x9d   : >> { %v502_v40 = vpop.permute.xlu1 %501  ;;  %v493_v41 = vpop.permute.xlu0 %492  ;;  %571 = vst.msk [vmem:[#allocation2 + $0x72] ss:$8 sm:$0xf] %vm3137_vm0, %v568_v39 }
  0x9e   : >> { %v503_v42 = vrot.slane %v502_v40, 1  ;;  %v494_v43 = vrot.slane %v493_v41, 1  ;;  %572 = vst.msk [vmem:[#allocation2 + $0x72] ss:$8 sm:$0x70] %vm3137_vm0, %v568_v39  ;;  %v592_v44 = vpop.permute.xlu2 %591 }
  0x9f   : >> { %v593_v45 = vrot.slane %v592_v44, 1 }
  0xa0   : >> { %v505_v46 = vsel %vm504_vm13, %v502_v40, %v503_v42  ;;  %v496_v47 = vsel %vm495_vm14, %v493_v41, %v494_v43  ;;  %vm576_vm13 = vcmask 326656  }
  0xa1   : >> { %508 = vst.msk [vmem:[#allocation2 + $0x3b] ss:$8 sm:$0xf] %vm3137_vm0, %v505_v46  ;;  %v595_v48 = vsel %vm594_vm15, %v592_v44, %v593_v45  ;;  %vm612_vm15 = vcmask 105472  }
  0xa2   : >> { %509 = vst.msk [vmem:[#allocation2 + $0x3b] ss:$8 sm:$0x70] %vm3137_vm0, %v505_v46  ;;  %v628_v29 = vld [vmem:[#allocation2] sm:$0xff]  ;;  %v629_v30 = vld [vmem:[#allocation2 + $0x8] sm:$0xff]  ;;  %v631_v31 = vld [vmem:[#allocation2 + $0x18] sm:$0xff] }
  0xa3   : >> { %499 = vst.msk [vmem:[#allocation2 + $0x3a] ss:$8 sm:$0xf] %vm3137_vm0, %v496_v47  ;;  %v634_v32 = vld [vmem:[#allocation2 + $0x30] sm:$0xff]  ;;  %v632_v40 = vld [vmem:[#allocation2 + $0x20] sm:$0xff]  ;;  %v633_v44 = vld [vmem:[#allocation2 + $0x28] sm:$0xff] }
  0xa4   : >> { %500 = vst.msk [vmem:[#allocation2 + $0x3a] ss:$8 sm:$0x70] %vm3137_vm0, %v496_v47  ;;  %v630_v39 = vld [vmem:[#allocation2 + $0x10] sm:$0xff] }
  0xa5   : >> { %v529_v49 = vpop.permute.xlu1 %528  ;;  %v520_v50 = vpop.permute.xlu0 %519  ;;  %598 = vst.msk [vmem:[#allocation2 + $0x75] ss:$8 sm:$0xf] %vm3137_vm0, %v595_v48 }
  0xa6   : >> { %v530_v51 = vrot.slane %v529_v49, 1  ;;  %v521_v52 = vrot.slane %v520_v50, 1  ;;  %599 = vst.msk [vmem:[#allocation2 + $0x75] ss:$8 sm:$0x70] %vm3137_vm0, %v595_v48  ;;  %v619_v53 = vpop.permute.xlu2 %618 }
  0xa7   : >> { %v620_v54 = vrot.slane %v619_v53, 1 }
  0xa8   : >> { %v532_v55 = vsel %vm531_vm2, %v529_v49, %v530_v51  ;;  %v523_v56 = vsel %vm522_vm3, %v520_v50, %v521_v52  ;;  %vm4367_vm3 = vcmask 113664  }
  0xa9   : >> { %535 = vst.msk [vmem:[#allocation2 + $0x3e] ss:$8 sm:$0xf] %vm3137_vm0, %v532_v55  ;;  %v622_v57 = vsel %vm621_vm4, %v619_v53, %v620_v54 }
  0xaa   : >> { %536 = vst.msk [vmem:[#allocation2 + $0x3e] ss:$8 sm:$0x70] %vm3137_vm0, %v532_v55 }
  0xab   : >> { %526 = vst.msk [vmem:[#allocation2 + $0x3d] ss:$8 sm:$0xf] %vm3137_vm0, %v523_v56 }
  0xac   : >> { %527 = vst.msk [vmem:[#allocation2 + $0x3d] ss:$8 sm:$0x70] %vm3137_vm0, %v523_v56 }
  0xad   : >> { %v556_v58 = vpop.permute.xlu1 %555  ;;  %v547_v59 = vpop.permute.xlu0 %546  ;;  %625 = vst.msk [vmem:[#allocation2 + $0xa8] ss:$8 sm:$0xf] %vm3137_vm0, %v622_v57 }
  0xae   : >> { %v557_v60 = vrot.slane %v556_v58, 1  ;;  %v548_v61 = vrot.slane %v547_v59, 1  ;;  %626 = vst.msk [vmem:[#allocation2 + $0xa8] ss:$8 sm:$0x70] %vm3137_vm0, %v622_v57 }
  0xb0   : >> { %v559_v62 = vsel %vm558_vm9, %v556_v58, %v557_v60  ;;  %v550_v63 = vsel %vm549_vm10, %v547_v59, %v548_v61  ;;  %vm1121_vm9 = vcmask 539648   ;;  %vm1320_vm10 = vcmask 703488  }
  0xb1   : >> { %562 = vst.msk [vmem:[#allocation2 + $0x71] ss:$8 sm:$0xf] %vm3137_vm0, %v559_v62 }
  0xb2   : >> { %563 = vst.msk [vmem:[#allocation2 + $0x71] ss:$8 sm:$0x70] %vm3137_vm0, %v559_v62  ;;  %v635_v25 = vld [vmem:[#allocation2 + $0x38] sm:$0xff]  ;;  %v636_v26 = vld [vmem:[#allocation2 + $0x40] sm:$0xff]  ;;  %v638_v27 = vld [vmem:[#allocation2 + $0x50] sm:$0xff] }
  0xb3   : >> { %553 = vst.msk [vmem:[#allocation2 + $0x70] ss:$8 sm:$0xf] %vm3137_vm0, %v550_v63  ;;  %v641_v28 = vld [vmem:[#allocation2 + $0x68] sm:$0xff]  ;;  %v639_v38 = vld [vmem:[#allocation2 + $0x58] sm:$0xff]  ;;  %v640_v43 = vld [vmem:[#allocation2 + $0x60] sm:$0xff] }
  0xb4   : >> { %554 = vst.msk [vmem:[#allocation2 + $0x70] ss:$8 sm:$0x70] %vm3137_vm0, %v550_v63  ;;  %v649_v2 = vld [vmem:[#allocation2 + $0xa8] sm:$0x1] }
  0xb5   : >> { %v583_v4 = vpop.permute.xlu1 %582  ;;  %v574_v5 = vpop.permute.xlu0 %573  ;;  %2826 = vmatpush.msk.msra.mxu0 %vm666_vm11, %v649_v2  ;;  %v650_v6 = vld [vmem:[#allocation2 + $0xb0] sm:$0x1]  ;;  %v652_v7 = vld [vmem:[#allocation2 + $0xc0] sm:$0x1]  ;;  %v655_v8 = vld [vmem:[#allocation2 + $0xd8] sm:$0x1] }
  0xb6   : >> { %v584_v9 = vrot.slane %v583_v4, 1  ;;  %v575_v10 = vrot.slane %v574_v5, 1  ;;  %2828 = vmatpush.msk.msra.mxu1 %vm666_vm11, %v650_v6  ;;  %2832 = vmatpush.msk.msra.mxu3 %vm666_vm11, %v652_v7  ;;  %v651_v33 = vld [vmem:[#allocation2 + $0xb8] sm:$0x1]  ;;  %v653_v34 = vld [vmem:[#allocation2 + $0xc8] sm:$0x1] }
  0xb7   : >> { %2838 = vmatpush.msk.msra.mxu2 %vm666_vm11, %v655_v8  ;;  %v637_v37 = vld [vmem:[#allocation2 + $0x48] sm:$0xff]  ;;  %v654_v41 = vld [vmem:[#allocation2 + $0xd0] sm:$0x1] }
  0xb8   : >> { %v586_v11 = vsel %vm585_vm12, %v583_v4, %v584_v9  ;;  %v577_v12 = vsel %vm576_vm13, %v574_v5, %v575_v10  ;;  %vm1001_vm13 = vcmask 998400  }
  0xb9   : >> { %589 = vst.msk [vmem:[#allocation2 + $0x74] ss:$8 sm:$0xf] %vm3137_vm0, %v586_v11 }
  0xba   : >> { %590 = vst.msk [vmem:[#allocation2 + $0x74] ss:$8 sm:$0x70] %vm3137_vm0, %v586_v11 }
  0xbb   : >> { %580 = vst.msk [vmem:[#allocation2 + $0x73] ss:$8 sm:$0xf] %vm3137_vm0, %v577_v12 }
  0xbc   : >> { %581 = vst.msk [vmem:[#allocation2 + $0x73] ss:$8 sm:$0x70] %vm3137_vm0, %v577_v12 }
  0xbd   : >> { %v610_v15 = vpop.permute.xlu1 %609  ;;  %v601_v16 = vpop.permute.xlu0 %600 }
  0xbe   : >> { %v611_v17 = vrot.slane %v610_v15, 1  ;;  %v602_v18 = vrot.slane %v601_v16, 1 }
  0xc0   : >> { %v613_v19 = vsel %vm612_vm15, %v610_v15, %v611_v17  ;;  %v604_v20 = vsel %vm4367_vm3, %v601_v16, %v602_v18  ;;  %vm4369_vm15 = vcmask 80896  }
  0xc1   : >> { %616 = vst.msk [vmem:[#allocation2 + $0x77] ss:$8 sm:$0xf] %vm3137_vm0, %v613_v19 }
  0xc2   : >> { %617 = vst.msk [vmem:[#allocation2 + $0x77] ss:$8 sm:$0x70] %vm3137_vm0, %v613_v19 }
  0xc3   : >> { %607 = vst.msk [vmem:[#allocation2 + $0x76] ss:$8 sm:$0xf] %vm3137_vm0, %v604_v20 }
  0xc4   : >> { %608 = vst.msk [vmem:[#allocation2 + $0x76] ss:$8 sm:$0x70] %vm3137_vm0, %v604_v20  ;;  %vm662_vm0 = vcmask 203776  }
  0xca   : >> { %v642_v21 = vld [vmem:[#allocation2 + $0x70] sm:$0xff]  ;;  %v643_v22 = vld [vmem:[#allocation2 + $0x78] sm:$0xff]  ;;  %v645_v23 = vld [vmem:[#allocation2 + $0x88] sm:$0xff] }
  0xcb   : >> { %701 = vmatpush.msra.mxu0 %v642_v21  ;;  %721 = vmatpush.msra.mxu1 %v643_v22  ;;  %v648_v24 = vld [vmem:[#allocation2 + $0xa0] sm:$0xff]  ;;  %v646_v36 = vld [vmem:[#allocation2 + $0x90] sm:$0xff]  ;;  %v647_v42 = vld [vmem:[#allocation2 + $0x98] sm:$0xff] }
  0xcc   : >> { %761 = vmatpush.msra.mxu3 %v645_v23  ;;  %821 = vmatpush.msra.mxu2 %v648_v24  ;;  %v644_v35 = vld [vmem:[#allocation2 + $0x80] sm:$0xff] }
  0xcd   : >> { %702 = vmatpush.msra.mxu0 %v635_v25  ;;  %722 = vmatpush.msra.mxu1 %v636_v26 }
  0xce   : >> { %762 = vmatpush.msra.mxu3 %v638_v27  ;;  %822 = vmatpush.msra.mxu2 %v641_v28 }
  0xcf   : >> { %703 = vmatpush.msra.mxu0 %v628_v29  ;;  %723 = vmatpush.msra.mxu1 %v629_v30 }
  0xd0   : >> { %763 = vmatpush.msra.mxu3 %v631_v31  ;;  %823 = vmatpush.msra.mxu2 %v634_v32 }
  0xd1   : >> { %2827 = vmatmul.msk.f32.vlgmr.msra.gmra.mxu0 %vm662_vm0, %v627_v3  ;;  %2829 = vmatmul.msk.f32.vlgmr.msra.gmra.mxu1 %vm662_vm0, %v627_v3 }
  0xd2   : >> { %2830 = vmatpush.msk.msrb.mxu1 %vm666_vm11, %v651_v33  ;;  %2833 = vmatmul.msk.f32.vlgmr.msra.gmra.mxu3 %vm662_vm0, %v627_v3 }
  0xd3   : >> { %2834 = vmatpush.msk.msrb.mxu0 %vm666_vm11, %v653_v34  ;;  %2839 = vmatmul.msk.f32.vlgmr.msra.gmra.mxu2 %vm662_vm0, %v627_v3 }
  0xd4   : >> { %741 = vmatpush.msrb.mxu1 %v644_v35 }
  0xd5   : >> { %781 = vmatpush.msrb.mxu0 %v646_v36 }
  0xd6   : >> { %742 = vmatpush.msrb.mxu1 %v637_v37 }
  0xd7   : >> { %782 = vmatpush.msrb.mxu0 %v639_v38 }
  0xd8   : >> { %743 = vmatpush.msrb.mxu1 %v630_v39 }
  0xd9   : >> { %783 = vmatpush.msrb.mxu0 %v632_v40  ;;  %2831 = vmatmul.msk.f32.vlgmr.msrb.gmra.mxu1 %vm662_vm0, %v627_v3 }
  0xda   : >> { %2836 = vmatpush.msk.msra.mxu1 %vm666_vm11, %v654_v41  ;;  %2835 = vmatmul.msk.f32.vlgmr.msrb.gmra.mxu0 %vm662_vm0, %v627_v3  ;;  %vm1422_vm11 = vcmask 261120  }
  0xdc   : >> { %801 = vmatpush.msra.mxu1 %v647_v42 }
  0xde   : >> { %802 = vmatpush.msra.mxu1 %v640_v43 }
  0xe0   : >> { %803 = vmatpush.msra.mxu1 %v633_v44 }
  0xe1   : >> { %2837 = vmatmul.msk.f32.vlgmr.msra.gmra.mxu1 %vm662_vm0, %v627_v3  ;;  %vm4368_vm0 = vcmask 64512  }
  0xfc   : >> { %v660_v45 = vpop.permute.xlu0 %659 }
 0x14e   : >> { %v705_v46 = vpop.f32.mrf.mxu0  ;;  %v725_v47 = vpop.f32.mrf.mxu1 }
 0x14f   : >> { %v706_v48 = vadd.f32 %v705_v46, %v660_v45  ;;  %v726_v49 = vadd.f32 %v725_v47, %v660_v45 }
 0x151   : >> { %v828_v50 = vmax.f32 %v706_v48, 0.0  ;;  %v829_v51 = vmax.f32 %v726_v49, 0.0 }
 0x153   : >> { %844 = vrot.lane.b32.xlu2 %v829_v51, %s2995_s15  ;;  %842 = vrot.lane.b32.xlu1 %v828_v50, %s2995_s15 }
 0x155   : >> { %v765_v52 = vpop.f32.mrf.mxu3 }
 0x156   : >> { %v766_v53 = vadd.f32 %v765_v52, %v660_v45  ;;  %v745_v54 = vpop.f32.mrf.mxu1  ;;  %v825_v59 = vpop.f32.mrf.mxu2 }
 0x157   : >> { %v785_v55 = vpop.f32.mrf.mxu0  ;;  %v746_v56 = vadd.f32 %v745_v54, %v660_v45  ;;  %v826_v62 = vadd.f32 %v825_v59, %v660_v45 }
 0x158   : >> { %v786_v57 = vadd.f32 %v785_v55, %v660_v45  ;;  %v831_v58 = vmax.f32 %v766_v53, 0.0 }
 0x159   : >> { %v830_v60 = vmax.f32 %v746_v56, 0.0  ;;  %v834_v4 = vmax.f32 %v826_v62, 0.0 }
 0x15a   : >> { %v832_v61 = vmax.f32 %v786_v57, 0.0 }
 0x15b   : >> { %848 = vrot.lane.b32.xlu2 %v831_v58, %s2995_s15  ;;  %846 = vrot.lane.b32.xlu1 %v830_v60, %s2995_s15 }
 0x15c   : >> { %850 = vrot.lane.b32.xlu0 %v832_v61, %s2995_s15 }
 0x15e   : >> { %v805_v63 = vpop.f32.mrf.mxu1 }
 0x15f   : >> { %v806_v2 = vadd.f32 %v805_v63, %v660_v45 }
 0x161   : >> { %v833_v5 = vmax.f32 %v806_v2, 0.0 }
 0x163   : >> { %854 = vrot.lane.b32.xlu2 %v834_v4, %s2995_s15  ;;  %852 = vrot.lane.b32.xlu1 %v833_v5, %s2995_s15  ;;  %s3019_s15 = smov 120  }
 0x1ad   : >> { %v845_v6 = vpop.permute.xlu2 %844 }
 0x1b5   : >> { %v849_v7 = vpop.permute.xlu2 %848 }
 0x1bd   : >> { %v855_v11 = vpop.permute.xlu2 %854 }
 0x1be   : >> { %v875_v13 = vmax.f32 %v834_v4, %v855_v11 }
 0x1c5   : >> { %v843_v8 = vpop.permute.xlu1 %842 }
 0x1c6   : >> { %v856_v9 = vsel %vm414_vm5, %v843_v8, %v845_v6 }
 0x1c7   : >> { %v868_v10 = vmax.f32 %v828_v50, %v856_v9 }
 0x1c9   : >> { %883 = vrot.lane.b32.xlu0 %v868_v10, %s2996_s16 }
 0x1cd   : >> { %v847_v12 = vpop.permute.xlu1 %846 }
 0x1ce   : >> { %v857_v14 = vsel %vm414_vm5, %v845_v6, %v847_v12  ;;  %v858_v15 = vsel %vm414_vm5, %v847_v12, %v849_v7  ;;  %v851_v18 = vpop.permute.xlu0 %850 }
 0x1cf   : >> { %v870_v16 = vmax.f32 %v830_v60, %v858_v15  ;;  %v869_v17 = vmax.f32 %v829_v51, %v857_v14  ;;  %v859_v19 = vsel %vm414_vm5, %v849_v7, %v851_v18 }
 0x1d0   : >> { %v871_v23 = vmax.f32 %v831_v58, %v859_v19 }
 0x1d1   : >> { %895 = vrot.lane.b32.xlu0 %v875_v13, %s2996_s16  ;;  %887 = vrot.lane.b32.xlu2 %v870_v16, %s2996_s16 }
 0x1d2   : >> { %885 = vrot.lane.b32.xlu1 %v869_v17, %s2996_s16 }
 0x1d5   : >> { %v853_v20 = vpop.permute.xlu1 %852 }
 0x1d6   : >> { %v860_v21 = vsel %vm414_vm5, %v851_v18, %v853_v20  ;;  %v861_v22 = vsel %vm414_vm5, %v853_v20, %v855_v11  ;;  %vm1024_vm5 = vcmask 982016  }
 0x1d7   : >> { %v3294_v24 = vmax.f32 %v833_v5, %v861_v22  ;;  %v3296_v25 = vmax.f32 %v832_v61, %v860_v21 }
 0x1d9   : >> { %889 = vrot.lane.b32.xlu0 %v871_v23, %s2996_s16  ;;  %893 = vrot.lane.b32.xlu2 %v3294_v24, %s2996_s16 }
 0x1da   : >> { %891 = vrot.lane.b32.xlu1 %v3296_v25, %s2996_s16  ;;  %s3020_s16 = smov 66  }
 0x22b   : >> { %v888_v28 = vpop.permute.xlu2 %887 }
 0x233   : >> { %v3382_v48 = vpop.permute.xlu2 %893 }
 0x23b   : >> { %v884_v26 = vpop.permute.xlu0 %883 }
 0x243   : >> { %v3303_v27 = vpop.permute.xlu0 %895 }
 0x244   : >> { %v886_v29 = vpop.permute.xlu1 %885 }
 0x245   : >> { %v897_v30 = vsel %vm450_vm1, %v884_v26, %v886_v29  ;;  %v898_v3 = vsel %vm450_vm1, %v886_v29, %v888_v28 }
 0x246   : >> { %v909_v31 = vmax.f32 %v868_v10, %v897_v30  ;;  %v3307_v32 = vmax.f32 %v869_v17, %v898_v3  ;;  %v902_v3 = vsel %vm450_vm1, %v3382_v48, %v3303_v27 }
 0x248   : >> { %915 = vst [vmem:[#allocation3 + $0xc8] sm:$0x3f] %v909_v31  ;;  %1016 = vrot.lane.b32.xlu2 %v3307_v32, %s3019_s15  ;;  %1014 = vrot.lane.b32.xlu1 %v909_v31, %s3019_s15  ;;  %v3340_v40 = vrot.slane %v3307_v32, 2  ;;  %v924_v41 = vrot.slane %v909_v31, 2  ;;  %v955_v42 = vrot.slane %v909_v31, 4  ;;  %v3350_v44 = vrot.slane %v3307_v32, 4 }
 0x249   : >> { %916 = vst [vmem:[#allocation3 + $0x8] sm:$0x3f] %v3307_v32  ;;  %v3358_v45 = vrot.slane %v3307_v32, 6  ;;  %v986_v46 = vrot.slane %v909_v31, 6 }
 0x24b   : >> { %v890_v33 = vpop.permute.xlu0 %889 }
 0x24c   : >> { %v899_v34 = vsel %vm450_vm1, %v888_v28, %v890_v33  ;;  %v3314_v35 = vpop.permute.xlu1 %891 }
 0x24d   : >> { %v911_v36 = vmax.f32 %v870_v16, %v899_v34  ;;  %v900_v37 = vsel %vm450_vm1, %v890_v33, %v3314_v35  ;;  %v901_v17 = vsel %vm450_vm1, %v3314_v35, %v3382_v48  ;;  %v3497_v33 = vmax.f32 %v3294_v24, %v902_v3 }
 0x24e   : >> { %v3318_v38 = vmax.f32 %v871_v23, %v900_v37  ;;  %v3471_v19 = vmax.f32 %v3296_v25, %v901_v17  ;;  %vm1144_vm1 = vcmask 523264  }
 0x24f   : >> { %917 = vst [vmem:[#allocation3 + $0x40] sm:$0x3f] %v911_v36  ;;  %1018 = vrot.lane.b32.xlu0 %v911_v36, %s3019_s15  ;;  %v3337_v39 = vrot.slane %v911_v36, 2  ;;  %v3347_v43 = vrot.slane %v911_v36, 4  ;;  %v3360_v47 = vrot.slane %v911_v36, 6 }
 0x250   : >> { %918 = vst [vmem:[#allocation3 + $0x28] sm:$0x3f] %v3318_v38  ;;  %1115 = vrot.lane.b32.xlu2 %v911_v36, %s3020_s16  ;;  %1113 = vrot.lane.b32.xlu1 %v3307_v32, %s3020_s16  ;;  %v3509_v24 = vrot.slane %v3318_v38, 2 }
 0x257   : >> { %1111 = vrot.lane.b32.xlu0 %v909_v31, %s3020_s16 }
 0x258   : >> { %1209 = vrot.lane.b32.xlu2 %v909_v31, %s3017_s13  ;;  %1213 = vrot.lane.b32.xlu1 %v911_v36, %s3017_s13 }
 0x25f   : >> { %1211 = vrot.lane.b32.xlu0 %v3307_v32, %s3017_s13 }
 0x260   : >> { %1312 = vrot.lane.b32.xlu2 %v911_v36, %s3021_s25  ;;  %1310 = vrot.lane.b32.xlu1 %v3307_v32, %s3021_s25 }
 0x267   : >> { %1412 = vrot.lane.b32.xlu0 %v3307_v32, %s4365_s30 }
 0x268   : >> { %1514 = vrot.lane.b32.xlu2 %v911_v36, %s3023_s14  ;;  %1414 = vrot.lane.b32.xlu1 %v911_v36, %s4365_s30 }
 0x26f   : >> { %933 = vrot.lane.b32.xlu0 %v3337_v39, %s2998_s19 }
 0x270   : >> { %931 = vrot.lane.b32.xlu2 %v3340_v40, %s2998_s19  ;;  %929 = vrot.lane.b32.xlu1 %v924_v41, %s2998_s19 }
 0x277   : >> { %960 = vrot.lane.b32.xlu0 %v955_v42, %s2997_s18 }
 0x278   : >> { %964 = vrot.lane.b32.xlu2 %v3347_v43, %s2997_s18  ;;  %962 = vrot.lane.b32.xlu1 %v3350_v44, %s2997_s18 }
 0x27f   : >> { %993 = vrot.lane.b32.xlu0 %v3358_v45, %s3024_s20 }
 0x280   : >> { %991 = vrot.lane.b32.xlu2 %v986_v46, %s3024_s20  ;;  %995 = vrot.lane.b32.xlu1 %v3360_v47, %s3024_s20 }
 0x287   : >> { %1037 = vrot.lane.b32.xlu0 %v924_v41, %s3004_s28 }
 0x288   : >> { %1041 = vrot.lane.b32.xlu2 %v3337_v39, %s3004_s28  ;;  %1039 = vrot.lane.b32.xlu1 %v3340_v40, %s3004_s28 }
 0x28f   : >> { %1065 = vrot.lane.b32.xlu0 %v3350_v44, %s4357_s29 }
 0x290   : >> { %1063 = vrot.lane.b32.xlu2 %v955_v42, %s4357_s29  ;;  %1067 = vrot.lane.b32.xlu1 %v3347_v43, %s4357_s29  ;;  %s3031_s29 = smov 80  }
 0x297   : >> { %1093 = vrot.lane.b32.xlu0 %v3360_v47, %s4374_s21 }
 0x298   : >> { %1091 = vrot.lane.b32.xlu2 %v3358_v45, %s4374_s21  ;;  %1089 = vrot.lane.b32.xlu1 %v986_v46, %s4374_s21 }
 0x29f   : >> { %1136 = vrot.lane.b32.xlu0 %v3340_v40, %s4347_s24 }
 0x2a0   : >> { %1134 = vrot.lane.b32.xlu2 %v924_v41, %s4347_s24  ;;  %1138 = vrot.lane.b32.xlu1 %v3337_v39, %s4347_s24  ;;  %s4351_s24 = smov 10  }
 0x2a2   : >> { %v1017_v49 = vpop.permute.xlu2 %1016 }
 0x2a7   : >> { %1165 = vrot.lane.b32.xlu0 %v3347_v43, %s4349_s22 }
 0x2a8   : >> { %1163 = vrot.lane.b32.xlu2 %v3350_v44, %s4349_s22  ;;  %1161 = vrot.lane.b32.xlu1 %v955_v42, %s4349_s22  ;;  %s4353_s22 = smov 8  }
 0x2aa   : >> { %v3394_v50 = vpop.permute.xlu2 %1115 }
 0x2af   : >> { %1187 = vrot.lane.b32.xlu0 %v986_v46, %s4355_s12  ;;  %v3523_v46 = vrot.slane %v3471_v19, 2 }
 0x2b0   : >> { %1191 = vrot.lane.b32.xlu2 %v3360_v47, %s4355_s12  ;;  %1189 = vrot.lane.b32.xlu1 %v3358_v45, %s4355_s12  ;;  %s3030_s12 = smov 82  }
 0x2b2   : >> { %v1210_v51 = vpop.permute.xlu2 %1209 }
 0x2b7   : >> { %1235 = vrot.lane.b32.xlu0 %v3337_v39, %s4351_s24 }
 0x2b8   : >> { %1233 = vrot.lane.b32.xlu2 %v3340_v40, %s4351_s24  ;;  %1231 = vrot.lane.b32.xlu1 %v924_v41, %s4351_s24  ;;  %s4361_s24 = smov 88  }
 0x2ba   : >> { %v3406_v52 = vpop.permute.xlu2 %1312  ;;  %v1015_v53 = vpop.permute.xlu1 %1014 }
 0x2bb   : >> { %v1025_v54 = vsel %vm1024_vm5, %v1015_v53, %v1017_v49 }
 0x2bc   : >> { %1033 = vst [vmem:[#allocation3 + $0x188] sm:$0x3f] %v1025_v54 }
 0x2bf   : >> { %1258 = vrot.lane.b32.xlu0 %v955_v42, %s4353_s22 }
 0x2c0   : >> { %1262 = vrot.lane.b32.xlu2 %v3347_v43, %s4353_s22  ;;  %1260 = vrot.lane.b32.xlu1 %v3350_v44, %s4353_s22  ;;  %s4359_s22 = smov 84  }
 0x2c1   : >> { %v3414_v55 = vpop.permute.xlu0 %1018 }
 0x2c2   : >> { %v1026_v56 = vsel %vm1024_vm5, %v1017_v49, %v3414_v55  ;;  %v3418_v57 = vpop.permute.xlu2 %1514  ;;  %v1114_v58 = vpop.permute.xlu1 %1113 }
 0x2c3   : >> { %1034 = vst [vmem:[#allocation3 + $0x98] sm:$0x3f] %v1026_v56  ;;  %v1123_v59 = vsel %vm1121_vm9, %v1114_v58, %v3394_v50  ;;  %v3542_v56 = vrot.slane %v3318_v38, 6 }
 0x2c4   : >> { %1131 = vst [vmem:[#allocation3 + $0x1c0] sm:$0x3f] %v1123_v59 }
 0x2c7   : >> { %1289 = vrot.lane.b32.xlu0 %v3360_v47, %s4361_s24 }
 0x2c8   : >> { %1287 = vrot.lane.b32.xlu2 %v3358_v45, %s4361_s24  ;;  %1336 = vrot.lane.b32.xlu1 %v3337_v39, %s4359_s22  ;;  %s4363_s24 = smov 30  }
 0x2c9   : >> { %v1112_v60 = vpop.permute.xlu0 %1111 }
 0x2ca   : >> { %v932_v61 = vpop.permute.xlu2 %931  ;;  %v1122_v62 = vsel %vm1121_vm9, %v1112_v60, %v1114_v58  ;;  %v3429_v63 = vpop.permute.xlu1 %1213 }
 0x2cb   : >> { %1130 = vst [vmem:[#allocation3 + $0x1f8] sm:$0x3f] %v1122_v62 }
 0x2cf   : >> { %1334 = vrot.lane.b32.xlu0 %v3340_v40, %s4359_s22  ;;  %s3032_s22 = smov 28  }
 0x2d0   : >> { %1362 = vrot.lane.b32.xlu2 %v3350_v44, %s3030_s12  ;;  %1389 = vrot.lane.b32.xlu1 %v3358_v45, %s3031_s29 }
 0x2d1   : >> { %v1212_v2 = vpop.permute.xlu0 %1211 }
 0x2d2   : >> { %v3437_v4 = vpop.permute.xlu2 %964  ;;  %v1219_v5 = vsel %vm621_vm4, %v1210_v51, %v1212_v2  ;;  %v1220_v6 = vsel %vm621_vm4, %v1212_v2, %v3429_v63  ;;  %v1311_v7 = vpop.permute.xlu1 %1310  ;;  %v3556_v2 = vrot.slane %v3318_v38, 4 }
 0x2d3   : >> { %1227 = vst [vmem:[#allocation3 + $0x1d0] sm:$0x3f] %v1219_v5  ;;  %v1321_v8 = vsel %vm1320_vm10, %v1311_v7, %v3406_v52 }
 0x2d4   : >> { %1228 = vst [vmem:[#allocation3 + $0x1e0] sm:$0x3f] %v1220_v6 }
 0x2d5   : >> { %1329 = vst [vmem:[#allocation3 + $0x218] sm:$0x3f] %v1321_v8 }
 0x2d7   : >> { %1364 = vrot.lane.b32.xlu0 %v3347_v43, %s3030_s12 }
 0x2d8   : >> { %1391 = vrot.lane.b32.xlu2 %v3360_v47, %s3031_s29  ;;  %1464 = vrot.lane.b32.xlu1 %v3347_v43, %s3032_s22 }
 0x2d9   : >> { %v1413_v9 = vpop.permute.xlu0 %1412 }
 0x2da   : >> { %v992_v10 = vpop.permute.xlu2 %991  ;;  %v3450_v11 = vpop.permute.xlu1 %1414 }
 0x2db   : >> { %v1423_v12 = vsel %vm1422_vm11, %v1413_v9, %v3450_v11  ;;  %v3572_v9 = vrot.slane %v3471_v19, 6 }
 0x2dc   : >> { %1431 = vst [vmem:[#allocation3 + $0x248] sm:$0x3f] %v1423_v12 }
 0x2df   : >> { %1437 = vrot.lane.b32.xlu0 %v3337_v39, %s4363_s24 }
 0x2e0   : >> { %1435 = vrot.lane.b32.xlu2 %v3340_v40, %s4363_s24  ;;  %1020 = vrot.lane.b32.xlu1 %v3318_v38, %s3019_s15  ;;  %s3034_s24 = smov 26  }
 0x2e1   : >> { %v3460_v13 = vpop.permute.xlu0 %933 }
 0x2e2   : >> { %v940_v14 = vsel %vm423_vm8, %v932_v61, %v3460_v13  ;;  %v3464_v15 = vpop.permute.xlu2 %1041  ;;  %v930_v16 = vpop.permute.xlu1 %929 }
 0x2e3   : >> { %948 = vst [vmem:[#allocation3 + $0x8] sm:$0xc0] %v940_v14  ;;  %v939_v18 = vsel %vm423_vm8, %v930_v16, %v932_v61 }
 0x2e4   : >> { %952 = vst [vmem:[#allocation3 + $0xf0] sm:$0xf] %v940_v14 }
 0x2e5   : >> { %947 = vst [vmem:[#allocation3 + $0xc8] sm:$0xc0] %v939_v18 }
 0x2e6   : >> { %951 = vst [vmem:[#allocation3 + $0xe8] sm:$0xf] %v939_v18 }
 0x2e7   : >> { %1491 = vrot.lane.b32.xlu0 %v3360_v47, %s3034_s24  ;;  %v3526_v47 = vrot.slane %v3471_v19, 4 }
 0x2e8   : >> { %1022 = vrot.lane.b32.xlu2 %v3471_v19, %s3019_s15  ;;  %1119 = vrot.lane.b32.xlu1 %v3471_v19, %s3020_s16 }
 0x2e9   : >> { %v961_v20 = vpop.permute.xlu0 %960 }
 0x2ea   : >> { %v1064_v21 = vpop.permute.xlu2 %1063  ;;  %v963_v22 = vpop.permute.xlu1 %962 }
 0x2eb   : >> { %v970_v23 = vsel %vm441_vm7, %v961_v20, %v963_v22  ;;  %v971_v25 = vsel %vm441_vm7, %v963_v22, %v3437_v4 }
 0x2ec   : >> { %978 = vst [vmem:[#allocation3 + $0xe8] sm:$0xf0] %v970_v23 }
 0x2ed   : >> { %979 = vst [vmem:[#allocation3 + $0xf0] sm:$0xf0] %v971_v25 }
 0x2ee   : >> { %982 = vst [vmem:[#allocation3 + $0xd8] sm:$0x3] %v970_v23 }
 0x2ef   : >> { %983 = vst [vmem:[#allocation3 + $0x148] sm:$0x3] %v971_v25  ;;  %1117 = vrot.lane.b32.xlu0 %v3318_v38, %s3020_s16  ;;  %s4375_s16 = smov 70  }
 0x2f0   : >> { %1215 = vrot.lane.b32.xlu2 %v3318_v38, %s3017_s13  ;;  %1316 = vrot.lane.b32.xlu1 %v3471_v19, %s3021_s25 }
 0x2f1   : >> { %v994_v26 = vpop.permute.xlu0 %993 }
 0x2f2   : >> { %v1092_v28 = vpop.permute.xlu2 %1091  ;;  %v1002_v29 = vsel %vm1001_vm13, %v992_v10, %v994_v26  ;;  %v3489_v30 = vpop.permute.xlu1 %995 }
 0x2f3   : >> { %1010 = vst [vmem:[#allocation3 + $0xd8] sm:$0xfc] %v1002_v29  ;;  %v1003_v31 = vsel %vm1001_vm13, %v994_v26, %v3489_v30 }
 0x2f4   : >> { %1011 = vst [vmem:[#allocation3 + $0x148] sm:$0xfc] %v1003_v31 }
 0x2f7   : >> { %1217 = vrot.lane.b32.xlu0 %v3471_v19, %s3017_s13 }
 0x2f8   : >> { %1318 = vrot.lane.b32.xlu2 %v3497_v33, %s3021_s25  ;;  %1420 = vrot.lane.b32.xlu1 %v3497_v33, %s4365_s30 }
 0x2f9   : >> { %v1038_v34 = vpop.permute.xlu0 %1037 }
 0x2fa   : >> { %v1135_v35 = vpop.permute.xlu2 %1134  ;;  %v1040_v27 = vpop.permute.xlu1 %1039 }
 0x2fb   : >> { %v1047_v36 = vsel %vm495_vm14, %v1038_v34, %v1040_v27  ;;  %v1048_v37 = vsel %vm495_vm14, %v1040_v27, %v3464_v15 }
 0x2fc   : >> { %1055 = vst [vmem:[#allocation3 + $0x188] sm:$0xc0] %v1047_v36 }
 0x2fd   : >> { %1056 = vst [vmem:[#allocation3 + $0x98] sm:$0xc0] %v1048_v37 }
 0x2fe   : >> { %1059 = vst [vmem:[#allocation3 + $0x10] sm:$0xf] %v1047_v36 }
 0x2ff   : >> { %1060 = vst [vmem:[#allocation3 + $0x60] sm:$0xf] %v1048_v37  ;;  %1314 = vrot.lane.b32.xlu0 %v3318_v38, %s3021_s25  ;;  %s4376_s25 = smov 16  }
 0x300   : >> { %1416 = vrot.lane.b32.xlu2 %v3318_v38, %s4365_s30  ;;  %935 = vrot.lane.b32.xlu1 %v3509_v24, %s2998_s19 }
 0x301   : >> { %v1066_v39 = vpop.permute.xlu0 %1065 }
 0x302   : >> { %v1164_v40 = vpop.permute.xlu2 %1163  ;;  %v1073_v41 = vsel %vm513_vm6, %v1064_v21, %v1066_v39  ;;  %v3518_v42 = vpop.permute.xlu1 %1067 }
 0x303   : >> { %1081 = vst [vmem:[#allocation3 + $0x10] sm:$0xf0] %v1073_v41  ;;  %v1074_v43 = vsel %vm513_vm6, %v1066_v39, %v3518_v42 }
 0x304   : >> { %1085 = vst [vmem:[#allocation3 + $0xa0] sm:$0x3] %v1073_v41 }
 0x305   : >> { %1082 = vst [vmem:[#allocation3 + $0x60] sm:$0xf0] %v1074_v43 }
 0x306   : >> { %1086 = vst [vmem:[#allocation3 + $0x90] sm:$0x3] %v1074_v43  ;;  %v1333_v43 = vrot.slane %v3497_v33, 2 }
 0x307   : >> { %1418 = vrot.lane.b32.xlu0 %v3471_v19, %s4365_s30  ;;  %s4379_s30 = smov 10  }
 0x308   : >> { %937 = vrot.lane.b32.xlu2 %v3523_v46, %s2998_s19  ;;  %968 = vrot.lane.b32.xlu1 %v3526_v47, %s2997_s18 }
 0x309   : >> { %v3534_v48 = vpop.permute.xlu0 %1093 }
 0x30a   : >> { %v3536_v49 = vpop.permute.xlu2 %1191  ;;  %v1100_v51 = vsel %vm531_vm2, %v1092_v28, %v3534_v48  ;;  %v1090_v53 = vpop.permute.xlu1 %1089 }
 0x30b   : >> { %1108 = vst [vmem:[#allocation3 + $0x90] sm:$0xfc] %v1100_v51  ;;  %v1099_v54 = vsel %vm531_vm2, %v1090_v53, %v1092_v28 }
 0x30c   : >> { %1107 = vst [vmem:[#allocation3 + $0xa0] sm:$0xfc] %v1099_v54 }
 0x30f   : >> { %1516 = vrot.lane.b32.xlu0 %v3318_v38, %s3023_s14 }
 0x310   : >> { %997 = vrot.lane.b32.xlu2 %v3542_v56, %s3024_s20  ;;  %1045 = vrot.lane.b32.xlu1 %v3523_v46, %s3004_s28 }
 0x311   : >> { %v1137_v58 = vpop.permute.xlu0 %1136 }
 0x312   : >> { %v1234_v59 = vpop.permute.xlu2 %1233  ;;  %v1145_v60 = vsel %vm1144_vm1, %v1135_v35, %v1137_v58  ;;  %v3551_v61 = vpop.permute.xlu1 %1138 }
 0x313   : >> { %1153 = vst [vmem:[#allocation3 + $0x1f8] sm:$0xc0] %v1145_v60  ;;  %v1146_v62 = vsel %vm1144_vm1, %v1137_v58, %v3551_v61 }
 0x314   : >> { %1157 = vst [vmem:[#allocation3 + $0xa8] sm:$0xf] %v1145_v60  ;;  %v3647_v60 = vrot.slane %v3497_v33, 6 }
 0x315   : >> { %1154 = vst [vmem:[#allocation3 + $0x1c0] sm:$0xc0] %v1146_v62 }
 0x316   : >> { %1158 = vst [vmem:[#allocation3 + $0x80] sm:$0xf] %v1146_v62 }
 0x317   : >> { %966 = vrot.lane.b32.xlu0 %v3556_v2, %s2997_s18 }
 0x318   : >> { %1069 = vrot.lane.b32.xlu2 %v3556_v2, %s4375_s16  ;;  %1095 = vrot.lane.b32.xlu1 %v3542_v56, %s4374_s21 }
 0x319   : >> { %v3564_v5 = vpop.permute.xlu0 %1165 }
 0x31a   : >> { %v3566_v6 = vpop.permute.xlu2 %1262  ;;  %v1172_v7 = vsel %vm585_vm12, %v1164_v40, %v3564_v5  ;;  %v1162_v8 = vpop.permute.xlu1 %1161 }
 0x31b   : >> { %1180 = vst [vmem:[#allocation3 + $0x80] sm:$0xf0] %v1172_v7  ;;  %v1171_v38 = vsel %vm585_vm12, %v1162_v8, %v1164_v40 }
 0x31c   : >> { %1184 = vst [vmem:[#allocation3 + $0xe0] sm:$0x3] %v1172_v7 }
 0x31d   : >> { %1179 = vst [vmem:[#allocation3 + $0xa8] sm:$0xf0] %v1171_v38 }
 0x31e   : >> { %1183 = vst [vmem:[#allocation3 + $0x228] sm:$0x3] %v1171_v38 }
 0x31f   : >> { %999 = vrot.lane.b32.xlu0 %v3572_v9, %s3024_s20  ;;  %s4377_s20 = smov 64  }
 0x320   : >> { %1097 = vrot.lane.b32.xlu2 %v3572_v9, %s4374_s21  ;;  %1167 = vrot.lane.b32.xlu1 %v3556_v2, %s4376_s25  ;;  %s4378_s21 = smov 14  }
 0x321   : >> { %v1188_v10 = vpop.permute.xlu0 %1187 }
 0x322   : >> { %v1288_v12 = vpop.permute.xlu2 %1287  ;;  %v1190_v14 = vpop.permute.xlu1 %1189 }
 0x323   : >> { %v1197_v16 = vsel %vm4367_vm3, %v1188_v10, %v1190_v14  ;;  %v1198_v17 = vsel %vm4367_vm3, %v1190_v14, %v3536_v49  ;;  %vm4370_vm3 = vcmask 719872  }
 0x324   : >> { %1205 = vst [vmem:[#allocation3 + $0x228] sm:$0xfc] %v1197_v16 }
 0x325   : >> { %1206 = vst [vmem:[#allocation3 + $0xe0] sm:$0xfc] %v1198_v17 }
 0x327   : >> { %1043 = vrot.lane.b32.xlu0 %v3509_v24, %s3004_s28 }
 0x328   : >> { %1140 = vrot.lane.b32.xlu2 %v3509_v24, %s4377_s20  ;;  %1195 = vrot.lane.b32.xlu1 %v3572_v9, %s4378_s21 }
 0x329   : >> { %v3589_v18 = vpop.permute.xlu0 %1235 }
 0x32a   : >> { %v1363_v20 = vpop.permute.xlu2 %1362  ;;  %v1243_v21 = vsel %vm4369_vm15, %v1234_v59, %v3589_v18  ;;  %v1232_v22 = vpop.permute.xlu1 %1231 }
 0x32b   : >> { %1251 = vst [vmem:[#allocation3 + $0x1e0] sm:$0xc0] %v1243_v21  ;;  %v1242_v23 = vsel %vm4369_vm15, %v1232_v22, %v1234_v59  ;;  %vm4371_vm15 = vcmask 654336  }
 0x32c   : >> { %1255 = vst [vmem:[#allocation3 + $0x1b0] sm:$0xf] %v1243_v21  ;;  %v1361_v21 = vrot.slane %v3497_v33, 4 }
 0x32d   : >> { %1250 = vst [vmem:[#allocation3 + $0x1d0] sm:$0xc0] %v1242_v23 }
 0x32e   : >> { %1254 = vst [vmem:[#allocation3 + $0x48] sm:$0xf] %v1242_v23 }
 0x32f   : >> { %1071 = vrot.lane.b32.xlu0 %v3526_v47, %s4375_s16  ;;  %s4380_s16 = smov 8  }
 0x330   : >> { %1169 = vrot.lane.b32.xlu2 %v3526_v47, %s4376_s25  ;;  %1237 = vrot.lane.b32.xlu1 %v3509_v24, %s4379_s30 }
 0x331   : >> { %v1259_v25 = vpop.permute.xlu0 %1258 }
 0x332   : >> { %v3600_v26 = vpop.permute.xlu2 %1391  ;;  %v1261_v28 = vpop.permute.xlu1 %1260 }
 0x333   : >> { %v1269_v29 = vsel %vm4368_vm0, %v1259_v25, %v1261_v28  ;;  %v1270_v3 = vsel %vm4368_vm0, %v1261_v28, %v3566_v6  ;;  %vm1344_vm0 = vcmask 687104  }
 0x334   : >> { %1277 = vst [vmem:[#allocation3 + $0x48] sm:$0xf0] %v1269_v29 }
 0x335   : >> { %1278 = vst [vmem:[#allocation3 + $0x1b0] sm:$0xf0] %v1270_v3 }
 0x336   : >> { %1281 = vst [vmem:[#allocation3 + $0x118] sm:$0x3] %v1269_v29 }
 0x337   : >> { %1282 = vst [vmem:[#allocation3 + $0x38] sm:$0x3] %v1270_v3  ;;  %1142 = vrot.lane.b32.xlu0 %v3523_v46, %s4377_s20  ;;  %s4381_s20 = smov 88  }
 0x338   : >> { %1239 = vrot.lane.b32.xlu2 %v3523_v46, %s4379_s30  ;;  %1266 = vrot.lane.b32.xlu1 %v3526_v47, %s4380_s16  ;;  %s4382_s30 = smov 84  }
 0x339   : >> { %v3611_v31 = vpop.permute.xlu0 %1289 }
 0x33a   : >> { %v1436_v34 = vpop.permute.xlu2 %1435  ;;  %v1298_v35 = vsel %vm4370_vm3, %v1288_v12, %v3611_v31  ;;  %v3615_v27 = vpop.permute.xlu1 %1336  ;;  %vm1372_vm3 = vcmask 670720  }
 0x33b   : >> { %1306 = vst [vmem:[#allocation3 + $0x118] sm:$0xfc] %v1298_v35 }
 0x33f   : >> { %1193 = vrot.lane.b32.xlu0 %v3542_v56, %s4378_s21  ;;  %s4383_s21 = smov 30  }
 0x340   : >> { %1293 = vrot.lane.b32.xlu2 %v3572_v9, %s4381_s20  ;;  %1291 = vrot.lane.b32.xlu1 %v3542_v56, %s4381_s20 }
 0x341   : >> { %v1335_v36 = vpop.permute.xlu0 %1334 }
 0x342   : >> { %v1345_v37 = vsel %vm1344_vm0, %v1335_v36, %v3615_v27  ;;  %v1023_v39 = vpop.permute.xlu2 %1022  ;;  %v1390_v40 = vpop.permute.xlu1 %1389 }
 0x343   : >> { %1353 = vst [vmem:[#allocation3 + $0x218] sm:$0xc0] %v1345_v37  ;;  %v1400_v41 = vsel %vm4371_vm15, %v1390_v40, %v3600_v26  ;;  %vm1445_vm15 = vcmask 244736  }
 0x344   : >> { %1357 = vst [vmem:[#allocation3 + $0x208] sm:$0xf] %v1345_v37 }
 0x345   : >> { %1408 = vst [vmem:[#allocation3 + $0x170] sm:$0xfc] %v1400_v41  ;;  %v1567_v41 = vld [vmem:[#allocation3 + $0xa8] sm:$0xff] }
 0x347   : >> { %1264 = vrot.lane.b32.xlu0 %v3556_v2, %s4380_s16 }
 0x348   : >> { %1338 = vrot.lane.b32.xlu2 %v3509_v24, %s4382_s30  ;;  %1342 = vrot.lane.b32.xlu1 %v1333_v43, %s4382_s30 }
 0x349   : >> { %v3635_v51 = vpop.permute.xlu0 %1364 }
 0x34a   : >> { %v1373_v53 = vsel %vm1372_vm3, %v1363_v20, %v3635_v51  ;;  %v3639_v54 = vpop.permute.xlu2 %1215  ;;  %v3641_v58 = vpop.permute.xlu1 %1464  ;;  %v1587_v23 = vld [vmem:[#allocation3 + $0x218] sm:$0xff] }
 0x34b   : >> { %1381 = vst [vmem:[#allocation3 + $0x208] sm:$0xf0] %v1373_v53  ;;  %v1221_v59 = vsel %vm621_vm4, %v3429_v63, %v3639_v54 }
 0x34c   : >> { %1385 = vst [vmem:[#allocation3 + $0x170] sm:$0x3] %v1373_v53 }
 0x34d   : >> { %1229 = vst [vmem:[#allocation3 + $0x20] sm:$0x3f] %v1221_v59 }
 0x34f   : >> { %1295 = vrot.lane.b32.xlu0 %v3647_v60, %s4381_s20 }
 0x350   : >> { %1368 = vrot.lane.b32.xlu2 %v3526_v47, %s3030_s12  ;;  %1366 = vrot.lane.b32.xlu1 %v3556_v2, %s3030_s12 }
 0x351   : >> { %v3655_v62 = vpop.permute.xlu0 %1437 }
 0x352   : >> { %v1446_v63 = vsel %vm1445_vm15, %v1436_v34, %v3655_v62  ;;  %v1319_v7 = vpop.permute.xlu2 %1318  ;;  %v1021_v8 = vpop.permute.xlu1 %1020  ;;  %v1591_v22 = vld [vmem:[#allocation3 + $0x208] sm:$0xff]  ;;  %v1583_v34 = vld [vmem:[#allocation3 + $0x118] sm:$0xff] }
 0x353   : >> { %1454 = vst [vmem:[#allocation3 + $0x248] sm:$0xc0] %v1446_v63  ;;  %v1027_v38 = vsel %vm1024_vm5, %v3414_v55, %v1021_v8  ;;  %v1028_v10 = vsel %vm1024_vm5, %v1021_v8, %v1023_v39  ;;  %v1595_v20 = vld [vmem:[#allocation3 + $0x170] sm:$0xff] }
 0x354   : >> { %1458 = vst [vmem:[#allocation3 + $0x78] sm:$0xf] %v1446_v63 }
 0x355   : >> { %1035 = vst [vmem:[#allocation3 + $0x230] sm:$0x3f] %v1027_v38  ;;  %v1551_v38 = vld [vmem:[#allocation3 + $0x188] sm:$0xff] }
 0x356   : >> { %1036 = vst [vmem:[#allocation3 + $0x58] sm:$0x3f] %v1028_v10  ;;  %v1543_v10 = vld [vmem:[#allocation3 + $0xe8] sm:$0xff] }
 0x357   : >> { %1340 = vrot.lane.b32.xlu0 %v3523_v46, %s4382_s30 }
 0x358   : >> { %1397 = vrot.lane.b32.xlu2 %v3647_v60, %s3031_s29  ;;  %1395 = vrot.lane.b32.xlu1 %v3572_v9, %s3031_s29 }
 0x359   : >> { %v3668_v12 = vpop.permute.xlu0 %1491 }
 0x35a   : >> { %v3670_v14 = vpop.permute.xlu2 %1416  ;;  %v1120_v16 = vpop.permute.xlu1 %1119  ;;  %v1599_v55 = vld [vmem:[#allocation3 + $0x248] sm:$0xff] }
 0x35b   : >> { %v1424_v17 = vsel %vm1422_vm11, %v3450_v11, %v3670_v14  ;;  %1647 = vmatpush.msrb.mxu3 %v1599_v55 }
 0x35c   : >> { %1432 = vst [vmem:[#allocation3 + $0x50] sm:$0x3f] %v1424_v17 }
 0x35d   : >> { %1648 = vmatpush.msrb.mxu3 %v1595_v20 }
 0x35f   : >> { %1370 = vrot.lane.b32.xlu0 %v1361_v21, %s3030_s12  ;;  %1649 = vmatpush.msrb.mxu3 %v1591_v22 }
 0x360   : >> { %1466 = vrot.lane.b32.xlu2 %v3556_v2, %s3032_s22  ;;  %1439 = vrot.lane.b32.xlu1 %v3509_v24, %s4383_s21  ;;  %v1579_v2 = vld [vmem:[#allocation3 + $0x48] sm:$0xff]  ;;  %v1575_v24 = vld [vmem:[#allocation3 + $0x1d0] sm:$0xff] }
 0x361   : >> { %v1118_v11 = vpop.permute.xlu0 %1117  ;;  %1650 = vmatpush.msrb.mxu3 %v1587_v23 }
 0x362   : >> { %v938_v25 = vpop.permute.xlu2 %937  ;;  %v1124_v28 = vsel %vm1121_vm9, %v3394_v50, %v1118_v11  ;;  %v1125_v29 = vsel %vm1121_vm9, %v1118_v11, %v1120_v16  ;;  %v1317_v3 = vpop.permute.xlu1 %1316  ;;  %v1571_v50 = vld [vmem:[#allocation3 + $0x228] sm:$0xff]  ;;  %vm1634_vm9 = vcmask 1045504  }
 0x363   : >> { %1132 = vst [vmem:[#allocation3 + $0x30] sm:$0x3f] %v1124_v28  ;;  %v1324_v35 = vsel %vm1320_vm10, %v1317_v3, %v1319_v7  ;;  %1651 = vmatpush.msrb.mxu3 %v1583_v34 }
 0x364   : >> { %1133 = vst [vmem:[#allocation3 + $0x1a8] sm:$0x3f] %v1125_v29 }
 0x365   : >> { %1332 = vst [vmem:[#allocation3 + $0xb8] sm:$0x3f] %v1324_v35  ;;  %1652 = vmatpush.msrb.mxu3 %v1579_v2 }
 0x367   : >> { %1393 = vrot.lane.b32.xlu0 %v3542_v56, %s3031_s29  ;;  %1653 = vmatpush.msrb.mxu3 %v1575_v24  ;;  %s3036_s29 = smov 4  }
 0x368   : >> { %1441 = vrot.lane.b32.xlu2 %v3523_v46, %s4383_s21  ;;  %1493 = vrot.lane.b32.xlu1 %v3542_v56, %s3034_s24  ;;  %v1563_v46 = vld [vmem:[#allocation3 + $0x1f8] sm:$0xff]  ;;  %v1559_v56 = vld [vmem:[#allocation3 + $0xa0] sm:$0xff] }
 0x369   : >> { %v1218_v36 = vpop.permute.xlu0 %1217  ;;  %1654 = vmatpush.msrb.mxu3 %v1571_v50 }
 0x36a   : >> { %v1222_v37 = vsel %vm621_vm4, %v3639_v54, %v1218_v36  ;;  %v3695_v39 = vpop.permute.xlu2 %997  ;;  %v1421_v40 = vpop.permute.xlu1 %1420  ;;  %v1555_v54 = vld [vmem:[#allocation3 + $0x10] sm:$0xff]  ;;  %vm1522_vm4 = vcmask 195584  }
 0x36b   : >> { %1230 = vst [vmem:[#allocation3 + $0x100] sm:$0x3f] %v1222_v37  ;;  %v1004_v53 = vsel %vm1001_vm13, %v3489_v30, %v3695_v39  ;;  %1655 = vmatpush.msrb.mxu3 %v1567_v41 }
 0x36c   : >> { %1012 = vst [vmem:[#allocation3 + $0x158] sm:$0xfc] %v1004_v53 }
 0x36d   : >> { %1656 = vmatpush.msrb.mxu3 %v1563_v46 }
 0x36f   : >> { %1443 = vrot.lane.b32.xlu0 %v1333_v43, %s4383_s21  ;;  %1657 = vmatpush.msrb.mxu3 %v1559_v56  ;;  %v1547_v43 = vld [vmem:[#allocation3 + $0xd8] sm:$0xff] }
 0x370   : >> { %1468 = vrot.lane.b32.xlu2 %v3526_v47, %s3032_s22  ;;  %1518 = vrot.lane.b32.xlu1 %v3471_v19, %s3023_s14 }
 0x371   : >> { %v1315_v59 = vpop.permute.xlu0 %1314  ;;  %1658 = vmatpush.msrb.mxu3 %v1555_v54 }
 0x372   : >> { %v1322_v30 = vsel %vm1320_vm10, %v3406_v52, %v1315_v59  ;;  %v1323_v63 = vsel %vm1320_vm10, %v1315_v59, %v1317_v3  ;;  %v3710_v7 = vpop.permute.xlu2 %1069  ;;  %v936_v8 = vpop.permute.xlu1 %935  ;;  %vm4388_vm10 = vcmask 719872  }
 0x373   : >> { %1330 = vst [vmem:[#allocation3] sm:$0x3f] %v1322_v30  ;;  %v1075_v47 = vsel %vm513_vm6, %v3518_v42, %v3710_v7  ;;  %1659 = vmatpush.msrb.mxu3 %v1551_v38  ;;  %v941_v19 = vsel %vm423_vm8, %v3460_v13, %v936_v8  ;;  %v942_v52 = vsel %vm423_vm8, %v936_v8, %v938_v25  ;;  %v1539_v13 = vld [vmem:[#allocation3 + $0xc8] sm:$0xff] }
 0x374   : >> { %1331 = vst [vmem:[#allocation3 + $0xd0] sm:$0x3f] %v1323_v63 }
 0x375   : >> { %1083 = vst [vmem:[#allocation3 + $0x160] sm:$0xf0] %v1075_v47  ;;  %1660 = vmatpush.msrb.mxu3 %v1547_v43 }
 0x376   : >> { %1087 = vst [vmem:[#allocation3 + $0xf8] sm:$0x3] %v1075_v47 }
 0x377   : >> { %949 = vst [vmem:[#allocation3 + $0x40] sm:$0xc0] %v941_v19  ;;  %1495 = vrot.lane.b32.xlu0 %v3572_v9, %s3034_s24  ;;  %1661 = vmatpush.msrb.mxu3 %v1543_v10 }
 0x378   : >> { %950 = vst [vmem:[#allocation3 + $0x28] sm:$0xc0] %v942_v52  ;;  %1462 = vrot.lane.b32.xlu2 %v3350_v44, %s3032_s22  ;;  %1512 = vrot.lane.b32.xlu1 %v3307_v32, %s3023_s14 }
 0x379   : >> { %953 = vst [vmem:[#allocation3 + $0x70] sm:$0xf] %v941_v19  ;;  %v1419_v42 = vpop.permute.xlu0 %1418  ;;  %1662 = vmatpush.msrb.mxu3 %v1539_v13 }
 0x37a   : >> { %954 = vst [vmem:[#allocation3 + $0x120] sm:$0xf] %v942_v52  ;;  %v1425_v16 = vsel %vm1422_vm11, %v3670_v14, %v1419_v42  ;;  %v1426_v55 = vsel %vm1422_vm11, %v1419_v42, %v1421_v40  ;;  %v1098_v17 = vpop.permute.xlu2 %1097  ;;  %v969_v9 = vpop.permute.xlu1 %968  ;;  %vm4389_vm11 = vmmov %vm4388_vm10 }
 0x37b   : >> { %1433 = vst [vmem:[#allocation3 + $0x1d8] sm:$0x3f] %v1425_v16 }
 0x37c   : >> { %1434 = vst [vmem:[#allocation3 + $0x140] sm:$0x3f] %v1426_v55 }
 0x37f   : >> { %1489 = vrot.lane.b32.xlu0 %v3358_v45, %s3034_s24 }
 0x380   : >> { %1470 = vrot.lane.b32.xlu2 %v1361_v21, %s3032_s22  ;;  %1520 = vrot.lane.b32.xlu1 %v3497_v33, %s3023_s14 }
 0x381   : >> { %v3734_v32 = vpop.permute.xlu0 %1516 }
 0x382   : >> { %v1524_v44 = vsel %vm1522_vm4, %v3418_v57, %v3734_v32  ;;  %v1141_v14 = vpop.permute.xlu2 %1140  ;;  %v1046_v20 = vpop.permute.xlu1 %1045 }
 0x383   : >> { %1532 = vst [vmem:[#allocation3 + $0x110] sm:$0x3f] %v1524_v44  ;;  %v1147_v45 = vsel %vm1144_vm1, %v3551_v61, %v1141_v14 }
 0x384   : >> { %1155 = vst [vmem:[#allocation3 + $0x30] sm:$0xc0] %v1147_v45 }
 0x385   : >> { %1159 = vst [vmem:[#allocation3 + $0x250] sm:$0xf] %v1147_v45 }
 0x387   : >> { %1497 = vrot.lane.b32.xlu0 %v3647_v60, %s3034_s24 }
 0x389   : >> { %v967_v21 = vpop.permute.xlu0 %966 }
 0x38a   : >> { %v972_v33 = vsel %vm441_vm7, %v3437_v4, %v967_v21  ;;  %v973_v22 = vsel %vm441_vm7, %v967_v21, %v969_v9  ;;  %v1170_v23 = vpop.permute.xlu2 %1169  ;;  %v1096_v11 = vpop.permute.xlu1 %1095  ;;  %v1612_v25 = vld [vmem:[#allocation3 + $0x110] sm:$0x3f]  ;;  %vm4384_vm7 = vcmask 80896  }
 0x38b   : >> { %980 = vst [vmem:[#allocation3 + $0x70] sm:$0xf0] %v972_v33  ;;  %2843 = vmatpush.msk.msrb.mxu2 %vm1634_vm9, %v1612_v25  ;;  %v1101_v61 = vsel %vm531_vm2, %v3534_v48, %v1096_v11  ;;  %v1102_v60 = vsel %vm531_vm2, %v1096_v11, %v1098_v17  ;;  %vm4385_vm2 = vmmov %vm4384_vm7 }
 0x38c   : >> { %981 = vst [vmem:[#allocation3 + $0x120] sm:$0xf0] %v973_v22 }
 0x38d   : >> { %984 = vst [vmem:[#allocation3 + $0x158] sm:$0x3] %v972_v33 }
 0x38e   : >> { %985 = vst [vmem:[#allocation3 + $0x108] sm:$0x3] %v973_v22 }
 0x38f   : >> { %1109 = vst [vmem:[#allocation3 + $0xf8] sm:$0xfc] %v1101_v61 }
 0x390   : >> { %1110 = vst [vmem:[#allocation3 + $0x180] sm:$0xfc] %v1102_v60 }
 0x391   : >> { %v1000_v28 = vpop.permute.xlu0 %999 }
 0x392   : >> { %v1005_v4 = vsel %vm1001_vm13, %v3695_v39, %v1000_v28  ;;  %v1240_v29 = vpop.permute.xlu2 %1239  ;;  %v1168_v3 = vpop.permute.xlu1 %1167  ;;  %vm1472_vm13 = vcmask 228352  }
 0x393   : >> { %1013 = vst [vmem:[#allocation3 + $0x108] sm:$0xfc] %v1005_v4  ;;  %v1173_v34 = vsel %vm585_vm12, %v3564_v5, %v1168_v3  ;;  %v1174_v35 = vsel %vm585_vm12, %v1168_v3, %v1170_v23 }
 0x394   : >> { %1181 = vst [vmem:[#allocation3 + $0x250] sm:$0xf0] %v1173_v34 }
 0x395   : >> { %1182 = vst [vmem:[#allocation3 + $0x1a0] sm:$0xf0] %v1174_v35 }
 0x396   : >> { %1185 = vst [vmem:[#allocation3 + $0x88] sm:$0x3] %v1173_v34 }
 0x397   : >> { %1186 = vst [vmem:[#allocation3 + $0x198] sm:$0x3] %v1174_v35 }
 0x399   : >> { %v1044_v48 = vpop.permute.xlu0 %1043 }
 0x39a   : >> { %v1294_v2 = vpop.permute.xlu2 %1293  ;;  %v1049_v24 = vsel %vm495_vm14, %v3464_v15, %v1044_v48  ;;  %v1050_v50 = vsel %vm495_vm14, %v1044_v48, %v1046_v20  ;;  %v1196_v36 = vpop.permute.xlu1 %1195 }
 0x39b   : >> { %1057 = vst [vmem:[#allocation3 + $0x230] sm:$0xc0] %v1049_v24 }
 0x39c   : >> { %1058 = vst [vmem:[#allocation3 + $0x58] sm:$0xc0] %v1050_v50 }
 0x39d   : >> { %1061 = vst [vmem:[#allocation3 + $0x160] sm:$0xf] %v1049_v24 }
 0x39e   : >> { %1062 = vst [vmem:[#allocation3 + $0x220] sm:$0xf] %v1050_v50 }
 0x3a1   : >> { %v1072_v37 = vpop.permute.xlu0 %1071 }
 0x3a2   : >> { %v1339_v5 = vpop.permute.xlu2 %1338  ;;  %v1076_v39 = vsel %vm513_vm6, %v3710_v7, %v1072_v37  ;;  %v1238_v40 = vpop.permute.xlu1 %1237  ;;  %vm4386_vm6 = vcmask 113664  }
 0x3a3   : >> { %v1346_v41 = vsel %vm1344_vm0, %v3615_v27, %v1339_v5  ;;  %1084 = vst [vmem:[#allocation3 + $0x220] sm:$0xf0] %v1076_v39  ;;  %v1244_v15 = vsel %vm4384_vm7, %v3589_v18, %v1238_v40  ;;  %v1245_v53 = vsel %vm4385_vm2, %v1238_v40, %v1240_v29  ;;  %vm4387_vm12 = vmmov %vm4386_vm6  ;;  %v3814_v40 = vld [vmem:[%s4332_s3 + $0x10] sm:$0xff] }
 0x3a4   : >> { %1354 = vst [vmem:[#allocation3] sm:$0xc0] %v1346_v41  ;;  %vm4392_vm2 = vmmov %vm4388_vm10 }
 0x3a5   : >> { %1358 = vst [vmem:[#allocation3 + $0x1f0] sm:$0xf] %v1346_v41 }
 0x3a6   : >> { %1088 = vst [vmem:[#allocation3 + $0x180] sm:$0x3] %v1076_v39  ;;  %v3809_v39 = vld [vmem:[%s4332_s3 + $0x8] sm:$0xff] }
 0x3a7   : >> { %1252 = vst [vmem:[#allocation3 + $0x20] sm:$0xc0] %v1244_v15 }
 0x3a8   : >> { %1253 = vst [vmem:[#allocation3 + $0x100] sm:$0xc0] %v1245_v53 }
 0x3a9   : >> { %1256 = vst [vmem:[#allocation3 + $0x238] sm:$0xf] %v1244_v15  ;;  %v1143_v46 = vpop.permute.xlu0 %1142 }
 0x3aa   : >> { %1257 = vst [vmem:[#allocation3 + $0x128] sm:$0xf] %v1245_v53  ;;  %v1369_v56 = vpop.permute.xlu2 %1368  ;;  %v1148_v54 = vsel %vm1144_vm1, %v1141_v14, %v1143_v46  ;;  %v1267_v59 = vpop.permute.xlu1 %1266  ;;  %vm4390_vm1 = vcmask 64512  }
 0x3ab   : >> { %1156 = vst [vmem:[#allocation3 + $0x1a8] sm:$0xc0] %v1148_v54  ;;  %vm4391_vm7 = vmmov %vm4390_vm1 }
 0x3ac   : >> { %1160 = vst [vmem:[#allocation3 + $0x1a0] sm:$0xf] %v1148_v54 }
 0x3b1   : >> { %v1194_v27 = vpop.permute.xlu0 %1193 }
 0x3b2   : >> { %v1398_v30 = vpop.permute.xlu2 %1397  ;;  %v1199_v18 = vsel %vm4386_vm6, %v3536_v49, %v1194_v27  ;;  %v1200_v63 = vsel %vm4387_vm12, %v1194_v27, %v1196_v36  ;;  %v1292_v7 = vpop.permute.xlu1 %1291  ;;  %vm4393_vm6 = vcmask 654336   ;;  %vm1499_vm12 = vcmask 211968  }
 0x3b3   : >> { %1207 = vst [vmem:[#allocation3 + $0x88] sm:$0xfc] %v1199_v18  ;;  %v1299_v8 = vsel %vm4388_vm10, %v3611_v31, %v1292_v7  ;;  %v1300_v38 = vsel %vm4389_vm11, %v1292_v7, %v1294_v2  ;;  %v1572_v18 = vld [vmem:[#allocation3 + $0xe0] sm:$0xff] }
 0x3b4   : >> { %1208 = vst [vmem:[#allocation3 + $0x198] sm:$0xfc] %v1200_v63  ;;  %v3829_v63 = vld [vmem:[%s4332_s3 + $0x18] sm:$0xff] }
 0x3b5   : >> { %1307 = vst [vmem:[#allocation3 + $0x38] sm:$0xfc] %v1299_v8 }
 0x3b6   : >> { %1308 = vst [vmem:[#allocation3 + $0x1c8] sm:$0xfc] %v1300_v38 }
 0x3b9   : >> { %v1265_v47 = vpop.permute.xlu0 %1264 }
 0x3ba   : >> { %v1467_v19 = vpop.permute.xlu2 %1466  ;;  %v1271_v43 = vsel %vm4390_vm1, %v3566_v6, %v1265_v47  ;;  %v1343_v52 = vpop.permute.xlu1 %1342  ;;  %v1272_v10 = vsel %vm4391_vm7, %v1265_v47, %v1267_v59  ;;  %v1615_v59 = vld [vmem:[%s4333_s4] sm:$0xff] }
 0x3bb   : >> { %v1474_v49 = vsel %vm1472_vm13, %v3641_v58, %v1467_v19  ;;  %1279 = vst [vmem:[#allocation3 + $0x238] sm:$0xf0] %v1271_v43  ;;  %1619 = vperm.xlu1 %2967, %v1615_v59   ;;  %v1564_v47 = vld [vmem:[#allocation3 + $0x1c0] sm:$0xff] }
 0x3bc   : >> { %1482 = vst [vmem:[#allocation3 + $0xc0] sm:$0xf0] %v1474_v49  ;;  %v1584_v41 = vld [vmem:[#allocation3 + $0x38] sm:$0xff] }
 0x3bd   : >> { %1486 = vst [vmem:[#allocation3 + $0x150] sm:$0x3] %v1474_v49  ;;  %v1560_v49 = vld [vmem:[#allocation3 + $0x90] sm:$0xff] }
 0x3be   : >> { %1280 = vst [vmem:[#allocation3 + $0x128] sm:$0xf0] %v1272_v10 }
 0x3bf   : >> { %1283 = vst [vmem:[#allocation3 + $0x1c8] sm:$0x3] %v1271_v43 }
 0x3c0   : >> { %1284 = vst [vmem:[#allocation3 + $0xb0] sm:$0x3] %v1272_v10 }
 0x3c1   : >> { %v1296_v31 = vpop.permute.xlu0 %1295 }
 0x3c2   : >> { %v1442_v13 = vpop.permute.xlu2 %1441  ;;  %v1301_v42 = vsel %vm4392_vm2, %v1294_v2, %v1296_v31  ;;  %v1367_v16 = vpop.permute.xlu1 %1366  ;;  %v1556_v31 = vld [vmem:[#allocation3 + $0x60] sm:$0xff] }
 0x3c3   : >> { %1309 = vst [vmem:[#allocation3 + $0xb0] sm:$0xfc] %v1301_v42  ;;  %v1374_v6 = vsel %vm1372_vm3, %v3635_v51, %v1367_v16  ;;  %v1375_v55 = vsel %vm1372_vm3, %v1367_v16, %v1369_v56  ;;  %v1552_v42 = vld [vmem:[#allocation3 + $0x98] sm:$0xff] }
 0x3c4   : >> { %1382 = vst [vmem:[#allocation3 + $0x1f0] sm:$0xf0] %v1374_v6 }
 0x3c5   : >> { %1383 = vst [vmem:[#allocation3 + $0x210] sm:$0xf0] %v1375_v55 }
 0x3c6   : >> { %1386 = vst [vmem:[#allocation3 + $0x168] sm:$0x3] %v1374_v6 }
 0x3c7   : >> { %1387 = vst [vmem:[#allocation3 + $0x1b8] sm:$0x3] %v1375_v55 }
 0x3c9   : >> { %v1341_v17 = vpop.permute.xlu0 %1340 }
 0x3ca   : >> { %v1469_v9 = vpop.permute.xlu2 %1468  ;;  %v1347_v44 = vsel %vm1344_vm0, %v1339_v5, %v1341_v17  ;;  %v1396_v14 = vpop.permute.xlu1 %1395  ;;  %v1348_v45 = vsel %vm1344_vm0, %v1341_v17, %v1343_v52  ;;  %v1588_v5 = vld [vmem:[#allocation3] sm:$0xff] }
 0x3cb   : >> { %v1475_v20 = vsel %vm1472_vm13, %v1467_v19, %v1469_v9  ;;  %1355 = vst [vmem:[#allocation3 + $0xd0] sm:$0xc0] %v1347_v44  ;;  %v1403_v51 = vsel %vm4393_vm6, %v1396_v14, %v1398_v30  ;;  %v1592_v36 = vld [vmem:[#allocation3 + $0x1f0] sm:$0xff]  ;;  %v1576_v30 = vld [vmem:[#allocation3 + $0x1e0] sm:$0xff] }
 0x3cc   : >> { %1483 = vst [vmem:[#allocation3 + $0x190] sm:$0xf0] %v1475_v20 }
 0x3cd   : >> { %1487 = vst [vmem:[#allocation3 + $0x68] sm:$0x3] %v1475_v20 }
 0x3ce   : >> { %1356 = vst [vmem:[#allocation3 + $0xb8] sm:$0xc0] %v1348_v45 }
 0x3cf   : >> { %1359 = vst [vmem:[#allocation3 + $0x210] sm:$0xf] %v1347_v44 }
 0x3d0   : >> { %1360 = vst [vmem:[#allocation3 + $0x200] sm:$0xf] %v1348_v45  ;;  %v1544_v45 = vld [vmem:[#allocation3 + $0xf0] sm:$0xff] }
 0x3d1   : >> { %1411 = vst [vmem:[#allocation3 + $0x130] sm:$0xfc] %v1403_v51  ;;  %v1371_v21 = vpop.permute.xlu0 %1370 }
 0x3d2   : >> { %v1463_v33 = vpop.permute.xlu2 %1462  ;;  %v1376_v22 = vsel %vm1372_vm3, %v1369_v56, %v1371_v21  ;;  %v1440_v23 = vpop.permute.xlu1 %1439  ;;  %vm4394_vm3 = vmmov %vm4393_vm6  ;;  %v1580_v56 = vld [vmem:[#allocation3 + $0x1b0] sm:$0xff] }
 0x3d3   : >> { %v1473_v11 = vsel %vm1472_vm13, %v1463_v33, %v3641_v58  ;;  %1384 = vst [vmem:[#allocation3 + $0x200] sm:$0xf0] %v1376_v22  ;;  %v1447_v25 = vsel %vm1445_vm15, %v3655_v62, %v1440_v23  ;;  %v1448_v61 = vsel %vm1445_vm15, %v1440_v23, %v1442_v13  ;;  %vm4395_vm10 = vmmov %vm4394_vm3  ;;  %v3798_v62 = vld [vmem:[%s4332_s3] sm:$0xff]  ;;  %v1586_v21 = vld [vmem:[#allocation3 + $0xb0] sm:$0xff] }
 0x3d4   : >> { %1481 = vst [vmem:[#allocation3 + $0x78] sm:$0xf0] %v1473_v11  ;;  %1663 = vmatmul.f32.vlgmr.msrb.gmra.mxu3 %v3798_v62  ;;  %v1540_v33 = vld [vmem:[#allocation3 + $0x8] sm:$0xff] }
 0x3d5   : >> { %1485 = vst [vmem:[#allocation3 + $0x1e8] sm:$0x3] %v1473_v11  ;;  %v1582_v23 = vld [vmem:[#allocation3 + $0x128] sm:$0xff] }
 0x3d6   : >> { %1388 = vst [vmem:[#allocation3 + $0x130] sm:$0x3] %v1376_v22  ;;  %v1593_v11 = vld [vmem:[#allocation3 + $0x210] sm:$0xff] }
 0x3d7   : >> { %1455 = vst [vmem:[#allocation3 + $0x50] sm:$0xc0] %v1447_v25 }
 0x3d8   : >> { %1456 = vst [vmem:[#allocation3 + $0x1d8] sm:$0xc0] %v1448_v61 }
 0x3d9   : >> { %1459 = vst [vmem:[#allocation3 + $0xc0] sm:$0xf] %v1447_v25  ;;  %v1394_v60 = vpop.permute.xlu0 %1393  ;;  %v1578_v25 = vld [vmem:[#allocation3 + $0x100] sm:$0xff] }
 0x3da   : >> { %1460 = vst [vmem:[#allocation3 + $0x190] sm:$0xf] %v1448_v61  ;;  %v1471_v28 = vpop.permute.xlu2 %1470  ;;  %v1401_v4 = vsel %vm4394_vm3, %v3600_v26, %v1394_v60  ;;  %v1494_v58 = vpop.permute.xlu1 %1493  ;;  %v1402_v3 = vsel %vm4395_vm10, %v1394_v60, %v1396_v14  ;;  %v1594_v6 = vld [vmem:[#allocation3 + $0x200] sm:$0xff]  ;;  %v1590_v14 = vld [vmem:[#allocation3 + $0xb8] sm:$0xff]  ;;  %v1589_v60 = vld [vmem:[#allocation3 + $0xd0] sm:$0xff] }
 0x3db   : >> { %v1476_v29 = vsel %vm1472_vm13, %v1469_v9, %v1471_v28  ;;  %1409 = vst [vmem:[#allocation3 + $0x168] sm:$0xfc] %v1401_v4  ;;  %v1501_v34 = vsel %vm1499_vm12, %v3668_v12, %v1494_v58  ;;  %v1548_v9 = vld [vmem:[#allocation3 + $0x148] sm:$0xff]  ;;  %v1603_v20 = vld [vmem:[#allocation3 + $0x78] sm:$0xff] }
 0x3dc   : >> { %1484 = vst [vmem:[#allocation3 + $0x18] sm:$0xf0] %v1476_v29  ;;  %1666 = vmatmul.f32.gmra.mxu3 %v3814_v40  ;;  %v1574_v28 = vld [vmem:[#allocation3 + $0x198] sm:$0xff] }
 0x3dd   : >> { %1488 = vst [vmem:[#allocation3 + $0x178] sm:$0x3] %v1476_v29  ;;  %v1570_v29 = vld [vmem:[#allocation3 + $0x1a0] sm:$0xff] }
 0x3de   : >> { %1410 = vst [vmem:[#allocation3 + $0x1b8] sm:$0xfc] %v1402_v3  ;;  %v1600_v26 = vld [vmem:[#allocation3 + $0x50] sm:$0xff]  ;;  %v1616_v3 = vld [vmem:[%s4333_s4 + $0x8] sm:$0xff] }
 0x3df   : >> { %1509 = vst [vmem:[#allocation3 + $0x150] sm:$0xfc] %v1501_v34  ;;  %1693 = vmatpush.msrb.mxu1 %v1600_v26  ;;  %v1601_v51 = vld [vmem:[#allocation3 + $0x1d8] sm:$0xff]  ;;  %v1566_v26 = vld [vmem:[#allocation3 + $0x1a8] sm:$0xff]  ;;  %1624 = vperm.xlu2 %2968, %v1616_v3  }
 0x3e0   : >> { %v1581_v34 = vld [vmem:[#allocation3 + $0x238] sm:$0xff] }
 0x3e1   : >> { %v1444_v35 = vpop.permute.xlu0 %1443  ;;  %v1605_v10 = vld [vmem:[#allocation3 + $0x190] sm:$0xff] }
 0x3e2   : >> { %v1449_v48 = vsel %vm1445_vm15, %v1442_v13, %v1444_v35  ;;  %v1519_v2 = vpop.permute.xlu1 %1518  ;;  %v1596_v24 = vld [vmem:[#allocation3 + $0x168] sm:$0xff]  ;;  %vm1627_vm15 = vcmask 179200   ;;  %v1598_v13 = vld [vmem:[#allocation3 + $0x130] sm:$0xff]  ;;  %v1577_v35 = vld [vmem:[#allocation3 + $0x20] sm:$0xff] }
 0x3e3   : >> { %1457 = vst [vmem:[#allocation3 + $0x140] sm:$0xc0] %v1449_v48  ;;  %v1525_v50 = vsel %vm1522_vm4, %v3734_v32, %v1519_v2  ;;  %1694 = vmatpush.msrb.mxu1 %v1596_v24  ;;  %v1604_v32 = vld [vmem:[#allocation3 + $0xc0] sm:$0xff] }
 0x3e4   : >> { %1461 = vst [vmem:[#allocation3 + $0x18] sm:$0xf] %v1449_v48  ;;  %v1562_v48 = vld [vmem:[#allocation3 + $0x180] sm:$0xff] }
 0x3e5   : >> { %1533 = vst [vmem:[#allocation3 + $0x258] sm:$0x3f] %v1525_v50  ;;  %1695 = vmatpush.msrb.mxu1 %v1592_v36  ;;  %v1597_v22 = vld [vmem:[#allocation3 + $0x1b8] sm:$0xff]  ;;  %v1558_v24 = vld [vmem:[#allocation3 + $0x220] sm:$0xff]  ;;  %v1569_v50 = vld [vmem:[#allocation3 + $0x250] sm:$0xff] }
 0x3e6   : >> { %v1608_v37 = vld [vmem:[#allocation3 + $0x150] sm:$0xff]  ;;  %v1554_v36 = vld [vmem:[#allocation3 + $0x58] sm:$0xff] }
 0x3e7   : >> { %1730 = vmatpush.msrb.mxu2 %v1608_v37  ;;  %1696 = vmatpush.msrb.mxu1 %v1588_v5  ;;  %v1565_v37 = vld [vmem:[#allocation3 + $0x30] sm:$0xff]  ;;  %v1550_v5 = vld [vmem:[#allocation3 + $0x108] sm:$0xff] }
 0x3e9   : >> { %1731 = vmatpush.msrb.mxu2 %v1604_v32  ;;  %v1496_v15 = vpop.permute.xlu0 %1495  ;;  %1697 = vmatpush.msrb.mxu1 %v1584_v41  ;;  %v1546_v32 = vld [vmem:[#allocation3 + $0x120] sm:$0xff] }
 0x3ea   : >> { %v1502_v53 = vsel %vm1499_vm12, %v1494_v58, %v1496_v15  ;;  %v1513_v46 = vpop.permute.xlu1 %1512  ;;  %2844 = vmatmul.msk.f32.vlgmr.msrb.gmra.mxu2 %vm1627_vm15, %v3809_v39  ;;  %v1585_v58 = vld [vmem:[#allocation3 + $0x1c8] sm:$0xff]  ;;  %v1557_v41 = vld [vmem:[#allocation3 + $0x160] sm:$0xff] }
 0x3eb   : >> { %1510 = vst [vmem:[#allocation3 + $0x68] sm:$0xfc] %v1502_v53  ;;  %v1523_v54 = vsel %vm1522_vm4, %v1513_v46, %v3418_v57  ;;  %1698 = vmatpush.msrb.mxu1 %v1580_v56  ;;  %v1568_v57 = vld [vmem:[#allocation3 + $0x80] sm:$0xff]  ;;  %v1606_v4 = vld [vmem:[#allocation3 + $0x18] sm:$0xff]  ;;  %v1553_v53 = vld [vmem:[#allocation3 + $0x230] sm:$0xff] }
 0x3ec   : >> { %1531 = vst [vmem:[#allocation3 + $0x138] sm:$0x3f] %v1523_v54  ;;  %v1613_v27 = vld [vmem:[#allocation3 + $0x258] sm:$0x3f]  ;;  %v1545_v56 = vld [vmem:[#allocation3 + $0x70] sm:$0xff]  ;;  %v1541_v54 = vld [vmem:[#allocation3 + $0x40] sm:$0xff] }
 0x3ed   : >> { %2846 = vmatpush.msk.msra.mxu2 %vm1634_vm9, %v1613_v27  ;;  %1699 = vmatpush.msrb.mxu1 %v1576_v30  ;;  %v1549_v46 = vld [vmem:[#allocation3 + $0x158] sm:$0xff] }
 0x3ef   : >> { %1700 = vmatpush.msrb.mxu1 %v1572_v18 }
 0x3f1   : >> { %v1490_v7 = vpop.permute.xlu0 %1489  ;;  %1701 = vmatpush.msrb.mxu1 %v1568_v57 }
 0x3f2   : >> { %v1500_v8 = vsel %vm1499_vm12, %v1490_v7, %v3668_v12  ;;  %v1521_v38 = vpop.permute.xlu1 %1520  ;;  %v1609_v19 = vld [vmem:[#allocation3 + $0x68] sm:$0xff]  ;;  %2845 = vmatmul.msk.f32.gmra.mxu2 %vm1627_vm15, %v3829_v63  ;;  %v1602_v12 = vld [vmem:[#allocation3 + $0x140] sm:$0xff] }
 0x3f3   : >> { %1508 = vst [vmem:[#allocation3 + $0x1e8] sm:$0xfc] %v1500_v8  ;;  %v1526_v43 = vsel %vm1522_vm4, %v1519_v2, %v1521_v38  ;;  %v1611_v52 = vld [vmem:[#allocation3 + $0x138] sm:$0x3f]  ;;  %1702 = vmatpush.msrb.mxu1 %v1564_v47  ;;  %1776 = vmatpush.msra.mxu2 %v1609_v19  ;;  %v1573_v2 = vld [vmem:[#allocation3 + $0x88] sm:$0xff] }
 0x3f4   : >> { %1534 = vst [vmem:[#allocation3 + $0x240] sm:$0x3f] %v1526_v43  ;;  %2840 = vmatpush.msk.msra.mxu0 %vm1634_vm9, %v1611_v52 }
 0x3f5   : >> { %1703 = vmatpush.msrb.mxu1 %v1560_v49  ;;  %1777 = vmatpush.msra.mxu2 %v1605_v10 }
 0x3f7   : >> { %1785 = vmatpush.msrb.mxu2 %v1602_v12  ;;  %1704 = vmatpush.msrb.mxu1 %v1556_v31 }
 0x3f9   : >> { %1786 = vmatpush.msrb.mxu2 %v1598_v13  ;;  %v1498_v16 = vpop.permute.xlu0 %1497  ;;  %1705 = vmatpush.msrb.mxu1 %v1552_v42 }
 0x3fa   : >> { %v1503_v55 = vsel %vm1499_vm12, %v1496_v15, %v1498_v16  ;;  %v1607_v17 = vld [vmem:[#allocation3 + $0x1e8] sm:$0xff]  ;;  %2847 = vmatmul.msk.f32.vlgmr.msra.gmra.mxu2 %vm1627_vm15, %v3809_v39 }
 0x3fb   : >> { %1787 = vmatpush.msrb.mxu2 %v1594_v6  ;;  %1511 = vst [vmem:[#allocation3 + $0x178] sm:$0xfc] %v1503_v55  ;;  %1684 = vmatpush.msra.mxu0 %v1607_v17  ;;  %v1614_v44 = vld [vmem:[#allocation3 + $0x240] sm:$0x3f]  ;;  %v1542_v15 = vld [vmem:[#allocation3 + $0x28] sm:$0xff] }
 0x3fc   : >> { %1706 = vmatpush.msrb.mxu1 %v1548_v9  ;;  %2849 = vmatpush.msk.msra.mxu3 %vm1634_vm9, %v1614_v44 }
 0x3fd   : >> { %1788 = vmatpush.msrb.mxu2 %v1590_v14  ;;  %1685 = vmatpush.msra.mxu0 %v1603_v20 }
 0x3fe   : >> { %1707 = vmatpush.msrb.mxu1 %v1544_v45  ;;  %2841 = vmatmul.msk.f32.vlgmr.msra.gmra.mxu0 %vm1627_vm15, %v3809_v39 }
 0x3ff   : >> { %1739 = vmatpush.msrb.mxu0 %v1601_v51  ;;  %1789 = vmatpush.msrb.mxu2 %v1586_v21 }
 0x400   : >> { %1708 = vmatpush.msrb.mxu1 %v1540_v33 }
 0x401   : >> { %1709 = vmatmul.f32.vlgmr.msrb.gmra.mxu1 %v3798_v62  ;;  %1740 = vmatpush.msrb.mxu0 %v1597_v22 }
 0x402   : >> { %1790 = vmatpush.msrb.mxu2 %v1582_v23  ;;  %v1610_v61 = vld [vmem:[#allocation3 + $0x178] sm:$0xff] }
 0x403   : >> { %1741 = vmatpush.msrb.mxu0 %v1593_v11  ;;  %1822 = vmatpush.msra.mxu3 %v1610_v61 }
 0x404   : >> { %1791 = vmatpush.msrb.mxu2 %v1578_v25 }
 0x405   : >> { %1742 = vmatpush.msrb.mxu0 %v1589_v60  ;;  %1823 = vmatpush.msra.mxu3 %v1606_v4 }
 0x406   : >> { %1792 = vmatpush.msrb.mxu2 %v1574_v28  ;;  %2850 = vmatmul.msk.f32.vlgmr.msra.gmra.mxu3 %vm1627_vm15, %v3809_v39  ;;  %v1561_v39 = vld [vmem:[#allocation3 + $0xf8] sm:$0xff] }
 0x407   : >> { %1743 = vmatpush.msrb.mxu0 %v1585_v58  ;;  %2848 = vmatmul.msk.f32.gmra.mxu2 %vm1627_vm15, %v3829_v63 }
 0x408   : >> { %1793 = vmatpush.msrb.mxu2 %v1570_v29  ;;  %2842 = vmatmul.msk.f32.gmra.mxu0 %vm1627_vm15, %v3829_v63 }
 0x409   : >> { %1744 = vmatpush.msrb.mxu0 %v1581_v34  ;;  %1712 = vmatmul.f32.gmra.mxu1 %v3814_v40 }
 0x40a   : >> { %1794 = vmatpush.msrb.mxu2 %v1566_v26 }
 0x40b   : >> { %1745 = vmatpush.msrb.mxu0 %v1577_v35 }
 0x40c   : >> { %1795 = vmatpush.msrb.mxu2 %v1562_v48 }
 0x40d   : >> { %1746 = vmatpush.msrb.mxu0 %v1573_v2 }
 0x40e   : >> { %1796 = vmatpush.msrb.mxu2 %v1558_v24  ;;  %2851 = vmatmul.msk.f32.gmra.mxu3 %vm1627_vm15, %v3829_v63 }
 0x40f   : >> { %1747 = vmatpush.msrb.mxu0 %v1569_v50 }
 0x410   : >> { %1797 = vmatpush.msrb.mxu2 %v1554_v36 }
 0x411   : >> { %1748 = vmatpush.msrb.mxu0 %v1565_v37 }
 0x412   : >> { %1798 = vmatpush.msrb.mxu2 %v1550_v5 }
 0x413   : >> { %1749 = vmatpush.msrb.mxu0 %v1561_v39 }
 0x414   : >> { %1799 = vmatpush.msrb.mxu2 %v1546_v32 }
 0x415   : >> { %1750 = vmatpush.msrb.mxu0 %v1557_v41 }
 0x416   : >> { %1800 = vmatpush.msrb.mxu2 %v1542_v15 }
 0x417   : >> { %1801 = vmatmul.f32.vlgmr.msrb.gmra.mxu2 %v3798_v62  ;;  %1751 = vmatpush.msrb.mxu0 %v1553_v53 }
 0x419   : >> { %1752 = vmatpush.msrb.mxu0 %v1549_v46 }
 0x41b   : >> { %1753 = vmatpush.msrb.mxu0 %v1545_v56 }
 0x41d   : >> { %1754 = vmatpush.msrb.mxu0 %v1541_v54 }
 0x41e   : >> { %1755 = vmatmul.f32.vlgmr.msrb.gmra.mxu0 %v3798_v62 }
 0x41f   : >> { %1804 = vmatmul.f32.gmra.mxu2 %v3814_v40 }
 0x426   : >> { %1758 = vmatmul.f32.gmra.mxu0 %v3814_v40 }
 0x42d   : >> { %v1620_v30 = vpop.permute.xlu1 %1619 }
 0x439   : >> { %v1625_v47 = vpop.permute.xlu2 %1624 }
 0x457   : >> { %v1664_v27 = vpop.f32.mrf.mxu3 }
 0x458   : >> { %v1665_v18 = vadd.f32 %v1664_v27, %v1620_v30 }
 0x45f   : >> { %v1667_v19 = vpop.f32.mrf.mxu3 }
 0x460   : >> { %v1668_v62 = vadd.f32 %v1667_v19, %v1625_v47 }
 0x46d   : >> { %v1733_v59 = vpop.f32.mrf.mxu2 }
 0x475   : >> { %v1736_v63 = vpop.f32.mrf.mxu2 }
 0x47b   : >> { %v1687_v57 = vpop.f32.mrf.mxu0 }
 0x47c   : >> { %v1688_v8 = vadd.f32 %v1687_v57, %v1665_v18 }
 0x47d   : >> { %v1779_v10 = vpop.f32.mrf.mxu2 }
 0x47e   : >> { %v1710_v7 = vpop.f32.mrf.mxu1  ;;  %v1831_v43 = vmax.f32 %v1688_v8, 0.0 }
 0x47f   : >> { %v1711_v38 = vadd.f32 %v1710_v7, %v1620_v30 }
 0x480   : >> { %1847 = vrot.lane.b32.xlu0 %v1831_v43, %s2998_s19 }
 0x481   : >> { %v1734_v52 = vadd.f32 %v1733_v59, %v1711_v38 }
 0x483   : >> { %v1832_v49 = vmax.f32 %v1734_v52, 0.0 }
 0x485   : >> { %1849 = vrot.lane.b32.xlu1 %v1832_v49, %s2998_s19  ;;  %v1690_v40 = vpop.f32.mrf.mxu0 }
 0x486   : >> { %v1691_v12 = vadd.f32 %v1690_v40, %v1668_v62  ;;  %v1713_v17 = vpop.f32.mrf.mxu1 }
 0x487   : >> { %v1714_v44 = vadd.f32 %v1713_v17, %v1625_v47 }
 0x488   : >> { %v1835_v31 = vmax.f32 %v1691_v12, 0.0 }
 0x489   : >> { %v1825_v42 = vpop.f32.mrf.mxu3  ;;  %v1737_v33 = vadd.f32 %v1736_v63, %v1714_v44 }
 0x48a   : >> { %v1782_v13 = vpop.f32.mrf.mxu2 }
 0x48b   : >> { %v1836_v61 = vmax.f32 %v1737_v33, 0.0 }
 0x48d   : >> { %1855 = vrot.lane.b32.xlu1 %v1835_v31, %s2998_s19 }
 0x491   : >> { %v1828_v45 = vpop.f32.mrf.mxu3 }
 0x49a   : >> { %v1802_v16 = vpop.f32.mrf.mxu2 }
 0x49b   : >> { %v1756_v6 = vpop.f32.mrf.mxu0  ;;  %v1803_v60 = vadd.f32 %v1802_v16, %v1620_v30 }
 0x49c   : >> { %v1757_v55 = vadd.f32 %v1756_v6, %v1620_v30 }
 0x49d   : >> { %v1826_v4 = vadd.f32 %v1825_v42, %v1803_v60 }
 0x49e   : >> { %v1780_v9 = vadd.f32 %v1779_v10, %v1757_v55 }
 0x49f   : >> { %v1834_v58 = vmax.f32 %v1826_v4, 0.0 }
 0x4a0   : >> { %v1833_v14 = vmax.f32 %v1780_v9, 0.0 }
 0x4a2   : >> { %v1805_v20 = vpop.f32.mrf.mxu2  ;;  %1851 = vrot.lane.b32.xlu2 %v1833_v14, %s2998_s19 }
 0x4a3   : >> { %v1806_v51 = vadd.f32 %v1805_v20, %v1625_v47  ;;  %v1759_v21 = vpop.f32.mrf.mxu0 }
 0x4a4   : >> { %v1760_v22 = vadd.f32 %v1759_v21, %v1625_v47  ;;  %v1993_v21 = vstv %s2992_s27  ;;  %s394_s27 = sadd.s32 1, %s2992_s27  }
 0x4a5   : >> { %v1829_v23 = vadd.f32 %v1828_v45, %v1806_v51  ;;  %p391_p4 = scmp.ge.s32.totalorder %s394_s27, 4  }
 0x4a6   : >> { %v1783_v11 = vadd.f32 %v1782_v13, %v1760_v22  ;;  %v1995_v22 = vld [vmem:[#allocation4] sm:$0xff]  ;;  %vm2691_vm4 = vcmask (%p391_p4), 1043456  }
 0x4a7   : >> { %v1838_v25 = vmax.f32 %v1829_v23, 0.0 }
 0x4a8   : >> { %v1837_v28 = vmax.f32 %v1783_v11, 0.0 }
 0x4a9   : >> { %1861 = vrot.lane.b32.xlu1 %v1838_v25, %s2998_s19 }
 0x4aa   : >> { %1857 = vrot.lane.b32.xlu2 %v1836_v61, %s2998_s19  ;;  %1859 = vrot.lane.b32.xlu0 %v1837_v28, %s2998_s19 }
 0x4b2   : >> { %1853 = vrot.lane.b32.xlu0 %v1834_v58, %s2998_s19  ;;  %s3035_s19 = smov 116  }
 0x4f2   : >> { %v1848_v29 = vpop.permute.xlu0 %1847 }
 0x4f7   : >> { %v1850_v3 = vpop.permute.xlu1 %1849 }
 0x4f8   : >> { %v1863_v34 = vsel %vm423_vm8, %v1848_v29, %v1850_v3 }
 0x4f9   : >> { %v1875_v26 = vmax.f32 %v1831_v43, %v1863_v34 }
 0x4fb   : >> { %1893 = vrot.lane.b32.xlu2 %v1875_v26, %s3004_s28 }
 0x4fc   : >> { %v1852_v35 = vpop.permute.xlu2 %1851 }
 0x4fd   : >> { %v1864_v48 = vsel %vm423_vm8, %v1850_v3, %v1852_v35 }
 0x4fe   : >> { %v1876_v2 = vmax.f32 %v1832_v49, %v1864_v48 }
 0x4ff   : >> { %v1856_v24 = vpop.permute.xlu1 %1855 }
 0x500   : >> { %1895 = vrot.lane.b32.xlu0 %v1876_v2, %s3004_s28 }
 0x504   : >> { %v1858_v50 = vpop.permute.xlu2 %1857 }
 0x505   : >> { %v1866_v36 = vsel %vm423_vm8, %v1856_v24, %v1858_v50 }
 0x506   : >> { %v1878_v37 = vmax.f32 %v1835_v31, %v1866_v36 }
 0x508   : >> { %1901 = vrot.lane.b32.xlu0 %v1878_v37, %s3004_s28 }
 0x51b   : >> { %v1862_v5 = vpop.permute.xlu1 %1861 }
 0x51c   : >> { %v1884_v39 = vmax.f32 %v1838_v25, %v1862_v5  ;;  %v1860_v32 = vpop.permute.xlu0 %1859 }
 0x51d   : >> { %v1867_v41 = vsel %vm423_vm8, %v1858_v50, %v1860_v32  ;;  %v1868_v59 = vsel %vm423_vm8, %v1860_v32, %v1862_v5 }
 0x51e   : >> { %v1879_v15 = vmax.f32 %v1836_v61, %v1867_v41  ;;  %1907 = vrot.lane.b32.xlu0 %v1884_v39, %s3004_s28  ;;  %v1880_v27 = vmax.f32 %v1837_v28, %v1868_v59  ;;  %v1996_v61 = vld [vmem:[#allocation4 + $0x8] sm:$0xff] }
 0x520   : >> { %1903 = vrot.lane.b32.xlu1 %v1879_v15, %s3004_s28 }
 0x524   : >> { %v1854_v53 = vpop.permute.xlu0 %1853 }
 0x525   : >> { %v1865_v46 = vsel %vm423_vm8, %v1852_v35, %v1854_v53  ;;  %v1883_v56 = vmax.f32 %v1834_v58, %v1854_v53  ;;  %vm3910_vm8 = vcmp.eq.s32.totalorder %v3110_v1, %v1993_v21  ;;  %v2010_v21 = vld [vmem:[#allocation4 + $0x78] sm:$0xff]  ;;  %v2296_v1 = vld [vmem:[%s4335_s6 + $0x60] sm:$0xff] (%p391_p4) }
 0x526   : >> { %v1877_v54 = vmax.f32 %v1833_v14, %v1865_v46 }
 0x527   : >> { %1899 = vrot.lane.b32.xlu2 %v1883_v56, %s3004_s28  ;;  %v2001_v56 = vld [vmem:[#allocation4 + $0x30] sm:$0xff] }
 0x528   : >> { %1897 = vrot.lane.b32.xlu1 %v1877_v54, %s3004_s28 }
 0x52f   : >> { %1905 = vrot.lane.b32.xlu2 %v1880_v27, %s3004_s28  ;;  %s4396_s28 = smov 32  }
 0x555   : >> { %v1894_v30 = vpop.permute.xlu2 %1893 }
 0x572   : >> { %v1896_v18 = vpop.permute.xlu0 %1895 }
 0x573   : >> { %v1909_v63 = vsel %vm495_vm14, %v1894_v30, %v1896_v18 }
 0x574   : >> { %v1921_v57 = vmax.f32 %v1875_v26, %v1909_v63  ;;  %v2007_v63 = vld [vmem:[#allocation4 + $0x60] sm:$0xff] }
 0x576   : >> { %1937 = vrot.lane.b32.xlu2 %v1921_v57, %s3035_s19  ;;  %1933 = vrot.lane.b32.xlu0 %v1921_v57, %s3019_s15 }
 0x577   : >> { %1929 = vrot.lane.b32.xlu1 %v1921_v57, %s2997_s18 }
 0x57a   : >> { %v1902_v7 = vpop.permute.xlu0 %1901 }
 0x57e   : >> { %1949 = vrot.lane.b32.xlu2 %v1921_v57, %s4380_s16  ;;  %1945 = vrot.lane.b32.xlu0 %v1921_v57, %s3017_s13 }
 0x57f   : >> { %1941 = vrot.lane.b32.xlu1 %v1921_v57, %s4376_s25 }
 0x581   : >> { %v1900_v62 = vpop.permute.xlu2 %1899 }
 0x587   : >> { %1953 = vrot.lane.b32.xlu1 %v1921_v57, %s3036_s29 }
 0x589   : >> { %v1906_v10 = vpop.permute.xlu2 %1905 }
 0x58f   : >> { %2030 = vperm.xlu1 %2967, %v1921_v57   ;;  %v2005_v57 = vld [vmem:[#allocation4 + $0x50] sm:$0xff] }
 0x590   : >> { %v1908_v13 = vpop.permute.xlu0 %1907 }
 0x591   : >> { %v1914_v42 = vsel %vm495_vm14, %v1906_v10, %v1908_v13 }
 0x592   : >> { %v1904_v8 = vpop.permute.xlu1 %1903  ;;  %v1926_v16 = vmax.f32 %v1880_v27, %v1914_v42 }
 0x593   : >> { %v1912_v38 = vsel %vm495_vm14, %v1902_v7, %v1904_v8  ;;  %v1913_v12 = vsel %vm495_vm14, %v1904_v8, %v1906_v10 }
 0x594   : >> { %v1924_v47 = vmax.f32 %v1878_v37, %v1912_v38  ;;  %v1925_v31 = vmax.f32 %v1879_v15, %v1913_v12 }
 0x596   : >> { %1939 = vrot.lane.b32.xlu0 %v1924_v47, %s3035_s19  ;;  %1931 = vrot.lane.b32.xlu2 %v1924_v47, %s2997_s18  ;;  %s3037_s18 = smov 20  }
 0x597   : >> { %1935 = vrot.lane.b32.xlu1 %v1924_v47, %s3019_s15  ;;  %s4397_s15 = smov 44  }
 0x59a   : >> { %v1898_v19 = vpop.permute.xlu1 %1897 }
 0x59b   : >> { %v1910_v43 = vsel %vm495_vm14, %v1896_v18, %v1898_v19  ;;  %v1911_v49 = vsel %vm495_vm14, %v1898_v19, %v1900_v62  ;;  %vm2189_vm14 = vcmask 31744   ;;  %v1997_v19 = vld [vmem:[#allocation4 + $0x10] sm:$0xff]  ;;  %v1998_v62 = vld [vmem:[#allocation4 + $0x18] sm:$0xff] }
 0x59c   : >> { %v1922_v52 = vmax.f32 %v1876_v2, %v1910_v43  ;;  %v1923_v40 = vmax.f32 %v1877_v54, %v1911_v49  ;;  %v1999_v54 = vld [vmem:[#allocation4 + $0x20] sm:$0xff]  ;;  %v2002_v49 = vld [vmem:[#allocation4 + $0x38] sm:$0xff] }
 0x59e   : >> { %1951 = vrot.lane.b32.xlu0 %v1924_v47, %s4380_s16  ;;  %1943 = vrot.lane.b32.xlu2 %v1924_v47, %s4376_s25  ;;  %s3038_s25 = smov 48   ;;  %s3039_s16 = smov 36  }
 0x59f   : >> { %1947 = vrot.lane.b32.xlu1 %v1924_v47, %s3017_s13  ;;  %s4398_s13 = smov 40  }
 0x5a6   : >> { %1959 = vrot.lane.b32.xlu0 %v1922_v52, %s4396_s28  ;;  %1955 = vrot.lane.b32.xlu2 %v1924_v47, %s3036_s29 }
 0x5a7   : >> { %1967 = vrot.lane.b32.xlu1 %v1922_v52, %s3023_s14 }
 0x5ae   : >> { %1971 = vrot.lane.b32.xlu0 %v1922_v52, %s3037_s18  ;;  %2034 = vperm.xlu2 %2968, %v1924_v47  }
 0x5af   : >> { %1981 = vrot.lane.b32.xlu1 %v1923_v40, %s4397_s15 }
 0x5b6   : >> { %1985 = vrot.lane.b32.xlu0 %v1923_v40, %s4398_s13  ;;  %1963 = vrot.lane.b32.xlu2 %v1922_v52, %s3032_s22 }
 0x5b7   : >> { %1961 = vrot.lane.b32.xlu1 %v1925_v31, %s4396_s28 }
 0x5be   : >> { %1965 = vrot.lane.b32.xlu0 %v1925_v31, %s3032_s22  ;;  %1977 = vrot.lane.b32.xlu2 %v1923_v40, %s3038_s25 }
 0x5bf   : >> { %1973 = vrot.lane.b32.xlu1 %v1925_v31, %s3037_s18 }
 0x5c6   : >> { %1989 = vrot.lane.b32.xlu2 %v1923_v40, %s3039_s16  ;;  %1979 = vrot.lane.b32.xlu0 %v1926_v16, %s3038_s25  ;;  %v2003_v40 = vld [vmem:[#allocation4 + $0x40] sm:$0xff] }
 0x5c7   : >> { %1987 = vrot.lane.b32.xlu1 %v1926_v16, %s4398_s13 }
 0x5ce   : >> { %1969 = vrot.lane.b32.xlu2 %v1925_v31, %s3023_s14  ;;  %1991 = vrot.lane.b32.xlu0 %v1926_v16, %s3039_s16 }
 0x5d0   : >> { %v1938_v6 = vpop.permute.xlu2 %1937 }
 0x5d1   : >> { %2054 = vperm.xlu1 %2967, %v1938_v6   ;;  %v2004_v6 = vld [vmem:[#allocation4 + $0x48] sm:$0xff] }
 0x5d6   : >> { %1983 = vrot.lane.b32.xlu2 %v1926_v16, %s4397_s15 }
 0x5d8   : >> { %v1950_v55 = vpop.permute.xlu2 %1949 }
 0x5d9   : >> { %2078 = vperm.xlu1 %2967, %v1950_v55   ;;  %v2008_v55 = vld [vmem:[#allocation4 + $0x68] sm:$0xff] }
 0x5e8   : >> { %v1934_v17 = vpop.permute.xlu0 %1933 }
 0x5e9   : >> { %v1930_v9 = vpop.permute.xlu1 %1929  ;;  %2046 = vperm.xlu2 %2968, %v1934_v17   ;;  %v2009_v17 = vld [vmem:[#allocation4 + $0x70] sm:$0xff] }
 0x5ea   : >> { %2038 = vperm.xlu0 %2966, %v1930_v9  }
 0x5f0   : >> { %v1932_v44 = vpop.permute.xlu2 %1931  ;;  %v1946_v14 = vpop.permute.xlu0 %1945 }
 0x5f1   : >> { %v1942_v20 = vpop.permute.xlu1 %1941  ;;  %2042 = vperm.xlu1 %2967, %v1932_v44   ;;  %2070 = vperm.xlu2 %2968, %v1946_v14  }
 0x5f2   : >> { %2062 = vperm.xlu0 %2966, %v1942_v20  }
 0x5f8   : >> { %v1944_v45 = vpop.permute.xlu2 %1943 }
 0x5f9   : >> { %v1954_v51 = vpop.permute.xlu1 %1953  ;;  %2066 = vperm.xlu1 %2967, %v1944_v45  }
 0x5fa   : >> { %2086 = vperm.xlu0 %2966, %v1954_v51  }
 0x600   : >> { %v1956_v23 = vpop.permute.xlu2 %1955 }
 0x601   : >> { %v2031_v11 = vpop.permute.xlu1 %2030  ;;  %2090 = vperm.xlu1 %2967, %v1956_v23  }
 0x602   : >> { %v2157_v25 = vsel %vm3910_vm8, %v2031_v11, %v1995_v22  ;;  %v2011_v22 = vld [vmem:[#allocation4 + $0x80] sm:$0xff] }
 0x603   : >> { %2190 = vst.msk [vmem:[#allocation4] sm:$0xff] %vm2189_vm14, %v2157_v25 }
 0x608   : >> { %v2035_v60 = vpop.permute.xlu2 %2034  ;;  %v1940_v28 = vpop.permute.xlu0 %1939 }
 0x609   : >> { %v1936_v4 = vpop.permute.xlu1 %1935  ;;  %v2158_v58 = vsel %vm3910_vm8, %v2035_v60, %v1996_v61  ;;  %2058 = vperm.xlu2 %2968, %v1940_v28   ;;  %v2017_v60 = vld [vmem:[#allocation4 + $0xb0] sm:$0xff]  ;;  %v2000_v28 = vld [vmem:[#allocation4 + $0x28] sm:$0xff] }
 0x60a   : >> { %2191 = vst.msk [vmem:[#allocation4 + $0x8] sm:$0xff] %vm2189_vm14, %v2158_v58  ;;  %2050 = vperm.xlu0 %2966, %v1936_v4  }
 0x610   : >> { %v1964_v29 = vpop.permute.xlu2 %1963  ;;  %v1952_v3 = vpop.permute.xlu0 %1951 }
 0x611   : >> { %v1948_v34 = vpop.permute.xlu1 %1947  ;;  %2102 = vperm.xlu1 %2967, %v1964_v29   ;;  %2082 = vperm.xlu2 %2968, %v1952_v3  }
 0x612   : >> { %2074 = vperm.xlu0 %2966, %v1948_v34   ;;  %v2013_v34 = vld [vmem:[#allocation4 + $0x90] sm:$0xff] }
 0x618   : >> { %v1978_v26 = vpop.permute.xlu2 %1977  ;;  %v1960_v35 = vpop.permute.xlu0 %1959 }
 0x619   : >> { %v1968_v48 = vpop.permute.xlu1 %1967  ;;  %2126 = vperm.xlu1 %2967, %v1978_v26   ;;  %2094 = vperm.xlu2 %2968, %v1960_v35   ;;  %v2023_v26 = vld [vmem:[#allocation4 + $0xe0] sm:$0xff]  ;;  %v2006_v35 = vld [vmem:[#allocation4 + $0x58] sm:$0xff] }
 0x61a   : >> { %2110 = vperm.xlu0 %2966, %v1968_v48  }
 0x620   : >> { %v1990_v2 = vpop.permute.xlu2 %1989  ;;  %v1972_v24 = vpop.permute.xlu0 %1971 }
 0x621   : >> { %v1982_v50 = vpop.permute.xlu1 %1981  ;;  %2118 = vperm.xlu2 %2968, %v1972_v24  }
 0x622   : >> { %2134 = vperm.xlu0 %2966, %v1982_v50  }
 0x628   : >> { %v1970_v36 = vpop.permute.xlu2 %1969  ;;  %v1986_v37 = vpop.permute.xlu0 %1985 }
 0x629   : >> { %v1962_v5 = vpop.permute.xlu1 %1961  ;;  %2114 = vperm.xlu1 %2967, %v1970_v36   ;;  %2142 = vperm.xlu2 %2968, %v1986_v37  }
 0x62a   : >> { %2098 = vperm.xlu0 %2966, %v1962_v5   ;;  %v2019_v5 = vld [vmem:[#allocation4 + $0xc0] sm:$0xff] }
 0x630   : >> { %v1984_v39 = vpop.permute.xlu2 %1983  ;;  %v1966_v32 = vpop.permute.xlu0 %1965 }
 0x631   : >> { %v1974_v41 = vpop.permute.xlu1 %1973  ;;  %2138 = vperm.xlu1 %2967, %v1984_v39   ;;  %2106 = vperm.xlu2 %2968, %v1966_v32   ;;  %v2014_v39 = vld [vmem:[#allocation4 + $0x98] sm:$0xff]  ;;  %v2015_v32 = vld [vmem:[#allocation4 + $0xa0] sm:$0xff] }
 0x632   : >> { %2122 = vperm.xlu0 %2966, %v1974_v41  }
 0x638   : >> { %v1980_v15 = vpop.permute.xlu0 %1979 }
 0x639   : >> { %v1988_v53 = vpop.permute.xlu1 %1987  ;;  %2150 = vperm.xlu1 %2967, %v1990_v2   ;;  %2130 = vperm.xlu2 %2968, %v1980_v15  }
 0x63a   : >> { %2146 = vperm.xlu0 %2966, %v1988_v53  }
 0x640   : >> { %v1992_v46 = vpop.permute.xlu0 %1991 }
 0x641   : >> { %2154 = vperm.xlu2 %2968, %v1992_v46  }
 0x643   : >> { %v2055_v59 = vpop.permute.xlu1 %2054  ;;  %v2047_v27 = vpop.permute.xlu2 %2046 }
 0x644   : >> { %v2163_v30 = vsel %vm3910_vm8, %v2055_v59, %v2001_v56  ;;  %v2161_v18 = vsel %vm3910_vm8, %v2047_v27, %v1999_v54  ;;  %v2020_v59 = vld [vmem:[#allocation4 + $0xc8] sm:$0xff]  ;;  %v2021_v27 = vld [vmem:[#allocation4 + $0xd0] sm:$0xff] }
 0x645   : >> { %2196 = vst.msk [vmem:[#allocation4 + $0x30] sm:$0xff] %vm2189_vm14, %v2163_v30 }
 0x646   : >> { %2194 = vst.msk [vmem:[#allocation4 + $0x20] sm:$0xff] %vm2189_vm14, %v2161_v18 }
 0x64b   : >> { %v2079_v7 = vpop.permute.xlu1 %2078  ;;  %v2071_v8 = vpop.permute.xlu2 %2070 }
 0x64c   : >> { %v2169_v38 = vsel %vm3910_vm8, %v2079_v7, %v2007_v63  ;;  %v2167_v47 = vsel %vm3910_vm8, %v2071_v8, %v2005_v57  ;;  %v2016_v7 = vld [vmem:[#allocation4 + $0xa8] sm:$0xff]  ;;  %v2026_v8 = vld [vmem:[#allocation4 + $0xf8] sm:$0xff] }
 0x64d   : >> { %2202 = vst.msk [vmem:[#allocation4 + $0x60] sm:$0xff] %vm2189_vm14, %v2169_v38  ;;  %v2012_v38 = vld [vmem:[#allocation4 + $0x88] sm:$0xff] }
 0x64e   : >> { %2200 = vst.msk [vmem:[#allocation4 + $0x50] sm:$0xff] %vm2189_vm14, %v2167_v47 }
 0x65c   : >> { %v2039_v43 = vpop.permute.xlu0 %2038 }
 0x65d   : >> { %v2159_v52 = vsel %vm3910_vm8, %v2039_v43, %v1997_v19 }
 0x65e   : >> { %2192 = vst.msk [vmem:[#allocation4 + $0x10] sm:$0xff] %vm2189_vm14, %v2159_v52 }
 0x663   : >> { %v2043_v10 = vpop.permute.xlu1 %2042  ;;  %v2059_v12 = vpop.permute.xlu2 %2058 }
 0x664   : >> { %v2160_v31 = vsel %vm3910_vm8, %v2043_v10, %v1998_v62  ;;  %v2164_v13 = vsel %vm3910_vm8, %v2059_v12, %v2002_v49  ;;  %v2063_v42 = vpop.permute.xlu0 %2062  ;;  %v2018_v10 = vld [vmem:[#allocation4 + $0xb8] sm:$0xff] }
 0x665   : >> { %2193 = vst.msk [vmem:[#allocation4 + $0x18] sm:$0xff] %vm2189_vm14, %v2160_v31  ;;  %v2165_v16 = vsel %vm3910_vm8, %v2063_v42, %v2003_v40  ;;  %v2022_v40 = vld [vmem:[#allocation4 + $0xd8] sm:$0xff] }
 0x666   : >> { %2197 = vst.msk [vmem:[#allocation4 + $0x38] sm:$0xff] %vm2189_vm14, %v2164_v13 }
 0x667   : >> { %2198 = vst.msk [vmem:[#allocation4 + $0x40] sm:$0xff] %vm2189_vm14, %v2165_v16  ;;  %v2025_v16 = vld [vmem:[#allocation4 + $0xf0] sm:$0xff] }
 0x66b   : >> { %v2067_v9 = vpop.permute.xlu1 %2066  ;;  %v2083_v44 = vpop.permute.xlu2 %2082 }
 0x66c   : >> { %v2166_v14 = vsel %vm3910_vm8, %v2067_v9, %v2004_v6  ;;  %v2170_v20 = vsel %vm3910_vm8, %v2083_v44, %v2008_v55  ;;  %v2087_v45 = vpop.permute.xlu0 %2086  ;;  %v2024_v6 = vld [vmem:[#allocation4 + $0xe8] sm:$0xff] }
 0x66d   : >> { %2199 = vst.msk [vmem:[#allocation4 + $0x48] sm:$0xff] %vm2189_vm14, %v2166_v14  ;;  %v2171_v51 = vsel %vm3910_vm8, %v2087_v45, %v2009_v17 }
 0x66e   : >> { %2203 = vst.msk [vmem:[#allocation4 + $0x68] sm:$0xff] %vm2189_vm14, %v2170_v20 }
 0x66f   : >> { %2204 = vst.msk [vmem:[#allocation4 + $0x70] sm:$0xff] %vm2189_vm14, %v2171_v51 }
 0x673   : >> { %v2091_v23 = vpop.permute.xlu1 %2090  ;;  %v2095_v11 = vpop.permute.xlu2 %2094 }
 0x674   : >> { %v2172_v25 = vsel %vm3910_vm8, %v2091_v23, %v2010_v21  ;;  %v2173_v61 = vsel %vm3910_vm8, %v2095_v11, %v2011_v22  ;;  %v3040_v21 = vmov (%p391_p4), 0   ;;  %v2234_v23 = vld [vmem:[#allocation4 + $0x60] sm:$0xff] (%p391_p4) }
 0x675   : >> { %2205 = vst.msk [vmem:[#allocation4 + $0x78] sm:$0xff] %vm2189_vm14, %v2172_v25  ;;  %v2235_v33 = vld [vmem:[#allocation4 + $0x68] sm:$0xff] (%p391_p4)  ;;  %2970 = vset.pattern.permute.xlu1 (%p391_p4), %v3040_v21  ;;  %2969 = vset.pattern.permute.xlu0 (%p391_p4), %v3040_v21 }
 0x676   : >> { %2206 = vst.msk [vmem:[#allocation4 + $0x80] sm:$0xff] %vm2189_vm14, %v2173_v61  ;;  %v2236_v20 = vld [vmem:[#allocation4 + $0x70] sm:$0xff] (%p391_p4)  ;;  %2361 = vperm.xlu1 (%p391_p4), %2970, %v2296_v1   ;;  %2971 = vset.pattern.permute.xlu2 (%p391_p4), %v3040_v21  ;;  %v2509_v1 = vld [vmem:[%s4337_s8] sm:$0xff] (%p391_p4) }
 0x677   : > { %v2232_v61 = vld [vmem:[#allocation4 + $0x50] sm:$0xff] (%p391_p4) }
 0x678   : > { %v2264_v21 = vld [vmem:[%s4334_s5 + $0x50] sm:$0xff] (%p391_p4) }
 0x67b   : >> { %v2119_v4 = vpop.permute.xlu2 %2118 }
 0x67c   : >> { %v2179_v58 = vsel %vm3910_vm8, %v2119_v4, %v2017_v60  ;;  %v2051_v29 = vpop.permute.xlu0 %2050  ;;  %v2237_v14 = vld [vmem:[#allocation4 + $0x78] sm:$0xff] (%p391_p4)  ;;  %v2298_v60 = vld [vmem:[%s4335_s6 + $0x70] sm:$0xff] (%p391_p4)  ;;  %v2231_v4 = vld [vmem:[#allocation4 + $0x48] sm:$0xff] (%p391_p4) }
 0x67d   : >> { %2212 = vst.msk [vmem:[#allocation4 + $0xb0] sm:$0xff] %vm2189_vm14, %v2179_v58  ;;  %v2162_v3 = vsel %vm3910_vm8, %v2051_v29, %v2000_v28  ;;  %2374 = vmatpush.msra.mxu0 (%p391_p4), %v2237_v14  ;;  %2871 = vmatpush.msra.mxu3 (%p391_p4), %v2237_v14  ;;  %v2295_v29 = vld [vmem:[%s4335_s6 + $0x58] sm:$0xff] (%p391_p4)  ;;  %v2262_v14 = vld [vmem:[%s4334_s5 + $0x40] sm:$0xff] (%p391_p4) }
 0x67e   : >> { %2195 = vst.msk [vmem:[#allocation4 + $0x28] sm:$0xff] %vm2189_vm14, %v2162_v3  ;;  %2371 = vperm.xlu0 (%p391_p4), %2969, %v2298_v60   ;;  %v2230_v3 = vld [vmem:[#allocation4 + $0x40] sm:$0xff] (%p391_p4)  ;;  %2356 = vperm.xlu1 (%p391_p4), %2970, %v2295_v29   ;;  %v2267_v60 = vld [vmem:[%s4334_s5 + $0x68] sm:$0xff] (%p391_p4) }
 0x67f   : > { %2375 = vmatpush.msra.mxu0 (%p391_p4), %v2236_v20  ;;  %2872 = vmatpush.msra.mxu3 (%p391_p4), %v2236_v20  ;;  %v2277_v20 = vld [vmem:[%s4334_s5 + $0xb8] sm:$0xff] (%p391_p4)  ;;  %v2283_v29 = vld [vmem:[%s4334_s5 + $0xe8] sm:$0xff] (%p391_p4) }
 0x681   : > { %2376 = vmatpush.msra.mxu0 (%p391_p4), %v2235_v33  ;;  %2873 = vmatpush.msra.mxu3 (%p391_p4), %v2235_v33  ;;  %v2512_v33 = vld [vmem:[%s4337_s8 + $0x18] sm:$0xff] (%p391_p4) }
 0x683   : >> { %v2103_v48 = vpop.permute.xlu1 %2102  ;;  %v2143_v2 = vpop.permute.xlu2 %2142  ;;  %2377 = vmatpush.msra.mxu0 (%p391_p4), %v2234_v23  ;;  %2874 = vmatpush.msra.mxu3 (%p391_p4), %v2234_v23  ;;  %v2265_v23 = vld [vmem:[%s4334_s5 + $0x58] sm:$0xff] (%p391_p4) }
 0x684   : >> { %v2175_v24 = vsel %vm3910_vm8, %v2103_v48, %v2013_v34  ;;  %v2185_v50 = vsel %vm3910_vm8, %v2143_v2, %v2023_v26  ;;  %v2075_v36 = vpop.permute.xlu0 %2074  ;;  %v2294_v26 = vld [vmem:[%s4335_s6 + $0x50] sm:$0xff] (%p391_p4)  ;;  %v2297_v2 = vld [vmem:[%s4335_s6 + $0x68] sm:$0xff] (%p391_p4) }
 0x685   : >> { %2208 = vst.msk [vmem:[#allocation4 + $0x90] sm:$0xff] %vm2189_vm14, %v2175_v24  ;;  %v2168_v37 = vsel %vm3910_vm8, %v2075_v36, %v2006_v35  ;;  %v2229_v35 = vld [vmem:[#allocation4 + $0x38] sm:$0xff] (%p391_p4)  ;;  %v2228_v24 = vld [vmem:[#allocation4 + $0x30] sm:$0xff] (%p391_p4)  ;;  %2351 = vperm.xlu2 (%p391_p4), %2971, %v2294_v26   ;;  %v2227_v36 = vld [vmem:[#allocation4 + $0x28] sm:$0xff] (%p391_p4) }
 0x686   : >> { %2218 = vst.msk [vmem:[#allocation4 + $0xe0] sm:$0xff] %vm2189_vm14, %v2185_v50  ;;  %v4054_v50 = vld [vmem:[#allocation4 + $0xb0] sm:$0xff] (%p391_p4)  ;;  %2366 = vperm.xlu0 (%p391_p4), %2969, %v2297_v2   ;;  %v2270_v26 = vld [vmem:[%s4334_s5 + $0x80] sm:$0xff] (%p391_p4) }
 0x687   : >> { %2201 = vst.msk [vmem:[#allocation4 + $0x58] sm:$0xff] %vm2189_vm14, %v2168_v37  ;;  %v2272_v2 = vld [vmem:[%s4334_s5 + $0x90] sm:$0xff] (%p391_p4) }
 0x68b   : >> { %v2127_v41 = vpop.permute.xlu1 %2126  ;;  %v2107_v15 = vpop.permute.xlu2 %2106 }
 0x68c   : >> { %v2181_v53 = vsel %vm3910_vm8, %v2127_v41, %v2019_v5  ;;  %v2176_v46 = vsel %vm3910_vm8, %v2107_v15, %v2014_v39  ;;  %v2111_v56 = vpop.permute.xlu0 %2110  ;;  %v2291_v5 = vld [vmem:[%s4335_s6 + $0x38] sm:$0xff] (%p391_p4)  ;;  %v2226_v39 = vld [vmem:[#allocation4 + $0x20] sm:$0xff] (%p391_p4)  ;;  %v2293_v41 = vld [vmem:[%s4335_s6 + $0x48] sm:$0xff] (%p391_p4) }
 0x68d   : >> { %2214 = vst.msk [vmem:[#allocation4 + $0xc0] sm:$0xff] %vm2189_vm14, %v2181_v53  ;;  %v2177_v54 = vsel %vm3910_vm8, %v2111_v56, %v2015_v32  ;;  %v4021_v0 = vld [vmem:[#allocation4 + $0xe0] sm:$0xff] (%p391_p4)  ;;  %v2225_v15 = vld [vmem:[#allocation4 + $0x18] sm:$0xff] (%p391_p4)  ;;  %2336 = vperm.xlu1 (%p391_p4), %2970, %v2291_v5   ;;  %v2224_v56 = vld [vmem:[#allocation4 + $0x10] sm:$0xff] (%p391_p4)  ;;  %2346 = vperm.xlu2 (%p391_p4), %2971, %v2293_v41  }
 0x68e   : >> { %2209 = vst.msk [vmem:[#allocation4 + $0x98] sm:$0xff] %vm2189_vm14, %v2176_v46  ;;  %v2233_v11 = vld [vmem:[#allocation4 + $0x58] sm:$0xff] (%p391_p4)  ;;  %v2292_v46 = vld [vmem:[%s4335_s6 + $0x40] sm:$0xff] (%p391_p4) }
 0x68f   : >> { %2210 = vst.msk [vmem:[#allocation4 + $0xa0] sm:$0xff] %vm2189_vm14, %v2177_v54  ;;  %2378 = vmatpush.msra.mxu0 (%p391_p4), %v2233_v11  ;;  %2875 = vmatpush.msra.mxu3 (%p391_p4), %v2233_v11  ;;  %v4075_v54 = vld [vmem:[#allocation4 + $0x90] sm:$0xff] (%p391_p4)  ;;  %v2517_v11 = vld [vmem:[%s4337_s8 + $0x40] sm:$0xff] (%p391_p4) }
 0x690   : > { %2341 = vperm.xlu0 (%p391_p4), %2969, %v2292_v46  }
 0x691   : > { %2379 = vmatpush.msra.mxu0 (%p391_p4), %v2232_v61  ;;  %2876 = vmatpush.msra.mxu3 (%p391_p4), %v2232_v61  ;;  %v2281_v61 = vld [vmem:[%s4334_s5 + $0xd8] sm:$0xff] (%p391_p4) }
 0x693   : >> { %v2131_v30 = vpop.permute.xlu2 %2130  ;;  %2380 = vmatpush.msra.mxu0 (%p391_p4), %v2231_v4  ;;  %2877 = vmatpush.msra.mxu3 (%p391_p4), %v2231_v4  ;;  %v2514_v4 = vld [vmem:[%s4337_s8 + $0x28] sm:$0xff] (%p391_p4) }
 0x694   : >> { %v2182_v18 = vsel %vm3910_vm8, %v2131_v30, %v2020_v59  ;;  %v2135_v63 = vpop.permute.xlu0 %2134  ;;  %v4042_v34 = vld [vmem:[#allocation4 + $0xc0] sm:$0xff] (%p391_p4)  ;;  %v2223_v59 = vld [vmem:[#allocation4 + $0x8] sm:$0xff] (%p391_p4) }
 0x695   : >> { %2215 = vst.msk [vmem:[#allocation4 + $0xc8] sm:$0xff] %vm2189_vm14, %v2182_v18  ;;  %v2183_v57 = vsel %vm3910_vm8, %v2135_v63, %v2021_v27  ;;  %2381 = vmatpush.msra.mxu0 (%p391_p4), %v2230_v3  ;;  %2878 = vmatpush.msra.mxu3 (%p391_p4), %v2230_v3  ;;  %v4069_v53 = vld [vmem:[#allocation4 + $0x98] sm:$0xff] (%p391_p4)  ;;  %v2288_v30 = vld [vmem:[%s4335_s6 + $0x20] sm:$0xff] (%p391_p4) }
 0x696   : >> { %2216 = vst.msk [vmem:[#allocation4 + $0xd0] sm:$0xff] %vm2189_vm14, %v2183_v57  ;;  %v4063_v32 = vld [vmem:[#allocation4 + $0xa0] sm:$0xff] (%p391_p4)  ;;  %v2276_v57 = vld [vmem:[%s4334_s5 + $0xb0] sm:$0xff] (%p391_p4)  ;;  %2321 = vperm.xlu1 (%p391_p4), %2970, %v2288_v30   ;;  %v2269_v3 = vld [vmem:[%s4334_s5 + $0x78] sm:$0xff] (%p391_p4) }
 0x697   : > { %2382 = vmatpush.msra.mxu0 (%p391_p4), %v2229_v35  ;;  %2879 = vmatpush.msra.mxu3 (%p391_p4), %v2229_v35  ;;  %v2222_v18 = vld [vmem:[#allocation4] sm:$0xff] (%p391_p4)  ;;  %v2271_v35 = vld [vmem:[%s4334_s5 + $0x88] sm:$0xff] (%p391_p4) }
 0x698   : > { %v2254_v63 = vld [vmem:[%s4334_s5] sm:$0xff] (%p391_p4) }
 0x699   : > { %2383 = vmatpush.msra.mxu0 (%p391_p4), %v2228_v24  ;;  %2880 = vmatpush.msra.mxu3 (%p391_p4), %v2228_v24  ;;  %v2273_v24 = vld [vmem:[%s4334_s5 + $0x98] sm:$0xff] (%p391_p4) }
 0x69b   : >> { %v2115_v47 = vpop.permute.xlu1 %2114  ;;  %v2155_v19 = vpop.permute.xlu2 %2154  ;;  %2384 = vmatpush.msra.mxu0 (%p391_p4), %v2227_v36  ;;  %2881 = vmatpush.msra.mxu3 (%p391_p4), %v2227_v36  ;;  %v2275_v36 = vld [vmem:[%s4334_s5 + $0xa8] sm:$0xff] (%p391_p4) }
 0x69c   : >> { %v2178_v43 = vsel %vm3910_vm8, %v2115_v47, %v2016_v7  ;;  %v2188_v52 = vsel %vm3910_vm8, %v2155_v19, %v2026_v8  ;;  %v2099_v62 = vpop.permute.xlu0 %2098  ;;  %v4036_v58 = vld [vmem:[#allocation4 + $0xc8] sm:$0xff] (%p391_p4)  ;;  %v4091_v7 = vld [vmem:[#allocation4 + $0x80] sm:$0xff] (%p391_p4) }
 0x69d   : >> { %2211 = vst.msk [vmem:[#allocation4 + $0xa8] sm:$0xff] %vm2189_vm14, %v2178_v43  ;;  %v2174_v49 = vsel %vm3910_vm8, %v2099_v62, %v2012_v38  ;;  %v4033_v28 = vld [vmem:[#allocation4 + $0xd0] sm:$0xff] (%p391_p4)  ;;  %2385 = vmatpush.msra.mxu0 (%p391_p4), %v2226_v39  ;;  %2882 = vmatpush.msra.mxu3 (%p391_p4), %v2226_v39  ;;  %v2255_v8 = vld [vmem:[%s4334_s5 + $0x8] sm:$0xff] (%p391_p4)  ;;  %v2257_v62 = vld [vmem:[%s4334_s5 + $0x18] sm:$0xff] (%p391_p4) }
 0x69e   : >> { %2221 = vst.msk [vmem:[#allocation4 + $0xf8] sm:$0xff] %vm2189_vm14, %v2188_v52  ;;  %v2290_v38 = vld [vmem:[%s4335_s6 + $0x30] sm:$0xff] (%p391_p4)  ;;  %v2289_v47 = vld [vmem:[%s4335_s6 + $0x28] sm:$0xff] (%p391_p4)  ;;  %v2278_v52 = vld [vmem:[%s4334_s5 + $0xc0] sm:$0xff] (%p391_p4) }
 0x69f   : >> { %2207 = vst.msk [vmem:[#allocation4 + $0x88] sm:$0xff] %vm2189_vm14, %v2174_v49  ;;  %2386 = vmatpush.msra.mxu0 (%p391_p4), %v2225_v15  ;;  %2883 = vmatpush.msra.mxu3 (%p391_p4), %v2225_v15  ;;  %v2285_v19 = vld [vmem:[%s4335_s6 + $0x8] sm:$0xff] (%p391_p4)  ;;  %v2256_v43 = vld [vmem:[%s4334_s5 + $0x10] sm:$0xff] (%p391_p4)  ;;  %v2287_v49 = vld [vmem:[%s4335_s6 + $0x18] sm:$0xff] (%p391_p4) }
 0x6a0   : > { %2331 = vperm.xlu2 (%p391_p4), %2971, %v2290_v38   ;;  %2326 = vperm.xlu0 (%p391_p4), %2969, %v2289_v47  }
 0x6a1   : > { %2387 = vmatpush.msra.mxu0 (%p391_p4), %v2224_v56  ;;  %2884 = vmatpush.msra.mxu3 (%p391_p4), %v2224_v56 }
 0x6a2   : > { %2306 = vperm.xlu1 (%p391_p4), %2970, %v2285_v19  }
 0x6a3   : >> { %v2139_v12 = vpop.permute.xlu1 %2138  ;;  %2388 = vmatpush.msra.mxu0 (%p391_p4), %v2223_v59  ;;  %2885 = vmatpush.msra.mxu3 (%p391_p4), %v2223_v59 }
 0x6a4   : >> { %v2184_v31 = vsel %vm3910_vm8, %v2139_v12, %v2022_v40  ;;  %v2123_v13 = vpop.permute.xlu0 %2122  ;;  %v4057_v37 = vld [vmem:[#allocation4 + $0xa8] sm:$0xff] (%p391_p4)  ;;  %v2286_v40 = vld [vmem:[%s4335_s6 + $0x10] sm:$0xff] (%p391_p4) }
 0x6a5   : >> { %2217 = vst.msk [vmem:[#allocation4 + $0xd8] sm:$0xff] %vm2189_vm14, %v2184_v31  ;;  %v2180_v42 = vsel %vm3910_vm8, %v2123_v13, %v2018_v10  ;;  %v4013_v45 = vld [vmem:[#allocation4 + $0xf8] sm:$0xff] (%p391_p4)  ;;  %2389 = vmatpush.msra.mxu0 (%p391_p4), %v2222_v18  ;;  %2886 = vmatpush.msra.mxu3 (%p391_p4), %v2222_v18  ;;  %v2258_v10 = vld [vmem:[%s4334_s5 + $0x20] sm:$0xff] (%p391_p4)  ;;  %v2280_v12 = vld [vmem:[%s4334_s5 + $0xd0] sm:$0xff] (%p391_p4) }
 0x6a6   : >> { %2213 = vst.msk [vmem:[#allocation4 + $0xb8] sm:$0xff] %vm2189_vm14, %v2180_v42  ;;  %2436 = vmatpush.msra.mxu1 (%p391_p4), %v4013_v45  ;;  %v4078_v27 = vld [vmem:[#allocation4 + $0x88] sm:$0xff] (%p391_p4)  ;;  %2390 = vmatmul.f32.vlgmr.msra.gmra.mxu0 (%p391_p4), %v2254_v63  ;;  %v2284_v13 = vld [vmem:[%s4335_s6] sm:$0xff] (%p391_p4)  ;;  %v2519_v42 = vld [vmem:[%s4337_s8 + $0x50] sm:$0xf] (%p391_p4) }
 0x6a7   : > { %2423 = vmatmul.f32.vlgmr.msra.gmra.mxu3 (%p391_p4), %v2276_v57  ;;  %v2259_v31 = vld [vmem:[%s4334_s5 + $0x28] sm:$0xff] (%p391_p4) }
 0x6a8   : > { %2887 = vmatpush.msrb.mxu3 (%p391_p4), %v4013_v45  ;;  %2316 = vperm.xlu2 (%p391_p4), %2971, %v2287_v49   ;;  %v2263_v45 = vld [vmem:[%s4334_s5 + $0x48] sm:$0xff] (%p391_p4) }
 0x6a9   : > { %2311 = vperm.xlu0 (%p391_p4), %2969, %v2286_v40  }
 0x6aa   : > { %393 = sbr.rel (!%p391_p4) target bundleno = 14 (0xe), region = 126 }
 0x6ab   : >> { %v2151_v55 = vpop.permute.xlu1 %2150 }
 0x6ac   : >> { %v2187_v17 = vsel %vm3910_vm8, %v2151_v55, %v2025_v16  ;;  %v2147_v9 = vpop.permute.xlu0 %2146  ;;  %v4027_v25 = vld [vmem:[#allocation4 + $0xd8] sm:$0xff] (%p391_p4)  ;;  %v2518_v16 = vld [vmem:[%s4337_s8 + $0x48] sm:$0xff] (%p391_p4)  ;;  %v2282_v55 = vld [vmem:[%s4334_s5 + $0xe0] sm:$0xff] (%p391_p4) }
 0x6ad   : >> { %2220 = vst.msk [vmem:[#allocation4 + $0xf0] sm:$0xff] %vm2189_vm14, %v2187_v17  ;;  %v2186_v44 = vsel %vm3910_vm8, %v2147_v9, %v2024_v6  ;;  %v4048_v48 = vld [vmem:[#allocation4 + $0xb8] sm:$0xff] (%p391_p4)  ;;  %2567 = vperm.xlu1 (%p391_p4), %2970, %v2518_v16   ;;  %v2260_v6 = vld [vmem:[%s4334_s5 + $0x30] sm:$0xff] (%p391_p4) }
 0x6ae   : >> { %2219 = vst.msk [vmem:[#allocation4 + $0xe8] sm:$0xff] %vm2189_vm14, %v2186_v44  ;;  %2393 = vmatmul.f32.gmra.mxu0 (%p391_p4), %v2256_v43  ;;  %v2261_v17 = vld [vmem:[%s4334_s5 + $0x38] sm:$0xff] (%p391_p4)  ;;  %v2515_v44 = vld [vmem:[%s4337_s8 + $0x30] sm:$0xff] (%p391_p4) }
 0x6af   : > { %2426 = vmatmul.f32.gmra.mxu3 %v2278_v52  ;;  %v2516_v9 = vld [vmem:[%s4337_s8 + $0x38] sm:$0xff] }
 0x6b0   : > { %2301 = vperm.xlu2 %2971, %v2284_v13  }
 0x6b1   : > { %2572 = vperm.xlu0 %2969, %v2519_v42  }
 0x6b4   : > { %v4015_v51 = vld [vmem:[#allocation4 + $0xf0] sm:$0xff] }
 0x6b5   : > { %v4018_v22 = vld [vmem:[#allocation4 + $0xe8] sm:$0xff]  ;;  %2437 = vmatpush.msra.mxu1 %v4015_v51  ;;  %2888 = vmatpush.msrb.mxu3 %v4015_v51  ;;  %v2513_v51 = vld [vmem:[%s4337_s8 + $0x20] sm:$0xff] }
 0x6b6   : > { %2396 = vmatmul.f32.gmra.mxu0 %v2258_v10  ;;  %2552 = vperm.xlu1 %2970, %v2515_v44  }
 0x6b7   : > { %2438 = vmatpush.msra.mxu1 %v4018_v22  ;;  %2889 = vmatpush.msrb.mxu3 %v4018_v22  ;;  %v2279_v22 = vld [vmem:[%s4334_s5 + $0xc8] sm:$0xff] }
 0x6b8   : > { %2429 = vmatmul.f32.gmra.mxu3 %v2280_v12  ;;  %2562 = vperm.xlu2 %2971, %v2517_v11  }
 0x6b9   : > { %2439 = vmatpush.msra.mxu1 %v4021_v0  ;;  %2890 = vmatpush.msrb.mxu3 %v4021_v0  ;;  %v2510_v0 = vld [vmem:[%s4337_s8 + $0x8] sm:$0xff] }
 0x6ba   : > { %2557 = vperm.xlu0 %2969, %v2516_v9  }
 0x6bb   : > { %2440 = vmatpush.msra.mxu1 %v4027_v25  ;;  %2891 = vmatpush.msrb.mxu3 %v4027_v25  ;;  %v2266_v25 = vld [vmem:[%s4334_s5 + $0x60] sm:$0xff] }
 0x6bd   : > { %2441 = vmatpush.msra.mxu1 %v4033_v28  ;;  %2892 = vmatpush.msrb.mxu3 %v4033_v28  ;;  %v2673_v28 = vld [vmem:[%s4339_s10 + $0x8] sm:$0x3] }
 0x6be   : > { %2399 = vmatmul.f32.gmra.mxu0 %v2260_v6  ;;  %2537 = vperm.xlu1 %2970, %v2512_v33  }
 0x6bf   : > { %2442 = vmatpush.msra.mxu1 %v4036_v58  ;;  %2893 = vmatpush.msrb.mxu3 %v4036_v58  ;;  %v2268_v58 = vld [vmem:[%s4334_s5 + $0x70] sm:$0xff] }
 0x6c0   : > { %2432 = vmatmul.f32.gmra.mxu3 %v2282_v55  ;;  %2547 = vperm.xlu2 %2971, %v2514_v4  }
 0x6c1   : > { %2443 = vmatpush.msra.mxu1 %v4042_v34  ;;  %2894 = vmatpush.msrb.mxu3 %v4042_v34  ;;  %v2511_v34 = vld [vmem:[%s4337_s8 + $0x10] sm:$0xff] }
 0x6c2   : > { %2542 = vperm.xlu0 %2969, %v2513_v51  }
 0x6c3   : > { %2444 = vmatpush.msra.mxu1 %v4048_v48  ;;  %2895 = vmatpush.msrb.mxu3 %v4048_v48  ;;  %v2672_v48 = vld [vmem:[%s4339_s10] sm:$0xff] }
 0x6c5   : > { %2445 = vmatpush.msra.mxu1 %v4054_v50  ;;  %2896 = vmatpush.msrb.mxu3 %v4054_v50  ;;  %v2274_v50 = vld [vmem:[%s4334_s5 + $0xa0] sm:$0xff] }
 0x6c6   : > { %2402 = vmatmul.f32.gmra.mxu0 %v2262_v14  ;;  %2522 = vperm.xlu1 %2970, %v2509_v1  }
 0x6c7   : > { %2446 = vmatpush.msra.mxu1 %v4057_v37  ;;  %2897 = vmatpush.msrb.mxu3 %v4057_v37 }
 0x6c8   : > { %2532 = vperm.xlu2 %2971, %v2511_v34  }
 0x6c9   : > { %2447 = vmatpush.msra.mxu1 %v4063_v32  ;;  %2898 = vmatpush.msrb.mxu3 %v4063_v32 }
 0x6ca   : > { %2527 = vperm.xlu0 %2969, %v2510_v0  }
 0x6cb   : > { %2448 = vmatpush.msra.mxu1 %v4069_v53  ;;  %2899 = vmatpush.msrb.mxu3 %v4069_v53 }
 0x6cd   : > { %2449 = vmatpush.msra.mxu1 %v4075_v54  ;;  %2900 = vmatpush.msrb.mxu3 %v4075_v54 }
 0x6ce   : > { %2405 = vmatmul.f32.gmra.mxu0 %v2264_v21 }
 0x6cf   : > { %2450 = vmatpush.msra.mxu1 %v4078_v27  ;;  %2901 = vmatpush.msrb.mxu3 %v4078_v27 }
 0x6d0   : > { %2676 = vperm.xlu2 %2971, %v2672_v48  }
 0x6d1   : > { %2451 = vmatpush.msra.mxu1 %v4091_v7  ;;  %2902 = vmatpush.msrb.mxu3 %v4091_v7 }
 0x6d2   : > { %2452 = vmatmul.f32.vlgmr.msra.gmra.mxu1 %v2255_v8  ;;  %2485 = vmatmul.f32.vlgmr.msrb.gmra.mxu3 %v2277_v20 }
 0x6d3   : > { %2681 = vperm.xlu0 %2969, %v2673_v28  }
 0x6d6   : > { %2408 = vmatmul.f32.gmra.mxu0 %v2266_v25 }
 0x6da   : > { %2455 = vmatmul.f32.gmra.mxu1 %v2257_v62  ;;  %2488 = vmatmul.f32.gmra.mxu3 %v2279_v22 }
 0x6de   : > { %2411 = vmatmul.f32.gmra.mxu0 %v2268_v58 }
 0x6df   : > { %v4251_v37 = vpop.permute.xlu2 %2351 }
 0x6e2   : > { %2458 = vmatmul.f32.gmra.mxu1 %v2259_v31  ;;  %2491 = vmatmul.f32.gmra.mxu3 %v2281_v61 }
 0x6e6   : > { %2414 = vmatmul.f32.gmra.mxu0 %v2270_v26 }
 0x6e7   : > { %v2347_v39 = vpop.permute.xlu2 %2346 }
 0x6e8   : > { %v2362_v5 = vpop.permute.xlu1 %2361 }
 0x6ea   : > { %2461 = vmatmul.f32.gmra.mxu1 %v2261_v17  ;;  %2494 = vmatmul.f32.gmra.mxu3 %v2283_v29 }
 0x6ee   : > { %2417 = vmatmul.f32.gmra.mxu0 %v2272_v2 }
 0x6f0   : > { %v2372_v32 = vpop.permute.xlu0 %2371  ;;  %v2357_v41 = vpop.permute.xlu1 %2356 }
 0x6f2   : > { %2464 = vmatmul.f32.gmra.mxu1 %v2263_v45 }
 0x6f6   : > { %2420 = vmatmul.f32.gmra.mxu0 %v2274_v50 }
 0x6f8   : > { %v2367_v53 = vpop.permute.xlu0 %2366 }
 0x6fa   : > { %2467 = vmatmul.f32.gmra.mxu1 %v2265_v23  ;;  %v4253_v15 = vpop.permute.xlu2 %2331 }
 0x6ff   : > { %v2337_v46 = vpop.permute.xlu1 %2336 }
 0x702   : > { %2470 = vmatmul.f32.gmra.mxu1 %v2267_v60  ;;  %v2317_v56 = vpop.permute.xlu2 %2316  ;;  %v2342_v54 = vpop.permute.xlu0 %2341 }
 0x708   : > { %v4255_v59 = vpop.permute.xlu1 %2321 }
 0x70a   : > { %2473 = vmatmul.f32.gmra.mxu1 %v2269_v3  ;;  %v2302_v27 = vpop.permute.xlu2 %2301 }
 0x712   : > { %2476 = vmatmul.f32.gmra.mxu1 %v2271_v35  ;;  %v2327_v7 = vpop.permute.xlu0 %2326 }
 0x714   : > { %v2307_v38 = vpop.permute.xlu1 %2306 }
 0x71a   : > { %2479 = vmatmul.f32.gmra.mxu1 %v2273_v24 }
 0x71b   : > { %v2312_v49 = vpop.permute.xlu0 %2311 }
 0x722   : > { %2482 = vmatmul.f32.gmra.mxu1 %v2275_v36 }
 0x723   : > { %v2391_v30 = vpop.f32.mrf.mxu0 }
 0x724   : > { %v2392_v18 = vadd.f32 %v2391_v30, %v2302_v27 }
 0x72a   : > { %v2424_v8 = vpop.f32.mrf.mxu3 }
 0x72b   : > { %v2394_v47 = vpop.f32.mrf.mxu0  ;;  %v2425_v29 = vadd.f32 %v2424_v8, %v2357_v41  ;;  %v2504_v8 = vld [vmem:[%s4336_s7 + $0x30] sm:$0xff] }
 0x72c   : > { %v2395_v19 = vadd.f32 %v2394_v47, %v2307_v38  ;;  %v2505_v38 = vld [vmem:[%s4336_s7 + $0x38] sm:$0xff]  ;;  %v2506_v47 = vld [vmem:[%s4336_s7 + $0x40] sm:$0xff] }
 0x732   : > { %v2427_v62 = vpop.f32.mrf.mxu3 }
 0x733   : > { %v2397_v40 = vpop.f32.mrf.mxu0  ;;  %v2428_v28 = vadd.f32 %v2427_v62, %v2362_v5 }
 0x734   : > { %v2398_v10 = vadd.f32 %v2397_v40, %v2312_v49 }
 0x73b   : > { %v2430_v13 = vpop.f32.mrf.mxu3  ;;  %v2400_v42 = vpop.f32.mrf.mxu0 }
 0x73c   : > { %v2401_v16 = vadd.f32 %v2400_v42, %v2317_v56  ;;  %v2431_v25 = vadd.f32 %v2430_v13, %v2367_v53 }
 0x743   : > { %v2433_v17 = vpop.f32.mrf.mxu3  ;;  %v2403_v9 = vpop.f32.mrf.mxu0 }
 0x744   : > { %v2434_v1 = vadd.f32 %v2433_v17, %v2372_v32  ;;  %v2563_v17 = vpop.permute.xlu2 %2562 }
 0x74b   : > { %v2406_v20 = vpop.f32.mrf.mxu0 }
 0x74c   : > { %v2407_v27 = vadd.f32 %v2406_v20, %v2327_v7  ;;  %v2503_v7 = vld [vmem:[%s4336_s7 + $0x28] sm:$0xff] }
 0x74f   : > { %v2453_v63 = vpop.f32.mrf.mxu1 }
 0x750   : > { %v4257_v57 = vadd.f32 %v2453_v63, %v2392_v18  ;;  %v2404_v18 = vadd.f32 %v2403_v9, %v4255_v59  ;;  %v2501_v59 = vld [vmem:[%s4336_s7 + $0x18] sm:$0xff] }
 0x753   : > { %v2409_v33 = vpop.f32.mrf.mxu0 }
 0x754   : > { %v2410_v56 = vadd.f32 %v2409_v33, %v4253_v15  ;;  %v2498_v15 = vld [vmem:[%s4336_s7] sm:$0xff] }
 0x755   : > { %v2486_v14 = vpop.f32.mrf.mxu3 }
 0x756   : > { %v2487_v34 = vadd.f32 %v2486_v14, %v2425_v29 }
 0x757   : > { %v2456_v43 = vpop.f32.mrf.mxu1 }
 0x758   : > { %v4259_v52 = vadd.f32 %v2456_v43, %v2395_v19  ;;  %v2507_v19 = vld [vmem:[%s4336_s7 + $0x48] sm:$0xff]  ;;  %v2508_v43 = vld [vmem:[%s4336_s7 + $0x50] sm:$0xf] }
 0x75b   : > { %v2412_v23 = vpop.f32.mrf.mxu0 }
 0x75c   : > { %v2413_v53 = vadd.f32 %v2412_v23, %v2337_v46  ;;  %v2499_v46 = vld [vmem:[%s4336_s7 + $0x8] sm:$0xff] }
 0x75d   : > { %v2489_v51 = vpop.f32.mrf.mxu3 }
 0x75e   : > { %v2490_v3 = vadd.f32 %v2489_v51, %v2428_v28 }
 0x75f   : > { %v2459_v12 = vpop.f32.mrf.mxu1 }
 0x760   : > { %v2460_v31 = vadd.f32 %v2459_v12, %v2398_v10 }
 0x763   : > { %v2415_v60 = vpop.f32.mrf.mxu0 }
 0x764   : > { %v2416_v36 = vadd.f32 %v2415_v60, %v2342_v54  ;;  %v2500_v54 = vld [vmem:[%s4336_s7 + $0x10] sm:$0xff] }
 0x765   : > { %v2492_v22 = vpop.f32.mrf.mxu3 }
 0x766   : > { %v2493_v4 = vadd.f32 %v2492_v22, %v2431_v25 }
 0x767   : > { %v2462_v6 = vpop.f32.mrf.mxu1 }
 0x768   : > { %v2463_v55 = vadd.f32 %v2462_v6, %v2401_v16  ;;  %v2573_v16 = vpop.permute.xlu0 %2572  ;;  %v2568_v6 = vpop.permute.xlu1 %2567 }
 0x76b   : > { %v2418_v26 = vpop.f32.mrf.mxu0 }
 0x76c   : > { %v2419_v2 = vadd.f32 %v2418_v26, %v2347_v39 }
 0x76d   : > { %v2495_v11 = vpop.f32.mrf.mxu3 }
 0x76e   : > { %v2496_v61 = vadd.f32 %v2495_v11, %v2434_v1 }
 0x76f   : > { %v2465_v44 = vpop.f32.mrf.mxu1 }
 0x770   : > { %2610 = vmatpush.msra.mxu2 %v2496_v61  ;;  %v2558_v9 = vpop.permute.xlu0 %2557 }
 0x772   : > { %2611 = vmatpush.msra.mxu2 %v2493_v4 }
 0x773   : > { %v2421_v48 = vpop.f32.mrf.mxu0 }
 0x774   : > { %2612 = vmatpush.msra.mxu2 %v2490_v3  ;;  %v2422_v24 = vadd.f32 %v2421_v48, %v4251_v37  ;;  %v2466_v37 = vadd.f32 %v2465_v44, %v2404_v18  ;;  %v2553_v44 = vpop.permute.xlu1 %2552 }
 0x776   : > { %2613 = vmatpush.msra.mxu2 %v2487_v34 }
 0x777   : > { %v2468_v45 = vpop.f32.mrf.mxu1 }
 0x778   : > { %v2469_v39 = vadd.f32 %v2468_v45, %v2407_v27 }
 0x77c   : > { %v2538_v25 = vpop.permute.xlu1 %2537 }
 0x77f   : > { %v2471_v21 = vpop.f32.mrf.mxu1 }
 0x780   : > { %v2472_v63 = vadd.f32 %v2471_v21, %v2410_v56  ;;  %v2548_v21 = vpop.permute.xlu2 %2547  ;;  %v2671_v56 = vld [vmem:[%s4338_s9 + $0x8] sm:$0x3] }
 0x787   : > { %v2474_v0 = vpop.f32.mrf.mxu1 }
 0x788   : > { %v2475_v30 = vadd.f32 %v2474_v0, %v2413_v53  ;;  %v2543_v0 = vpop.permute.xlu0 %2542  ;;  %v2533_v3 = vpop.permute.xlu2 %2532 }
 0x78f   : > { %v2477_v58 = vpop.f32.mrf.mxu1 }
 0x790   : > { %v2478_v41 = vadd.f32 %v2477_v58, %v2416_v36  ;;  %v2677_v27 = vpop.permute.xlu2 %2676 }
 0x797   : > { %v2480_v35 = vpop.f32.mrf.mxu1 }
 0x798   : > { %v2481_v5 = vadd.f32 %v2480_v35, %v2419_v2  ;;  %v2528_v35 = vpop.permute.xlu0 %2527 }
 0x79f   : > { %v2483_v50 = vpop.f32.mrf.mxu1 }
 0x7a0   : > { %v2484_v32 = vadd.f32 %v2483_v50, %v2422_v24  ;;  %v2523_v24 = vpop.permute.xlu1 %2522  ;;  %v2682_v18 = vpop.permute.xlu0 %2681 }
 0x7a2   : > { %2614 = vmatpush.msra.mxu2 %v2484_v32 }
 0x7a4   : > { %2615 = vmatpush.msra.mxu2 %v2481_v5  ;;  %v2670_v5 = vld [vmem:[%s4338_s9] sm:$0xff] }
 0x7a6   : > { %2616 = vmatpush.msra.mxu2 %v2478_v41 }
 0x7a8   : > { %2617 = vmatpush.msra.mxu2 %v2475_v30 }
 0x7aa   : > { %2618 = vmatpush.msra.mxu2 %v2472_v63 }
 0x7ac   : > { %2619 = vmatpush.msra.mxu2 %v2469_v39 }
 0x7ae   : > { %2620 = vmatpush.msra.mxu2 %v2466_v37 }
 0x7b0   : > { %2621 = vmatpush.msra.mxu2 %v2463_v55 }
 0x7b2   : > { %2622 = vmatpush.msra.mxu2 %v2460_v31 }
 0x7b4   : > { %2623 = vmatpush.msra.mxu2 %v4259_v52 }
 0x7b6   : > { %2624 = vmatpush.msra.mxu2 %v4257_v57  ;;  %v2502_v57 = vld [vmem:[%s4336_s7 + $0x20] sm:$0xff] }
 0x7b7   : > { %2852 = vmatmul.msk.f32.vlgmr.msra.gmra.mxu2 %vm1024_vm5, %v2498_v15 }
 0x7bf   : > { %2853 = vmatmul.msk.f32.gmra.mxu2 %vm1024_vm5, %v2499_v46 }
 0x7c7   : > { %2854 = vmatmul.msk.f32.gmra.mxu2 %vm1024_vm5, %v2500_v54 }
 0x7cf   : > { %2855 = vmatmul.msk.f32.gmra.mxu2 %vm1024_vm5, %v2501_v59 }
 0x7d7   : > { %2856 = vmatmul.msk.f32.gmra.mxu2 %vm1024_vm5, %v2502_v57 }
 0x7df   : > { %2857 = vmatmul.msk.f32.gmra.mxu2 %vm1024_vm5, %v2503_v7 }
 0x7e7   : > { %2858 = vmatmul.msk.f32.gmra.mxu2 %vm1024_vm5, %v2504_v8 }
 0x7ef   : > { %2859 = vmatmul.msk.f32.gmra.mxu2 %vm1024_vm5, %v2505_v38 }
 0x7f7   : > { %2860 = vmatmul.msk.f32.gmra.mxu2 %vm1024_vm5, %v2506_v47 }
 0x7ff   : > { %2861 = vmatmul.msk.f32.gmra.mxu2 %vm1024_vm5, %v2507_v19 }
 0x807   : > { %2862 = vmatmul.msk.f32.gmra.mxu2 %vm1024_vm5, %v2508_v43  ;;  %vm2722_vm5 = vcmask 25600  }
 0x83a   : > { %v2626_v52 = vpop.f32.mrf.mxu2 }
 0x83b   : > { %v2627_v50 = vadd.f32 %v2626_v52, %v2523_v24 }
 0x83d   : > { %v2659_v53 = vmax.f32 %v2627_v50, 0.0 }
 0x842   : > { %v2629_v62 = vpop.f32.mrf.mxu2 }
 0x843   : > { %v2630_v48 = vadd.f32 %v2629_v62, %v2528_v35 }
 0x845   : > { %v2660_v32 = vmax.f32 %v2630_v48, 0.0 }
 0x84a   : > { %v2632_v49 = vpop.f32.mrf.mxu2 }
 0x84b   : > { %v2633_v34 = vadd.f32 %v2632_v49, %v2533_v3 }
 0x84d   : > { %v2661_v36 = vmax.f32 %v2633_v34, 0.0 }
 0x852   : > { %v2635_v40 = vpop.f32.mrf.mxu2 }
 0x853   : > { %v2636_v58 = vadd.f32 %v2635_v40, %v2538_v25 }
 0x855   : > { %v2662_v2 = vmax.f32 %v2636_v58, 0.0 }
 0x85a   : > { %v2638_v10 = vpop.f32.mrf.mxu2 }
 0x85b   : > { %v2639_v28 = vadd.f32 %v2638_v10, %v2543_v0 }
 0x85d   : > { %v2663_v26 = vmax.f32 %v2639_v28, 0.0 }
 0x862   : > { %v2641_v12 = vpop.f32.mrf.mxu2 }
 0x863   : > { %v2642_v61 = vadd.f32 %v2641_v12, %v2548_v21 }
 0x865   : > { %v2664_v29 = vmax.f32 %v2642_v61, 0.0 }
 0x86a   : > { %v2644_v31 = vpop.f32.mrf.mxu2 }
 0x86b   : > { %v2645_v1 = vadd.f32 %v2644_v31, %v2553_v44 }
 0x86d   : > { %v2665_v4 = vmax.f32 %v2645_v1, 0.0 }
 0x872   : > { %v2647_v13 = vpop.f32.mrf.mxu2 }
 0x873   : > { %v2648_v22 = vadd.f32 %v2647_v13, %v2558_v9 }
 0x875   : > { %v2666_v60 = vmax.f32 %v2648_v22, 0.0 }
 0x87a   : > { %v2650_v42 = vpop.f32.mrf.mxu2 }
 0x87b   : > { %v2651_v51 = vadd.f32 %v2650_v42, %v2563_v17 }
 0x87d   : > { %v2667_v11 = vmax.f32 %v2651_v51, 0.0 }
 0x882   : > { %v2653_v55 = vpop.f32.mrf.mxu2 }
 0x883   : > { %v2654_v20 = vadd.f32 %v2653_v55, %v2568_v6 }
 0x885   : > { %v2668_v23 = vmax.f32 %v2654_v20, 0.0 }
 0x88a   : > { %v2656_v14 = vpop.f32.mrf.mxu2 }
 0x88b   : > { %v2657_v45 = vadd.f32 %v2656_v14, %v2573_v16 }
 0x88d   : > { %v2669_v33 = vmax.f32 %v2657_v45, 0.0 }
 0x88f   : > { %2863 = vmatpush.msk.msra.mxu3 %vm2691_vm4, %v2669_v33 }
 0x891   : > { %2701 = vmatpush.msra.mxu3 %v2668_v23 }
 0x893   : > { %2702 = vmatpush.msra.mxu3 %v2667_v11 }
 0x895   : > { %2703 = vmatpush.msra.mxu3 %v2666_v60 }
 0x897   : > { %2704 = vmatpush.msra.mxu3 %v2665_v4 }
 0x899   : > { %2705 = vmatpush.msra.mxu3 %v2664_v29 }
 0x89b   : > { %2706 = vmatpush.msra.mxu3 %v2663_v26 }
 0x89d   : > { %2707 = vmatpush.msra.mxu3 %v2662_v2 }
 0x89f   : > { %2708 = vmatpush.msra.mxu3 %v2661_v36 }
 0x8a1   : > { %2709 = vmatpush.msra.mxu3 %v2660_v32 }
 0x8a3   : > { %2710 = vmatpush.msra.mxu3 %v2659_v53 }
 0x8a4   : > { %2864 = vmatmul.msk.f32.vlgmr.msra.gmra.mxu3 %vm1344_vm0, %v2670_v5 }
 0x8ac   : > { %2865 = vmatmul.msk.f32.gmra.mxu3 %vm1344_vm0, %v2671_v56 }
 0x927   : > { %v2712_v41 = vpop.f32.mrf.mxu3 }
 0x928   : > { %v2713_v30 = vadd.f32 %v2712_v41, %v2677_v27 }
 0x92a   : > { %v2718_v39 = vmax.f32 %v2713_v30, 0.0 }
 0x92c   : > { %v2721_v46 = vsel %vm2189_vm14, %v2718_v39, -inf }
 0x92f   : > { %v2715_v63 = vpop.f32.mrf.mxu3 }
 0x930   : > { %v2716_v37 = vadd.f32 %v2715_v63, %v2682_v18 }
 0x932   : > { %v2719_v15 = vmax.f32 %v2716_v37, 0.0 }
 0x934   : > { %v2723_v54 = vsel %vm2722_vm5, %v2719_v15, -inf }
 0x935   : > { %v2724_v59 = vmax.f32 %v2721_v46, %v2723_v54 }
 0x937   : > { %v2725_v57 = vrot.slane %v2724_v59, 4 }
 0x939   : > { %v2726_v7 = vmax.f32 %v2724_v59, %v2725_v57 }
 0x93b   : > { %v2727_v8 = vrot.slane %v2726_v7, 2 }
 0x93d   : > { %v2728_v38 = vmax.f32 %v2726_v7, %v2727_v8 }
 0x93f   : > { %v2729_v47 = vrot.slane %v2728_v38, 1 }
 0x941   : > { %v2730_v19 = vmax.f32 %v2728_v38, %v2729_v47 }
 0x943   : > { %v2731_v43 = vsub.f32 %v2718_v39, %v2730_v19  ;;  %v2732_v52 = vsub.f32 %v2719_v15, %v2730_v19 }
 0x945   : > { %v2733_v62 = vmul.f32 1.442695, %v2731_v43  ;;  %v2735_v49 = vmul.f32 1.442695, %v2732_v52 }
 0x947   : > { %2972 = vpow2.f32 %v2733_v62 }
 0x948   : > { %2974 = vpow2.f32 %v2735_v49 }
 0x94d   : > { %v2973_v40 = vpop.eup %2972 }
 0x94e   : > { %v2975_v10 = vpop.eup %2974  ;;  %v2737_v12 = vsel %vm2189_vm14, %v2973_v40, 0.0 }
 0x94f   : > { %v2738_v31 = vsel %vm2722_vm5, %v2975_v10, 0.0 }
 0x950   : > { %v2739_v13 = vadd.f32 %v2738_v31, %v2737_v12 }
 0x952   : > { %v2740_v42 = vrot.slane %v2739_v13, 4 }
 0x954   : > { %v2741_v16 = vadd.f32 %v2740_v42, %v2739_v13 }
 0x956   : > { %v2742_v6 = vrot.slane %v2741_v16, 2 }
 0x958   : > { %v2743_v55 = vadd.f32 %v2742_v6, %v2741_v16 }
 0x95a   : > { %v2744_v17 = vrot.slane %v2743_v55, 1 }
 0x95c   : > { %v2745_v9 = vadd.f32 %v2744_v17, %v2743_v55 }
 0x95e   : > { %2976 = vlog2.f32 %v2745_v9 }
 0x964   : > { %v2977_v44 = vpop.eup %2976 }
 0x965   : > { %v2747_v14 = vmul.f32 0.6931472, %v2977_v44 }
 0x967   : > { %v2748_v20 = vsub.f32 %v2731_v43, %v2747_v14  ;;  %v2749_v45 = vsub.f32 %v2732_v52, %v2747_v14 }
 0x969   : > { %2750 = vst.msk [vmem:[%s3120_s26] sm:$0xff] %vm2189_vm14, %v2748_v20 }
 0x96a   : > { %2751 = vst.msk [vmem:[%s3120_s26 + $0x8] sm:$0x3] %vm2722_vm5, %v2749_v45 }
 0x96b PF: > { %s21_s17 = sadd.s32 1, %s2988_s17  }
 0x96c   : > { %p18_p5 = scmp.ge.s32.totalorder %s21_s17, 4  }
 0x96e   :  { %20 = sbr.rel (!%p18_p5) target bundleno = 1 (0x1), region = 137 }

</bundles_post_ra>
